<compile_context>
chip_gen: v7x
topology: tpu7x:2x2x1
jax: 0.10.0
libtpu: 0.0.40
codegen_flags: <defaults>
</compile_context>

<pallas_src>
import jax
import jax.numpy as jnp
from jax.experimental import pallas as pl
from jax.experimental.pallas import tpu as pltpu


# ----------------------------------------------------------------------------
# Kernel
# ----------------------------------------------------------------------------
def _linear_ln_lrelu(x, w_ref, b_ref, g_ref, beta_ref, *, slope, ln_eps):
    """Fused Linear -> LayerNorm -> LeakyReLU on a (tn, D) VMEM-resident tile."""
    h = jnp.dot(x, w_ref[...],
                preferred_element_type=jnp.float32,
                precision=jax.lax.Precision.HIGHEST)
    h = h + b_ref[...]
    mu = jnp.mean(h, axis=-1, keepdims=True)
    var = jnp.mean(jnp.square(h - mu), axis=-1, keepdims=True)
    h = (h - mu) * jax.lax.rsqrt(var + ln_eps)
    h = h * g_ref[...] + beta_ref[...]
    return jnp.where(h >= 0.0, h, slope * h)


def _make_nerf_forward_kernel(nl_points, nl_color, emb_half, points_scale,
                              *, slope=0.01, ln_eps=1e-5):
    n_p = 4 * nl_points + 2
    n_c = 4 * nl_color + 2

    def kernel(*refs):
        idx_ref, pe_scale_ref, pe_bias_ref = refs[0], refs[1], refs[2]
        p_params = refs[3:3 + n_p]
        c_params = refs[3 + n_p:3 + n_p + n_c]
        points_ref = refs[3 + n_p + n_c]
        colors_ref = refs[3 + n_p + n_c + 1]

        # Gaussian PE: phase = 2*pi*(2*idx/(S-1) - 1 + eps) * bvals, with the
        # affine folded into pe_scale/pe_bias (duplicated to full 2H lanes).
        # Pure f32 VPU broadcast multiply -- no MXU precision risk on the
        # O(60 rad) phases.  The embedding never leaves VMEM.
        idx = idx_ref[...]                                        # (tn, 1)
        proj = idx * pe_scale_ref[...] + pe_bias_ref[...]         # (tn, 2H)
        col = jax.lax.broadcasted_iota(jnp.int32, proj.shape, 1)
        emb = jnp.where(col < emb_half, jnp.sin(proj), jnp.cos(proj))

        def run_mlp(x, params, n_layers):
            for l in range(n_layers):
                w, b, g, be = params[4 * l:4 * l + 4]
                x = _linear_ln_lrelu(x, w, b, g, be, slope=slope, ln_eps=ln_eps)
            w_out, b_out = params[4 * n_layers], params[4 * n_layers + 1]
            return jnp.dot(x, w_out[...],
                           preferred_element_type=jnp.float32,
                           precision=jax.lax.Precision.HIGHEST) + b_out[...]

        points = run_mlp(emb, p_params, nl_points)                # (tn, 2P)
        colors = run_mlp(emb, c_params, nl_color)                 # (tn, 3)

        # Module post-processing fused: points_prediction_scale and sigmoid.
        points_ref[...] = (points_scale * points).astype(points_ref.dtype)
        colors_ref[...] = (1.0 / (1.0 + jnp.exp(-colors))).astype(colors_ref.dtype)

    return kernel


# ----------------------------------------------------------------------------
# One-time parameter preparation / folding
# ----------------------------------------------------------------------------
def fold_pe_params(bvals, num_shapes, eps):
    """bvals: (H, 1) Gaussian freqs -> lane-dense (1, 2H) scale/bias such that
        idx * scale + bias == 2*pi * ((2*idx/(S-1) - 1 + eps) * bvals)
    duplicated across both sin and cos halves. Exact up to f32 rounding."""
    b = bvals[:, 0].astype(jnp.float32)                      # (H,)
    two_pi = 2.0 * jnp.pi
    scale = (two_pi * 2.0 / (num_shapes - 1)) * b            # (H,)
    bias = (two_pi * (eps - 1.0)) * b                        # (H,)
    scale2 = jnp.concatenate([scale, scale])[None, :]        # (1, 2H)
    bias2 = jnp.concatenate([bias, bias])[None, :]           # (1, 2H)
    return scale2, bias2


def init_nerf_params(key, *, num_strokes, input_dim, intermediate_dim,
                     total_num_points, num_layers, scale=10, pe_eps=1e-4):
    """Random params matching NerfMLPMulti's default-config layer shapes.
    Linear weights stored as (in, out) so the kernel computes x @ W."""
    k_pe, k_p, k_c = jax.random.split(key, 3)
    H = input_dim // 2
    bvals = jax.random.normal(k_pe, (H, 1), jnp.float32) * scale
    pe_scale, pe_bias = fold_pe_params(bvals, num_strokes, pe_eps)

    def make_mlp(k, in_dim, inter, out_dim, layers):
        ks = jax.random.split(k, 3 * layers + 2)
        flat, d_in = [], in_dim
        for l in range(layers):
            w = jax.random.normal(ks[3 * l], (d_in, inter), jnp.float32) / jnp.sqrt(d_in)
            b = jax.random.normal(ks[3 * l + 1], (1, inter), jnp.float32) * 0.02
            g = 1.0 + 0.05 * jax.random.normal(ks[3 * l + 2], (1, inter), jnp.float32)
            be = jnp.zeros((1, inter), jnp.float32)
            flat += [w, b, g, be]
            d_in = inter
        w_out = jax.random.normal(ks[-2], (d_in, out_dim), jnp.float32) / jnp.sqrt(d_in)
        b_out = jax.random.normal(ks[-1], (1, out_dim), jnp.float32) * 0.02
        flat += [w_out, b_out]
        return tuple(flat)

    return {
        "bvals": bvals,
        "pe_scale": pe_scale,
        "pe_bias": pe_bias,
        "points_mlp": make_mlp(k_p, input_dim, intermediate_dim,
                               2 * total_num_points, num_layers),
        "color_mlp": make_mlp(k_c, input_dim, intermediate_dim, 3, num_layers),
    }


# ----------------------------------------------------------------------------
# Tile sizing / VMEM budget (review items: grid steps for v7x, explicit limit)
# ----------------------------------------------------------------------------
def _pick_row_tile(n_rows, *, max_tile=512, min_rows_to_split=128, target_steps=4):
    """Cap row tile at 512 rows and, for larger N, force >= `target_steps`
    grid steps so both v7x TensorCores get work and the output DMA of tile
    i-1 overlaps compute of tile i.  Tiny N stays a single tile."""
    if n_rows <= min_rows_to_split:
        return int(n_rows)
    t = min(max_tile, n_rows)
    per_step = -(-n_rows // target_steps)          # cdiv
    per_step = -(-per_step // 8) * 8               # round up to multiple of 8
    t = min(t, per_step)
    t = max(8, (t // 8) * 8)
    return int(t)


def _round_tile(t, n_rows):
    """Round caller-supplied tiles to a multiple of 8 ((8,128) constraint)
    unless they cover all rows."""
    t = int(min(t, n_rows))
    if t >= n_rows:
        return int(n_rows)
    return max(8, (t // 8) * 8)


def _vmem_limit_bytes(tn, out_points, param_arrays):
    params_bytes = sum(int(a.size) * 4 for a in param_arrays)
    io_bytes = 4 * tn * (1 + out_points + 3) * 2      # double-buffered in/out tiles
    act_bytes = 4 * tn * 128 * 8                      # embedding + activations headroom
    total = params_bytes + io_bytes + act_bytes
    return int(min(max(4 * total, 8 << 20), 32 << 20))


# ----------------------------------------------------------------------------
# Wrapper: fused NerfMLPMulti forward (default config)
# ----------------------------------------------------------------------------
def nerf_mlp_multi_forward(indices, params, *, num_strokes,
                           points_prediction_scale=0.1, row_tile=None):
    """indices: (N,) float stroke ids.  Returns (strokes, widths, opacities, colors)
    with the same shapes/semantics as NerfMLPMulti.forward (default config)."""
    N = int(indices.shape[0])
    idx = indices.reshape(N, 1).astype(jnp.float32)

    pe_scale, pe_bias = params["pe_scale"], params["pe_bias"]
    p_flat, c_flat = params["points_mlp"], params["color_mlp"]
    nl_p = (len(p_flat) - 2) // 4
    nl_c = (len(c_flat) - 2) // 4
    emb_half = pe_scale.shape[-1] // 2
    out_points = p_flat[-1].shape[-1]

    tn = _round_tile(row_tile, N) if row_tile is not None else _pick_row_tile(N)
    grid = (pl.cdiv(N, tn),)

    def resident(a):
        return pl.BlockSpec(tuple(a.shape), lambda i: (0,) * a.ndim)

    in_specs = ([pl.BlockSpec((tn, 1), lambda i: (i, 0)),
                 resident(pe_scale), resident(pe_bias)]
                + [resident(a) for a in p_flat]
                + [resident(a) for a in c_flat])

    kernel = _make_nerf_forward_kernel(nl_p, nl_c, emb_half,
                                       points_prediction_scale)

    vmem_limit = _vmem_limit_bytes(tn, out_points,
                                   (pe_scale, pe_bias) + p_flat + c_flat)

    points, colors = pl.pallas_call(
        kernel,
        out_shape=(jax.ShapeDtypeStruct((N, out_points), jnp.float32),
                   jax.ShapeDtypeStruct((N, 3), jnp.float32)),
        grid=grid,
        in_specs=in_specs,
        out_specs=(pl.BlockSpec((tn, out_points), lambda i: (i, 0)),
                   pl.BlockSpec((tn, 3), lambda i: (i, 0))),
        compiler_params=pltpu.CompilerParams(
            dimension_semantics=("parallel",),      # megacore-shardable on v7x
            vmem_limit_bytes=vmem_limit,
        ),
    )(idx, pe_scale, pe_bias, *p_flat, *c_flat)

    # Host-side layout-only post-processing (matches the torch module):
    strokes = points.reshape(N, -1, 2)[None]        # scale already applied in kernel
    colors = colors.T                               # sigmoid already applied in kernel
    widths = jnp.ones((1, num_strokes), jnp.float32) * 1.5
    opacities = jnp.ones((1, num_strokes), jnp.float32)
    return strokes, widths, opacities, colors


# ----------------------------------------------------------------------------
# Pure-JAX reference (torch-faithful math)
# ----------------------------------------------------------------------------
def reference_forward(indices, params, *, num_strokes, points_prediction_scale=0.1,
                      pe_eps=1e-4, slope=0.01, ln_eps=1e-5):
    HI = jax.lax.Precision.HIGHEST
    x = indices.reshape(-1, 1).astype(jnp.float32)
    x = 2.0 * (x / (num_strokes - 1)) - 1.0 + pe_eps
    proj = 2.0 * jnp.pi * jnp.dot(x, params["bvals"].T, precision=HI)
    emb = jnp.concatenate([jnp.sin(proj), jnp.cos(proj)], axis=-1)

    def mlp(h, flat):
        n_layers = (len(flat) - 2) // 4
        for l in range(n_layers):
            w, b, g, be = flat[4 * l:4 * l + 4]
            z = jnp.dot(h, w, precision=HI) + b
            mu = z.mean(-1, keepdims=True)
            var = ((z - mu) ** 2).mean(-1, keepdims=True)
            z = (z - mu) / jnp.sqrt(var + ln_eps) * g + be
            h = jnp.where(z >= 0, z, slope * z)
        return jnp.dot(h, flat[-2], precision=HI) + flat[-1]

    points = mlp(emb, params["points_mlp"])
    colors = mlp(emb, params["color_mlp"])
    strokes = points_prediction_scale * points.reshape(points.shape[0], -1, 2)[None]
    colors = jax.nn.sigmoid(colors.T)
    widths = jnp.ones((1, num_strokes), jnp.float32) * 1.5
    opacities = jnp.ones((1, num_strokes), jnp.float32)
    return strokes, widths, opacities, colors


if __name__ == "__main__":
    # NerfMLPMulti default-config hyper-params at small shapes.
    num_strokes = 16
    total_num_points = 64            # -> output_dim_points = 128 (lane-aligned)
    input_dim = 128
    intermediate_dim = 128
    num_layers = 2
    points_prediction_scale = 0.1
    TOL = 2e-3

    key = jax.random.PRNGKey(0)
    k_params, k_params2 = jax.random.split(key)

    # Case 1: the module's real call pattern (N = num_strokes = 16, one tile).
    params = init_nerf_params(k_params, num_strokes=num_strokes, input_dim=input_dim,
                              intermediate_dim=intermediate_dim,
                              total_num_points=total_num_points, num_layers=num_layers)
    indices = jnp.arange(num_strokes, dtype=jnp.float32)

    out = nerf_mlp_multi_forward(indices, params, num_strokes=num_strokes,
                                 points_prediction_scale=points_prediction_scale)
    strokes, widths, opacities, colors = jax.block_until_ready(out)
    r_strokes, r_widths, r_opac, r_colors = reference_forward(
        indices, params, num_strokes=num_strokes,
        points_prediction_scale=points_prediction_scale)

    assert strokes.shape == (1, num_strokes, total_num_points, 2), strokes.shape
    assert colors.shape == (3, num_strokes), colors.shape
    assert widths.shape == (1, num_strokes) and opacities.shape == (1, num_strokes)
    assert float(jnp.max(jnp.abs(strokes - r_strokes))) < TOL
    assert float(jnp.max(jnp.abs(colors - r_colors))) < TOL
    assert float(jnp.max(jnp.abs(widths - r_widths))) == 0.0
    assert float(jnp.max(jnp.abs(opacities - r_opac))) == 0.0

    # Case 2: larger stroke count exercising the row-tiled "parallel" grid
    # (4 tiles of 80 rows -> both v7x TCs get steps, output DMA overlaps compute).
    num_strokes2 = 320
    params2 = init_nerf_params(k_params2, num_strokes=num_strokes2, input_dim=input_dim,
                               intermediate_dim=intermediate_dim,
                               total_num_points=total_num_points, num_layers=num_layers)
    indices2 = jnp.arange(num_strokes2, dtype=jnp.float32)
    out2 = nerf_mlp_multi_forward(indices2, params2, num_strokes=num_strokes2,
                                  points_prediction_scale=points_prediction_scale)
    strokes2, widths2, opac2, colors2 = jax.block_until_ready(out2)
    ref2 = reference_forward(indices2, params2, num_strokes=num_strokes2,
                             points_prediction_scale=points_prediction_scale)
    assert strokes2.shape == (1, num_strokes2, total_num_points, 2), strokes2.shape
    assert colors2.shape == (3, num_strokes2), colors2.shape
    assert float(jnp.max(jnp.abs(strokes2 - ref2[0]))) < TOL
    assert float(jnp.max(jnp.abs(colors2 - ref2[3]))) < TOL

    print("KERNEL_OK")
</pallas_src>

<mosaic_0001>
module attributes {stable_mosaic.version = 11 : i64} {
  func.func @kernel(%arg0: i32, %arg1: memref<16x1xf32, #tpu.memory_space<vmem>>, %arg2: memref<1x128xf32, #tpu.memory_space<vmem>>, %arg3: memref<1x128xf32, #tpu.memory_space<vmem>>, %arg4: memref<128x128xf32, #tpu.memory_space<vmem>>, %arg5: memref<1x128xf32, #tpu.memory_space<vmem>>, %arg6: memref<1x128xf32, #tpu.memory_space<vmem>>, %arg7: memref<1x128xf32, #tpu.memory_space<vmem>>, %arg8: memref<128x128xf32, #tpu.memory_space<vmem>>, %arg9: memref<1x128xf32, #tpu.memory_space<vmem>>, %arg10: memref<1x128xf32, #tpu.memory_space<vmem>>, %arg11: memref<1x128xf32, #tpu.memory_space<vmem>>, %arg12: memref<128x128xf32, #tpu.memory_space<vmem>>, %arg13: memref<1x128xf32, #tpu.memory_space<vmem>>, %arg14: memref<128x128xf32, #tpu.memory_space<vmem>>, %arg15: memref<1x128xf32, #tpu.memory_space<vmem>>, %arg16: memref<1x128xf32, #tpu.memory_space<vmem>>, %arg17: memref<1x128xf32, #tpu.memory_space<vmem>>, %arg18: memref<128x128xf32, #tpu.memory_space<vmem>>, %arg19: memref<1x128xf32, #tpu.memory_space<vmem>>, %arg20: memref<1x128xf32, #tpu.memory_space<vmem>>, %arg21: memref<1x128xf32, #tpu.memory_space<vmem>>, %arg22: memref<128x3xf32, #tpu.memory_space<vmem>>, %arg23: memref<1x3xf32, #tpu.memory_space<vmem>>, %arg24: memref<16x128xf32, #tpu.memory_space<vmem>>, %arg25: memref<16x3xf32, #tpu.memory_space<vmem>>) attributes {dimension_semantics = [#tpu.dimension_semantics<parallel>], iteration_bounds = array<i64: 1>, scalar_prefetch = 0 : i64, scratch_operands = 0 : i64, tpu.core_type = #tpu.core_type<tc>, window_params = [{transform_indices = @transform_0, window_bounds = array<i64: 16, 1>}, {pipeline_mode = #tpu.pipeline_mode<synchronous>, transform_indices = @transform_1, window_bounds = array<i64: 1, 128>}, {pipeline_mode = #tpu.pipeline_mode<synchronous>, transform_indices = @transform_2, window_bounds = array<i64: 1, 128>}, {pipeline_mode = #tpu.pipeline_mode<synchronous>, transform_indices = @transform_3, window_bounds = array<i64: 128, 128>}, {pipeline_mode = #tpu.pipeline_mode<synchronous>, transform_indices = @transform_4, window_bounds = array<i64: 1, 128>}, {pipeline_mode = #tpu.pipeline_mode<synchronous>, transform_indices = @transform_5, window_bounds = array<i64: 1, 128>}, {pipeline_mode = #tpu.pipeline_mode<synchronous>, transform_indices = @transform_6, window_bounds = array<i64: 1, 128>}, {pipeline_mode = #tpu.pipeline_mode<synchronous>, transform_indices = @transform_7, window_bounds = array<i64: 128, 128>}, {pipeline_mode = #tpu.pipeline_mode<synchronous>, transform_indices = @transform_8, window_bounds = array<i64: 1, 128>}, {pipeline_mode = #tpu.pipeline_mode<synchronous>, transform_indices = @transform_9, window_bounds = array<i64: 1, 128>}, {pipeline_mode = #tpu.pipeline_mode<synchronous>, transform_indices = @transform_10, window_bounds = array<i64: 1, 128>}, {pipeline_mode = #tpu.pipeline_mode<synchronous>, transform_indices = @transform_11, window_bounds = array<i64: 128, 128>}, {pipeline_mode = #tpu.pipeline_mode<synchronous>, transform_indices = @transform_12, window_bounds = array<i64: 1, 128>}, {pipeline_mode = #tpu.pipeline_mode<synchronous>, transform_indices = @transform_13, window_bounds = array<i64: 128, 128>}, {pipeline_mode = #tpu.pipeline_mode<synchronous>, transform_indices = @transform_14, window_bounds = array<i64: 1, 128>}, {pipeline_mode = #tpu.pipeline_mode<synchronous>, transform_indices = @transform_15, window_bounds = array<i64: 1, 128>}, {pipeline_mode = #tpu.pipeline_mode<synchronous>, transform_indices = @transform_16, window_bounds = array<i64: 1, 128>}, {pipeline_mode = #tpu.pipeline_mode<synchronous>, transform_indices = @transform_17, window_bounds = array<i64: 128, 128>}, {pipeline_mode = #tpu.pipeline_mode<synchronous>, transform_indices = @transform_18, window_bounds = array<i64: 1, 128>}, {pipeline_mode = #tpu.pipeline_mode<synchronous>, transform_indices = @transform_19, window_bounds = array<i64: 1, 128>}, {pipeline_mode = #tpu.pipeline_mode<synchronous>, transform_indices = @transform_20, window_bounds = array<i64: 1, 128>}, {pipeline_mode = #tpu.pipeline_mode<synchronous>, transform_indices = @transform_21, window_bounds = array<i64: 128, 3>}, {pipeline_mode = #tpu.pipeline_mode<synchronous>, transform_indices = @transform_22, window_bounds = array<i64: 1, 3>}, {transform_indices = @transform_23, window_bounds = array<i64: 16, 128>}, {transform_indices = @transform_24, window_bounds = array<i64: 16, 3>}]} {
    %c0 = arith.constant 0 : index
    %c0_0 = arith.constant 0 : index
    %0 = vector.load %arg1[%c0, %c0_0] : memref<16x1xf32, #tpu.memory_space<vmem>>, vector<16x1xf32>
    %c0_1 = arith.constant 0 : index
    %c0_2 = arith.constant 0 : index
    %1 = vector.load %arg2[%c0_1, %c0_2] : memref<1x128xf32, #tpu.memory_space<vmem>>, vector<1x128xf32>
    %2 = vector.broadcast %0 : vector<16x1xf32> to vector<16x128xf32>
    %3 = vector.broadcast %1 : vector<1x128xf32> to vector<16x128xf32>
    %4 = arith.mulf %2, %3 : vector<16x128xf32>
    %c0_3 = arith.constant 0 : index
    %c0_4 = arith.constant 0 : index
    %5 = vector.load %arg3[%c0_3, %c0_4] : memref<1x128xf32, #tpu.memory_space<vmem>>, vector<1x128xf32>
    %6 = vector.broadcast %5 : vector<1x128xf32> to vector<16x128xf32>
    %7 = arith.addf %4, %6 : vector<16x128xf32>
    %8 = tpu.iota {dimensions = array<i32: 1>} : vector<16x128xi32>
    %c64_i32 = arith.constant 64 : i32
    %9 = vector.broadcast %c64_i32 : i32 to vector<16x128xi32>
    %10 = arith.cmpi slt, %8, %9 : vector<16x128xi32>
    %11 = math.sin %7 : vector<16x128xf32>
    %12 = math.cos %7 : vector<16x128xf32>
    %13 = arith.select %10, %11, %12 : vector<16x128xi1>, vector<16x128xf32>
    %c0_5 = arith.constant 0 : index
    %c0_6 = arith.constant 0 : index
    %14 = vector.load %arg4[%c0_5, %c0_6] : memref<128x128xf32, #tpu.memory_space<vmem>>, vector<128x128xf32>
    %cst = arith.constant dense<0.000000e+00> : vector<16x128xf32>
    %15 = tpu.matmul %13, %14, %cst {dimension_numbers = #tpu.dot_dimension_numbers<[1], [0], [0], [1], [0, 0, 1, 1], [], []>, precision = #tpu.contract_precision<fp32>} : vector<16x128xf32>, vector<128x128xf32>, vector<16x128xf32> -> vector<16x128xf32>
    %c0_7 = arith.constant 0 : index
    %c0_8 = arith.constant 0 : index
    %16 = vector.load %arg5[%c0_7, %c0_8] : memref<1x128xf32, #tpu.memory_space<vmem>>, vector<1x128xf32>
    %17 = vector.broadcast %16 : vector<1x128xf32> to vector<16x128xf32>
    %18 = arith.addf %15, %17 : vector<16x128xf32>
    %cst_9 = arith.constant dense<0.000000e+00> : vector<16xf32>
    %19 = vector.multi_reduction <add>, %18, %cst_9 [1] : vector<16x128xf32> to vector<16xf32>
    %20 = vector.shape_cast %19 : vector<16xf32> to vector<16x1xf32>
    %cst_10 = arith.constant 1.280000e+02 : f32
    %21 = vector.broadcast %cst_10 : f32 to vector<16x1xf32>
    %22 = arith.divf %20, %21 : vector<16x1xf32>
    %23 = vector.broadcast %22 : vector<16x1xf32> to vector<16x128xf32>
    %24 = arith.subf %18, %23 : vector<16x128xf32>
    %25 = arith.mulf %24, %24 : vector<16x128xf32>
    %cst_11 = arith.constant dense<0.000000e+00> : vector<16xf32>
    %26 = vector.multi_reduction <add>, %25, %cst_11 [1] : vector<16x128xf32> to vector<16xf32>
    %27 = vector.shape_cast %26 : vector<16xf32> to vector<16x1xf32>
    %cst_12 = arith.constant 1.280000e+02 : f32
    %28 = vector.broadcast %cst_12 : f32 to vector<16x1xf32>
    %29 = arith.divf %27, %28 : vector<16x1xf32>
    %30 = vector.broadcast %22 : vector<16x1xf32> to vector<16x128xf32>
    %31 = arith.subf %18, %30 : vector<16x128xf32>
    %cst_13 = arith.constant 9.99999974E-6 : f32
    %32 = vector.broadcast %cst_13 : f32 to vector<16x1xf32>
    %33 = arith.addf %29, %32 : vector<16x1xf32>
    %34 = math.rsqrt %33 : vector<16x1xf32>
    %35 = vector.broadcast %34 : vector<16x1xf32> to vector<16x128xf32>
    %36 = arith.mulf %31, %35 : vector<16x128xf32>
    %c0_14 = arith.constant 0 : index
    %c0_15 = arith.constant 0 : index
    %37 = vector.load %arg6[%c0_14, %c0_15] : memref<1x128xf32, #tpu.memory_space<vmem>>, vector<1x128xf32>
    %38 = vector.broadcast %37 : vector<1x128xf32> to vector<16x128xf32>
    %39 = arith.mulf %36, %38 : vector<16x128xf32>
    %c0_16 = arith.constant 0 : index
    %c0_17 = arith.constant 0 : index
    %40 = vector.load %arg7[%c0_16, %c0_17] : memref<1x128xf32, #tpu.memory_space<vmem>>, vector<1x128xf32>
    %41 = vector.broadcast %40 : vector<1x128xf32> to vector<16x128xf32>
    %42 = arith.addf %39, %41 : vector<16x128xf32>
    %cst_18 = arith.constant 0.000000e+00 : f32
    %43 = vector.broadcast %cst_18 : f32 to vector<16x128xf32>
    %44 = arith.cmpf oge, %42, %43 : vector<16x128xf32>
    %cst_19 = arith.constant 0.00999999977 : f32
    %45 = vector.broadcast %cst_19 : f32 to vector<16x128xf32>
    %46 = arith.mulf %45, %42 : vector<16x128xf32>
    %47 = arith.select %44, %42, %46 : vector<16x128xi1>, vector<16x128xf32>
    %c0_20 = arith.constant 0 : index
    %c0_21 = arith.constant 0 : index
    %48 = vector.load %arg8[%c0_20, %c0_21] : memref<128x128xf32, #tpu.memory_space<vmem>>, vector<128x128xf32>
    %cst_22 = arith.constant dense<0.000000e+00> : vector<16x128xf32>
    %49 = tpu.matmul %47, %48, %cst_22 {dimension_numbers = #tpu.dot_dimension_numbers<[1], [0], [0], [1], [0, 0, 1, 1], [], []>, precision = #tpu.contract_precision<fp32>} : vector<16x128xf32>, vector<128x128xf32>, vector<16x128xf32> -> vector<16x128xf32>
    %c0_23 = arith.constant 0 : index
    %c0_24 = arith.constant 0 : index
    %50 = vector.load %arg9[%c0_23, %c0_24] : memref<1x128xf32, #tpu.memory_space<vmem>>, vector<1x128xf32>
    %51 = vector.broadcast %50 : vector<1x128xf32> to vector<16x128xf32>
    %52 = arith.addf %49, %51 : vector<16x128xf32>
    %cst_25 = arith.constant dense<0.000000e+00> : vector<16xf32>
    %53 = vector.multi_reduction <add>, %52, %cst_25 [1] : vector<16x128xf32> to vector<16xf32>
    %54 = vector.shape_cast %53 : vector<16xf32> to vector<16x1xf32>
    %cst_26 = arith.constant 1.280000e+02 : f32
    %55 = vector.broadcast %cst_26 : f32 to vector<16x1xf32>
    %56 = arith.divf %54, %55 : vector<16x1xf32>
    %57 = vector.broadcast %56 : vector<16x1xf32> to vector<16x128xf32>
    %58 = arith.subf %52, %57 : vector<16x128xf32>
    %59 = arith.mulf %58, %58 : vector<16x128xf32>
    %cst_27 = arith.constant dense<0.000000e+00> : vector<16xf32>
    %60 = vector.multi_reduction <add>, %59, %cst_27 [1] : vector<16x128xf32> to vector<16xf32>
    %61 = vector.shape_cast %60 : vector<16xf32> to vector<16x1xf32>
    %cst_28 = arith.constant 1.280000e+02 : f32
    %62 = vector.broadcast %cst_28 : f32 to vector<16x1xf32>
    %63 = arith.divf %61, %62 : vector<16x1xf32>
    %64 = vector.broadcast %56 : vector<16x1xf32> to vector<16x128xf32>
    %65 = arith.subf %52, %64 : vector<16x128xf32>
    %cst_29 = arith.constant 9.99999974E-6 : f32
    %66 = vector.broadcast %cst_29 : f32 to vector<16x1xf32>
    %67 = arith.addf %63, %66 : vector<16x1xf32>
    %68 = math.rsqrt %67 : vector<16x1xf32>
    %69 = vector.broadcast %68 : vector<16x1xf32> to vector<16x128xf32>
    %70 = arith.mulf %65, %69 : vector<16x128xf32>
    %c0_30 = arith.constant 0 : index
    %c0_31 = arith.constant 0 : index
    %71 = vector.load %arg10[%c0_30, %c0_31] : memref<1x128xf32, #tpu.memory_space<vmem>>, vector<1x128xf32>
    %72 = vector.broadcast %71 : vector<1x128xf32> to vector<16x128xf32>
    %73 = arith.mulf %70, %72 : vector<16x128xf32>
    %c0_32 = arith.constant 0 : index
    %c0_33 = arith.constant 0 : index
    %74 = vector.load %arg11[%c0_32, %c0_33] : memref<1x128xf32, #tpu.memory_space<vmem>>, vector<1x128xf32>
    %75 = vector.broadcast %74 : vector<1x128xf32> to vector<16x128xf32>
    %76 = arith.addf %73, %75 : vector<16x128xf32>
    %cst_34 = arith.constant 0.000000e+00 : f32
    %77 = vector.broadcast %cst_34 : f32 to vector<16x128xf32>
    %78 = arith.cmpf oge, %76, %77 : vector<16x128xf32>
    %cst_35 = arith.constant 0.00999999977 : f32
    %79 = vector.broadcast %cst_35 : f32 to vector<16x128xf32>
    %80 = arith.mulf %79, %76 : vector<16x128xf32>
    %81 = arith.select %78, %76, %80 : vector<16x128xi1>, vector<16x128xf32>
    %c0_36 = arith.constant 0 : index
    %c0_37 = arith.constant 0 : index
    %82 = vector.load %arg12[%c0_36, %c0_37] : memref<128x128xf32, #tpu.memory_space<vmem>>, vector<128x128xf32>
    %cst_38 = arith.constant dense<0.000000e+00> : vector<16x128xf32>
    %83 = tpu.matmul %81, %82, %cst_38 {dimension_numbers = #tpu.dot_dimension_numbers<[1], [0], [0], [1], [0, 0, 1, 1], [], []>, precision = #tpu.contract_precision<fp32>} : vector<16x128xf32>, vector<128x128xf32>, vector<16x128xf32> -> vector<16x128xf32>
    %c0_39 = arith.constant 0 : index
    %c0_40 = arith.constant 0 : index
    %84 = vector.load %arg13[%c0_39, %c0_40] : memref<1x128xf32, #tpu.memory_space<vmem>>, vector<1x128xf32>
    %85 = vector.broadcast %84 : vector<1x128xf32> to vector<16x128xf32>
    %86 = arith.addf %83, %85 : vector<16x128xf32>
    %c0_41 = arith.constant 0 : index
    %c0_42 = arith.constant 0 : index
    %87 = vector.load %arg14[%c0_41, %c0_42] : memref<128x128xf32, #tpu.memory_space<vmem>>, vector<128x128xf32>
    %cst_43 = arith.constant dense<0.000000e+00> : vector<16x128xf32>
    %88 = tpu.matmul %13, %87, %cst_43 {dimension_numbers = #tpu.dot_dimension_numbers<[1], [0], [0], [1], [0, 0, 1, 1], [], []>, precision = #tpu.contract_precision<fp32>} : vector<16x128xf32>, vector<128x128xf32>, vector<16x128xf32> -> vector<16x128xf32>
    %c0_44 = arith.constant 0 : index
    %c0_45 = arith.constant 0 : index
    %89 = vector.load %arg15[%c0_44, %c0_45] : memref<1x128xf32, #tpu.memory_space<vmem>>, vector<1x128xf32>
    %90 = vector.broadcast %89 : vector<1x128xf32> to vector<16x128xf32>
    %91 = arith.addf %88, %90 : vector<16x128xf32>
    %cst_46 = arith.constant dense<0.000000e+00> : vector<16xf32>
    %92 = vector.multi_reduction <add>, %91, %cst_46 [1] : vector<16x128xf32> to vector<16xf32>
    %93 = vector.shape_cast %92 : vector<16xf32> to vector<16x1xf32>
    %cst_47 = arith.constant 1.280000e+02 : f32
    %94 = vector.broadcast %cst_47 : f32 to vector<16x1xf32>
    %95 = arith.divf %93, %94 : vector<16x1xf32>
    %96 = vector.broadcast %95 : vector<16x1xf32> to vector<16x128xf32>
    %97 = arith.subf %91, %96 : vector<16x128xf32>
    %98 = arith.mulf %97, %97 : vector<16x128xf32>
    %cst_48 = arith.constant dense<0.000000e+00> : vector<16xf32>
    %99 = vector.multi_reduction <add>, %98, %cst_48 [1] : vector<16x128xf32> to vector<16xf32>
    %100 = vector.shape_cast %99 : vector<16xf32> to vector<16x1xf32>
    %cst_49 = arith.constant 1.280000e+02 : f32
    %101 = vector.broadcast %cst_49 : f32 to vector<16x1xf32>
    %102 = arith.divf %100, %101 : vector<16x1xf32>
    %103 = vector.broadcast %95 : vector<16x1xf32> to vector<16x128xf32>
    %104 = arith.subf %91, %103 : vector<16x128xf32>
    %cst_50 = arith.constant 9.99999974E-6 : f32
    %105 = vector.broadcast %cst_50 : f32 to vector<16x1xf32>
    %106 = arith.addf %102, %105 : vector<16x1xf32>
    %107 = math.rsqrt %106 : vector<16x1xf32>
    %108 = vector.broadcast %107 : vector<16x1xf32> to vector<16x128xf32>
    %109 = arith.mulf %104, %108 : vector<16x128xf32>
    %c0_51 = arith.constant 0 : index
    %c0_52 = arith.constant 0 : index
    %110 = vector.load %arg16[%c0_51, %c0_52] : memref<1x128xf32, #tpu.memory_space<vmem>>, vector<1x128xf32>
    %111 = vector.broadcast %110 : vector<1x128xf32> to vector<16x128xf32>
    %112 = arith.mulf %109, %111 : vector<16x128xf32>
    %c0_53 = arith.constant 0 : index
    %c0_54 = arith.constant 0 : index
    %113 = vector.load %arg17[%c0_53, %c0_54] : memref<1x128xf32, #tpu.memory_space<vmem>>, vector<1x128xf32>
    %114 = vector.broadcast %113 : vector<1x128xf32> to vector<16x128xf32>
    %115 = arith.addf %112, %114 : vector<16x128xf32>
    %cst_55 = arith.constant 0.000000e+00 : f32
    %116 = vector.broadcast %cst_55 : f32 to vector<16x128xf32>
    %117 = arith.cmpf oge, %115, %116 : vector<16x128xf32>
    %cst_56 = arith.constant 0.00999999977 : f32
    %118 = vector.broadcast %cst_56 : f32 to vector<16x128xf32>
    %119 = arith.mulf %118, %115 : vector<16x128xf32>
    %120 = arith.select %117, %115, %119 : vector<16x128xi1>, vector<16x128xf32>
    %c0_57 = arith.constant 0 : index
    %c0_58 = arith.constant 0 : index
    %121 = vector.load %arg18[%c0_57, %c0_58] : memref<128x128xf32, #tpu.memory_space<vmem>>, vector<128x128xf32>
    %cst_59 = arith.constant dense<0.000000e+00> : vector<16x128xf32>
    %122 = tpu.matmul %120, %121, %cst_59 {dimension_numbers = #tpu.dot_dimension_numbers<[1], [0], [0], [1], [0, 0, 1, 1], [], []>, precision = #tpu.contract_precision<fp32>} : vector<16x128xf32>, vector<128x128xf32>, vector<16x128xf32> -> vector<16x128xf32>
    %c0_60 = arith.constant 0 : index
    %c0_61 = arith.constant 0 : index
    %123 = vector.load %arg19[%c0_60, %c0_61] : memref<1x128xf32, #tpu.memory_space<vmem>>, vector<1x128xf32>
    %124 = vector.broadcast %123 : vector<1x128xf32> to vector<16x128xf32>
    %125 = arith.addf %122, %124 : vector<16x128xf32>
    %cst_62 = arith.constant dense<0.000000e+00> : vector<16xf32>
    %126 = vector.multi_reduction <add>, %125, %cst_62 [1] : vector<16x128xf32> to vector<16xf32>
    %127 = vector.shape_cast %126 : vector<16xf32> to vector<16x1xf32>
    %cst_63 = arith.constant 1.280000e+02 : f32
    %128 = vector.broadcast %cst_63 : f32 to vector<16x1xf32>
    %129 = arith.divf %127, %128 : vector<16x1xf32>
    %130 = vector.broadcast %129 : vector<16x1xf32> to vector<16x128xf32>
    %131 = arith.subf %125, %130 : vector<16x128xf32>
    %132 = arith.mulf %131, %131 : vector<16x128xf32>
    %cst_64 = arith.constant dense<0.000000e+00> : vector<16xf32>
    %133 = vector.multi_reduction <add>, %132, %cst_64 [1] : vector<16x128xf32> to vector<16xf32>
    %134 = vector.shape_cast %133 : vector<16xf32> to vector<16x1xf32>
    %cst_65 = arith.constant 1.280000e+02 : f32
    %135 = vector.broadcast %cst_65 : f32 to vector<16x1xf32>
    %136 = arith.divf %134, %135 : vector<16x1xf32>
    %137 = vector.broadcast %129 : vector<16x1xf32> to vector<16x128xf32>
    %138 = arith.subf %125, %137 : vector<16x128xf32>
    %cst_66 = arith.constant 9.99999974E-6 : f32
    %139 = vector.broadcast %cst_66 : f32 to vector<16x1xf32>
    %140 = arith.addf %136, %139 : vector<16x1xf32>
    %141 = math.rsqrt %140 : vector<16x1xf32>
    %142 = vector.broadcast %141 : vector<16x1xf32> to vector<16x128xf32>
    %143 = arith.mulf %138, %142 : vector<16x128xf32>
    %c0_67 = arith.constant 0 : index
    %c0_68 = arith.constant 0 : index
    %144 = vector.load %arg20[%c0_67, %c0_68] : memref<1x128xf32, #tpu.memory_space<vmem>>, vector<1x128xf32>
    %145 = vector.broadcast %144 : vector<1x128xf32> to vector<16x128xf32>
    %146 = arith.mulf %143, %145 : vector<16x128xf32>
    %c0_69 = arith.constant 0 : index
    %c0_70 = arith.constant 0 : index
    %147 = vector.load %arg21[%c0_69, %c0_70] : memref<1x128xf32, #tpu.memory_space<vmem>>, vector<1x128xf32>
    %148 = vector.broadcast %147 : vector<1x128xf32> to vector<16x128xf32>
    %149 = arith.addf %146, %148 : vector<16x128xf32>
    %cst_71 = arith.constant 0.000000e+00 : f32
    %150 = vector.broadcast %cst_71 : f32 to vector<16x128xf32>
    %151 = arith.cmpf oge, %149, %150 : vector<16x128xf32>
    %cst_72 = arith.constant 0.00999999977 : f32
    %152 = vector.broadcast %cst_72 : f32 to vector<16x128xf32>
    %153 = arith.mulf %152, %149 : vector<16x128xf32>
    %154 = arith.select %151, %149, %153 : vector<16x128xi1>, vector<16x128xf32>
    %c0_73 = arith.constant 0 : index
    %c0_74 = arith.constant 0 : index
    %155 = vector.load %arg22[%c0_73, %c0_74] : memref<128x3xf32, #tpu.memory_space<vmem>>, vector<128x3xf32>
    %cst_75 = arith.constant dense<0.000000e+00> : vector<16x3xf32>
    %156 = tpu.matmul %154, %155, %cst_75 {dimension_numbers = #tpu.dot_dimension_numbers<[1], [0], [0], [1], [0, 0, 1, 1], [], []>, precision = #tpu.contract_precision<fp32>} : vector<16x128xf32>, vector<128x3xf32>, vector<16x3xf32> -> vector<16x3xf32>
    %c0_76 = arith.constant 0 : index
    %c0_77 = arith.constant 0 : index
    %157 = vector.load %arg23[%c0_76, %c0_77] : memref<1x3xf32, #tpu.memory_space<vmem>>, vector<1x3xf32>
    %158 = vector.broadcast %157 : vector<1x3xf32> to vector<16x3xf32>
    %159 = arith.addf %156, %158 : vector<16x3xf32>
    %cst_78 = arith.constant 1.000000e-01 : f32
    %160 = vector.broadcast %cst_78 : f32 to vector<16x128xf32>
    %161 = arith.mulf %160, %86 : vector<16x128xf32>
    %c0_79 = arith.constant 0 : index
    %c0_80 = arith.constant 0 : index
    %162 = vector.load %arg24[%c0_79, %c0_80] : memref<16x128xf32, #tpu.memory_space<vmem>>, vector<16x128xf32>
    tpu.vector_store %arg24[%c0_79, %c0_80], %161 {strides = array<i32>} : memref<16x128xf32, #tpu.memory_space<vmem>>, vector<16x128xf32>,
    %cst_81 = arith.constant 0.000000e+00 : f32
    %163 = vector.broadcast %cst_81 : f32 to vector<16x3xf32>
    %164 = arith.subf %163, %159 : vector<16x3xf32>
    %165 = math.exp %164 : vector<16x3xf32>
    %cst_82 = arith.constant 1.000000e+00 : f32
    %166 = vector.broadcast %cst_82 : f32 to vector<16x3xf32>
    %167 = arith.addf %166, %165 : vector<16x3xf32>
    %cst_83 = arith.constant 1.000000e+00 : f32
    %168 = vector.broadcast %cst_83 : f32 to vector<16x3xf32>
    %169 = arith.divf %168, %167 : vector<16x3xf32>
    %c0_84 = arith.constant 0 : index
    %c0_85 = arith.constant 0 : index
    %170 = vector.load %arg25[%c0_84, %c0_85] : memref<16x3xf32, #tpu.memory_space<vmem>>, vector<16x3xf32>
    tpu.vector_store %arg25[%c0_84, %c0_85], %169 {strides = array<i32>} : memref<16x3xf32, #tpu.memory_space<vmem>>, vector<16x3xf32>,
    return
  }
  func.func @transform_0(%arg0: i32) -> (i32, i32) {
    %c0_i32 = arith.constant 0 : i32
    %c0_i32_0 = arith.constant 0 : i32
    return %arg0, %c0_i32 : i32, i32
  }
  func.func @transform_1(%arg0: i32) -> (i32, i32) {
    %c0_i32 = arith.constant 0 : i32
    %c0_i32_0 = arith.constant 0 : i32
    %c0_i32_1 = arith.constant 0 : i32
    return %c0_i32, %c0_i32_0 : i32, i32
  }
  func.func @transform_2(%arg0: i32) -> (i32, i32) {
    %c0_i32 = arith.constant 0 : i32
    %c0_i32_0 = arith.constant 0 : i32
    %c0_i32_1 = arith.constant 0 : i32
    return %c0_i32, %c0_i32_0 : i32, i32
  }
  func.func @transform_3(%arg0: i32) -> (i32, i32) {
    %c0_i32 = arith.constant 0 : i32
    %c0_i32_0 = arith.constant 0 : i32
    %c0_i32_1 = arith.constant 0 : i32
    return %c0_i32, %c0_i32_0 : i32, i32
  }
  func.func @transform_4(%arg0: i32) -> (i32, i32) {
    %c0_i32 = arith.constant 0 : i32
    %c0_i32_0 = arith.constant 0 : i32
    %c0_i32_1 = arith.constant 0 : i32
    return %c0_i32, %c0_i32_0 : i32, i32
  }
  func.func @transform_5(%arg0: i32) -> (i32, i32) {
    %c0_i32 = arith.constant 0 : i32
    %c0_i32_0 = arith.constant 0 : i32
    %c0_i32_1 = arith.constant 0 : i32
    return %c0_i32, %c0_i32_0 : i32, i32
  }
  func.func @transform_6(%arg0: i32) -> (i32, i32) {
    %c0_i32 = arith.constant 0 : i32
    %c0_i32_0 = arith.constant 0 : i32
    %c0_i32_1 = arith.constant 0 : i32
    return %c0_i32, %c0_i32_0 : i32, i32
  }
  func.func @transform_7(%arg0: i32) -> (i32, i32) {
    %c0_i32 = arith.constant 0 : i32
    %c0_i32_0 = arith.constant 0 : i32
    %c0_i32_1 = arith.constant 0 : i32
    return %c0_i32, %c0_i32_0 : i32, i32
  }
  func.func @transform_8(%arg0: i32) -> (i32, i32) {
    %c0_i32 = arith.constant 0 : i32
    %c0_i32_0 = arith.constant 0 : i32
    %c0_i32_1 = arith.constant 0 : i32
    return %c0_i32, %c0_i32_0 : i32, i32
  }
  func.func @transform_9(%arg0: i32) -> (i32, i32) {
    %c0_i32 = arith.constant 0 : i32
    %c0_i32_0 = arith.constant 0 : i32
    %c0_i32_1 = arith.constant 0 : i32
    return %c0_i32, %c0_i32_0 : i32, i32
  }
  func.func @transform_10(%arg0: i32) -> (i32, i32) {
    %c0_i32 = arith.constant 0 : i32
    %c0_i32_0 = arith.constant 0 : i32
    %c0_i32_1 = arith.constant 0 : i32
    return %c0_i32, %c0_i32_0 : i32, i32
  }
  func.func @transform_11(%arg0: i32) -> (i32, i32) {
    %c0_i32 = arith.constant 0 : i32
    %c0_i32_0 = arith.constant 0 : i32
    %c0_i32_1 = arith.constant 0 : i32
    return %c0_i32, %c0_i32_0 : i32, i32
  }
  func.func @transform_12(%arg0: i32) -> (i32, i32) {
    %c0_i32 = arith.constant 0 : i32
    %c0_i32_0 = arith.constant 0 : i32
    %c0_i32_1 = arith.constant 0 : i32
    return %c0_i32, %c0_i32_0 : i32, i32
  }
  func.func @transform_13(%arg0: i32) -> (i32, i32) {
    %c0_i32 = arith.constant 0 : i32
    %c0_i32_0 = arith.constant 0 : i32
    %c0_i32_1 = arith.constant 0 : i32
    return %c0_i32, %c0_i32_0 : i32, i32
  }
  func.func @transform_14(%arg0: i32) -> (i32, i32) {
    %c0_i32 = arith.constant 0 : i32
    %c0_i32_0 = arith.constant 0 : i32
    %c0_i32_1 = arith.constant 0 : i32
    return %c0_i32, %c0_i32_0 : i32, i32
  }
  func.func @transform_15(%arg0: i32) -> (i32, i32) {
    %c0_i32 = arith.constant 0 : i32
    %c0_i32_0 = arith.constant 0 : i32
    %c0_i32_1 = arith.constant 0 : i32
    return %c0_i32, %c0_i32_0 : i32, i32
  }
  func.func @transform_16(%arg0: i32) -> (i32, i32) {
    %c0_i32 = arith.constant 0 : i32
    %c0_i32_0 = arith.constant 0 : i32
    %c0_i32_1 = arith.constant 0 : i32
    return %c0_i32, %c0_i32_0 : i32, i32
  }
  func.func @transform_17(%arg0: i32) -> (i32, i32) {
    %c0_i32 = arith.constant 0 : i32
    %c0_i32_0 = arith.constant 0 : i32
    %c0_i32_1 = arith.constant 0 : i32
    return %c0_i32, %c0_i32_0 : i32, i32
  }
  func.func @transform_18(%arg0: i32) -> (i32, i32) {
    %c0_i32 = arith.constant 0 : i32
    %c0_i32_0 = arith.constant 0 : i32
    %c0_i32_1 = arith.constant 0 : i32
    return %c0_i32, %c0_i32_0 : i32, i32
  }
  func.func @transform_19(%arg0: i32) -> (i32, i32) {
    %c0_i32 = arith.constant 0 : i32
    %c0_i32_0 = arith.constant 0 : i32
    %c0_i32_1 = arith.constant 0 : i32
    return %c0_i32, %c0_i32_0 : i32, i32
  }
  func.func @transform_20(%arg0: i32) -> (i32, i32) {
    %c0_i32 = arith.constant 0 : i32
    %c0_i32_0 = arith.constant 0 : i32
    %c0_i32_1 = arith.constant 0 : i32
    return %c0_i32, %c0_i32_0 : i32, i32
  }
  func.func @transform_21(%arg0: i32) -> (i32, i32) {
    %c0_i32 = arith.constant 0 : i32
    %c0_i32_0 = arith.constant 0 : i32
    %c0_i32_1 = arith.constant 0 : i32
    return %c0_i32, %c0_i32_0 : i32, i32
  }
  func.func @transform_22(%arg0: i32) -> (i32, i32) {
    %c0_i32 = arith.constant 0 : i32
    %c0_i32_0 = arith.constant 0 : i32
    %c0_i32_1 = arith.constant 0 : i32
    return %c0_i32, %c0_i32_0 : i32, i32
  }
  func.func @transform_23(%arg0: i32) -> (i32, i32) {
    %c0_i32 = arith.constant 0 : i32
    %c0_i32_0 = arith.constant 0 : i32
    return %arg0, %c0_i32 : i32, i32
  }
  func.func @transform_24(%arg0: i32) -> (i32, i32) {
    %c0_i32 = arith.constant 0 : i32
    %c0_i32_0 = arith.constant 0 : i32
    return %arg0, %c0_i32 : i32, i32
  }
}

</mosaic_0001>

<bundles_post_ra>
// kernel: tpu_custom_call.1
= control target key start
LH: loop header
LB: loop body
LE: loop exit
PB: predicated region body
PF: predicated region fallthrough
CT: control target
= control target key end

     0   :  { %s10894_s0 = inlined_call_operand.vmem [shape: f32[16,1], index: 0, kind: input, shape index: {}]   ;;  %s10895_s1 = inlined_call_operand.vmem [shape: f32[1,128], index: 1, kind: input, shape index: {}]   ;;  %s10896_s2 = inlined_call_operand.vmem [shape: f32[1,128], index: 2, kind: input, shape index: {}]   ;;  %s10897_s3 = inlined_call_operand.vmem [shape: f32[128,128], index: 3, kind: input, shape index: {}]   ;;  %s10898_s4 = inlined_call_operand.vmem [shape: f32[1,128], index: 4, kind: input, shape index: {}]   ;;  %s10899_s5 = inlined_call_operand.vmem [shape: f32[1,128], index: 5, kind: input, shape index: {}]   ;;  %s10900_s6 = inlined_call_operand.vmem [shape: f32[1,128], index: 6, kind: input, shape index: {}]   ;;  %s10901_s7 = inlined_call_operand.hbm [shape: f32[128,128], index: 7, kind: input, shape index: {}]   ;;  %s10902_s8 = inlined_call_operand.vmem [shape: f32[1,128], index: 8, kind: input, shape index: {}]   ;;  %s10903_s9 = inlined_call_operand.vmem [shape: f32[1,128], index: 9, kind: input, shape index: {}]   ;;  %s10904_s10 = inlined_call_operand.vmem [shape: f32[1,128], index: 10, kind: input, shape index: {}]   ;;  %s10905_s11 = inlined_call_operand.hbm [shape: f32[128,128], index: 11, kind: input, shape index: {}]   ;;  %s10906_s12 = inlined_call_operand.vmem [shape: f32[1,128], index: 12, kind: input, shape index: {}]   ;;  %s10907_s13 = inlined_call_operand.hbm [shape: f32[128,128], index: 13, kind: input, shape index: {}]   ;;  %s10908_s14 = inlined_call_operand.vmem [shape: f32[1,128], index: 14, kind: input, shape index: {}]   ;;  %s10909_s15 = inlined_call_operand.vmem [shape: f32[1,128], index: 15, kind: input, shape index: {}]   ;;  %s10910_s16 = inlined_call_operand.vmem [shape: f32[1,128], index: 16, kind: input, shape index: {}]   ;;  %s10911_s17 = inlined_call_operand.hbm [shape: f32[128,128], index: 17, kind: input, shape index: {}]   ;;  %s10912_s18 = inlined_call_operand.vmem [shape: f32[1,128], index: 18, kind: input, shape index: {}]   ;;  %s10913_s19 = inlined_call_operand.vmem [shape: f32[1,128], index: 19, kind: input, shape index: {}]   ;;  %s10914_s20 = inlined_call_operand.vmem [shape: f32[1,128], index: 20, kind: input, shape index: {}]   ;;  %s10915_s21 = inlined_call_operand.vmem [shape: f32[128,3], index: 21, kind: input, shape index: {}]   ;;  %s10916_s22 = inlined_call_operand.vmem [shape: f32[1,3], index: 22, kind: input, shape index: {}]   ;;  %s10917_s23 = inlined_call_operand.hbm [shape: f32[16,128], index: 23, kind: output, shape index: {0}]   ;;  %s10918_s24 = inlined_call_operand.vmem [shape: f32[16,3], index: 24, kind: output, shape index: {1}]  }
   0x1   :  { %10992 = sst [smem:[#allocation25_spill]] %s10894_s0 }
   0x2   :  { %10993 = sst [smem:[#allocation26_spill]] %s10895_s1 }
   0x3   :  { %10994 = sst [smem:[#allocation27_spill]] %s10896_s2 }
   0x4   :  { %10995 = sst [smem:[#allocation28_spill]] %s10897_s3 }
   0x5   :  { %10996 = sst [smem:[#allocation29_spill]] %s10898_s4 }
   0x6   :  { %10997 = sst [smem:[#allocation30_spill]] %s10899_s5 }
   0x7   :  { %10998 = sst [smem:[#allocation31_spill]] %s10900_s6 }
   0x8   :  { %10999 = sst [smem:[#allocation32_spill]] %s10901_s7 }
   0x9   :  { %11000 = sst [smem:[#allocation33_spill]] %s10902_s8 }
   0xa   :  { %11001 = sst [smem:[#allocation34_spill]] %s10918_s24 }
   0xb   :  { %30 = vsyncpa [#allocation3], 0 }
   0xc   :  { %31 = vsyncpa [#allocation6], 0 }
   0xd   :  { %32 = vsyncpa [#allocation9], 0 }
   0xe   :  { %33 = vsyncpa [#allocation4], 0  ;;  %s8387_s5 = smov [#allocation5]   ;;  %s8388_s27 = smov [#allocation2]  }
   0xf   :  { %s71_s26 = sshll.u32 %s8387_s5, 4  ;;  %s53_s28 = sshll.u32 %s8388_s27, 4  ;;  %s72_s26 = int_to_ptr.vmem [resolvable:$true] %s71_s26  ;;  %s8526_s28 = int_to_ptr.vmem [resolvable:$true] %s53_s28 }
  0x10   :  { %s8269_s29 = scalar_lea.hbm %s10905_s11, 2048 }
  0x11   :  { %p8270_p0 = scmp.ne.s32.totalorder %s10905_s11, %s8269_s29  ;;  %p8273_p1 = scmp.lt.u32.totalorder %s8269_s29, %s10905_s11 }
  0x13   :  { %p8275_p2 = pnand %p8273_p1, %p8270_p0 }
  0x15   :  { %8278 = shalt.err (!%p8275_p2)
}
  0x16   :  { %s8279_s25 = scalar_lea.vmem %s72_s26, 2048  ;;  %p8284_p4 = scmp.lt.s32.totalorder %s72_s26, %s72_s26 }
  0x17   :  { %p8280_p3 = scmp.ne.s32.totalorder %s72_s26, %s8279_s25  ;;  %p8285_p5 = scmp.lt.s32.totalorder %s8279_s25, %s8279_s25 }
  0x19   :  { %p8286_p6 = por %p8285_p5, %p8284_p4 }
  0x1b   :  { %p8287_p7 = pnand %p8286_p6, %p8280_p3 }
  0x1d   :  { %8290 = shalt.err (!%p8287_p7)
}
  0x1e   :  { %s8389_s8 = smov 128   ;;  %s8390_s4 = smov 8  }
  0x1f   :  { %77 = dma.hbm_to_vmem [thread:$0]  %s10905_s11, 2048, %s72_s26, [#allocation6], %s8389_s8, %s8389_s8, %s8390_s4  }
  0x20   :  { %s11002_s2 = sld [smem:[#allocation32_spill]] }
  0x26   :  { %s8291_s29 = scalar_lea.hbm %s11002_s2, 2048 }
  0x27   :  { %p8292_p8 = scmp.ne.s32.totalorder %s11002_s2, %s8291_s29  ;;  %p8295_p9 = scmp.lt.u32.totalorder %s8291_s29, %s11002_s2 }
  0x29   :  { %p8297_p10 = pnand %p8295_p9, %p8292_p8 }
  0x2b   :  { %8300 = shalt.err (!%p8297_p10)
}
  0x2c   :  { %s8301_s25 = scalar_lea.vmem %s8526_s28, 2048  ;;  %p8306_p12 = scmp.lt.s32.totalorder %s8526_s28, %s8526_s28 }
  0x2d   :  { %p8302_p11 = scmp.ne.s32.totalorder %s8526_s28, %s8301_s25  ;;  %p8307_p13 = scmp.lt.s32.totalorder %s8301_s25, %s8301_s25 }
  0x2f   :  { %p8308_p0 = por %p8307_p13, %p8306_p12 }
  0x31   :  { %p8309_p1 = pnand %p8308_p0, %p8302_p11 }
  0x33   :  { %8312 = shalt.err (!%p8309_p1)
}
  0x34   :  { %59 = dma.hbm_to_vmem [thread:$0]  %s11002_s2, 2048, %s8526_s28, [#allocation3], %s8389_s8, %s8389_s8, %s8390_s4  }
  0x35   :  { %s8391_s1 = smov [#allocation7]   ;;  %s8392_s27 = smov [#allocation8]  }
  0x36   :  { %s85_s5 = sshll.u32 %s8391_s1, 4  ;;  %s103_s6 = sshll.u32 %s8392_s27, 4  ;;  %s86_s5 = int_to_ptr.vmem [resolvable:$true] %s85_s5  ;;  %s8563_s6 = int_to_ptr.vmem [resolvable:$true] %s103_s6 }
  0x37   :  { %s8313_s7 = scalar_lea.hbm %s10907_s13, 2048 }
  0x38   :  { %p8314_p2 = scmp.ne.s32.totalorder %s10907_s13, %s8313_s7  ;;  %p8317_p3 = scmp.lt.u32.totalorder %s8313_s7, %s10907_s13 }
  0x3a   :  { %p8319_p4 = pnand %p8317_p3, %p8314_p2 }
  0x3c   :  { %8322 = shalt.err (!%p8319_p4)
}
  0x3d   :  { %s8323_s28 = scalar_lea.vmem %s86_s5, 2048  ;;  %p8328_p6 = scmp.lt.s32.totalorder %s86_s5, %s86_s5 }
  0x3e   :  { %p8324_p5 = scmp.ne.s32.totalorder %s86_s5, %s8323_s28  ;;  %p8329_p7 = scmp.lt.s32.totalorder %s8323_s28, %s8323_s28 }
  0x40   :  { %p8330_p8 = por %p8329_p7, %p8328_p6 }
  0x42   :  { %p8331_p9 = pnand %p8330_p8, %p8324_p5 }
  0x44   :  { %8334 = shalt.err (!%p8331_p9)
}
  0x45   :  { %91 = dma.hbm_to_vmem [thread:$0]  %s10907_s13, 2048, %s86_s5, [#allocation6], %s8389_s8, %s8389_s8, %s8390_s4  }
  0x46   :  { %s8335_s24 = scalar_lea.hbm %s10911_s17, 2048 }
  0x47   :  { %p8336_p10 = scmp.ne.s32.totalorder %s10911_s17, %s8335_s24  ;;  %p8339_p11 = scmp.lt.u32.totalorder %s8335_s24, %s10911_s17 }
  0x49   :  { %p8341_p12 = pnand %p8339_p11, %p8336_p10 }
  0x4b   :  { %8344 = shalt.err (!%p8341_p12)
}
  0x4c   :  { %s8345_s30 = scalar_lea.vmem %s8563_s6, 2048  ;;  %p8350_p0 = scmp.lt.s32.totalorder %s8563_s6, %s8563_s6 }
  0x4d   :  { %p8346_p13 = scmp.ne.s32.totalorder %s8563_s6, %s8345_s30  ;;  %p8351_p1 = scmp.lt.s32.totalorder %s8345_s30, %s8345_s30 }
  0x4f   :  { %p8352_p2 = por %p8351_p1, %p8350_p0 }
  0x51   :  { %p8353_p3 = pnand %p8352_p2, %p8346_p13 }
  0x53   :  { %8356 = shalt.err (!%p8353_p3)
}
  0x54   :  { %109 = dma.hbm_to_vmem [thread:$0]  %s10911_s17, 2048, %s8563_s6, [#allocation9], %s8389_s8, %s8389_s8, %s8390_s4  }
  0x55   :  { %8379 = dma.done.wait [#allocation3], 2048  }
  0x56   :  { %8380 = vsyncadd [#allocation3], 4294965248 }
  0x57   :  { %8381 = dma.done.wait [#allocation6], 4096  }
  0x58   :  { %8382 = vsyncadd [#allocation6], 4294963200 }
  0x59   :  { %8383 = dma.done.wait [#allocation9], 2048  }
  0x5a   :  { %8384 = vsyncadd [#allocation9], 4294965248  ;;  %v8393_v0 = vmov 0   ;;  %s11003_s28 = sld [smem:[#allocation25_spill]]  ;;  %s11004_s6 = sld [smem:[#allocation28_spill]] }
  0x5b   :  { %8236 = vset.pattern.permute.xlu0 %v8393_v0  ;;  %s11009_s17 = sld [smem:[#allocation26_spill]]  ;;  %s11011_s27 = sld [smem:[#allocation27_spill]] }
  0x5c   :  { %s11043_s7 = sld [smem:[#allocation29_spill]]  ;;  %s11044_s5 = sld [smem:[#allocation30_spill]] }
  0x60   :  { %v132_v1 = vld [vmem:[%s11003_s28] sm:$0xff]  ;;  %v133_v2 = vld [vmem:[%s11003_s28 + $0x8] sm:$0xff]  ;;  %v583_v8 = vld [vmem:[%s11004_s6 + $0x10] sm:$0xff]  ;;  %s11045_s28 = sld [smem:[#allocation31_spill]] }
  0x61   :  { %137 = vperm.xlu0 %8236, %v132_v1   ;;  %v581_v3 = vld [vmem:[%s11004_s6] sm:$0xff]  ;;  %v582_v4 = vld [vmem:[%s11004_s6 + $0x8] sm:$0xff]  ;;  %v584_v9 = vld [vmem:[%s11004_s6 + $0x18] sm:$0xff]  ;;  %v611_v10 = vand.u32 4294901760, %v583_v8 }
  0x62   :  { %v605_v5 = vand.u32 4294901760, %v581_v3  ;;  %v608_v6 = vand.u32 4294901760, %v582_v4  ;;  %v614_v11 = vand.u32 4294901760, %v584_v9  ;;  %v585_v13 = vld [vmem:[%s11004_s6 + $0x20] sm:$0xff]  ;;  %v586_v14 = vld [vmem:[%s11004_s6 + $0x28] sm:$0xff]  ;;  %v8633_v15 = vld [vmem:[%s11004_s6 + $0x30] sm:$0xff] }
  0x63   :  { %v617_v16 = vand.u32 4294901760, %v585_v13  ;;  %v620_v17 = vand.u32 4294901760, %v586_v14  ;;  %v8639_v18 = vld [vmem:[%s11004_s6 + $0x38] sm:$0xff]  ;;  %v623_v19 = vand.u32 4294901760, %v8633_v15  ;;  %v8645_v20 = vld [vmem:[%s11004_s6 + $0x40] sm:$0xff]  ;;  %v8650_v21 = vld [vmem:[%s11004_s6 + $0x48] sm:$0xff]  ;;  %v8743_v51 = vsub.f32 %v583_v8, %v611_v10 }
  0x64   :  { %v8612_v7 = vpack.c.bf16 %v608_v6, %v605_v5  ;;  %v8622_v12 = vpack.c.bf16 %v614_v11, %v611_v10  ;;  %v626_v22 = vand.u32 4294901760, %v8639_v18  ;;  %v629_v24 = vand.u32 4294901760, %v8645_v20  ;;  %v8663_v27 = vld [vmem:[%s11004_s6 + $0x50] sm:$0xff]  ;;  %v8668_v28 = vld [vmem:[%s11004_s6 + $0x58] sm:$0xff]  ;;  %v8684_v32 = vld [vmem:[%s11004_s6 + $0x60] sm:$0xff] }
  0x65   :  { %142 = vperm.xlu0 %8236, %v133_v2   ;;  %v8654_v23 = vpack.c.bf16 %v620_v17, %v617_v16  ;;  %v632_v25 = vand.u32 4294901760, %v8650_v21  ;;  %v635_v30 = vand.u32 4294901760, %v8663_v27  ;;  %v638_v31 = vand.u32 4294901760, %v8668_v28  ;;  %v8689_v33 = vld [vmem:[%s11004_s6 + $0x68] sm:$0xff]  ;;  %v8704_v37 = vld [vmem:[%s11004_s6 + $0x70] sm:$0xff]  ;;  %v8709_v38 = vld [vmem:[%s11004_s6 + $0x78] sm:$0xff] }
  0x66   :  { %6991 = vmatprep.subr.bf16.mxu0 %v8612_v7  ;;  %v8658_v26 = vpack.c.bf16 %v626_v22, %v623_v19  ;;  %v641_v35 = vand.u32 4294901760, %v8684_v32  ;;  %v644_v36 = vand.u32 4294901760, %v8689_v33  ;;  %v647_v40 = vand.u32 4294901760, %v8704_v37  ;;  %11007 = vst [vmem:[#allocation17_spill] sm:$0xff] %v8743_v51  ;;  %s11065_s6 = sld [smem:[#allocation33_spill]] }
  0x67   :  { %6993 = vmatpush3.bf16.msra.mxu0 %v8612_v7  ;;  %v8677_v29 = vpack.c.bf16 %v632_v25, %v629_v24  ;;  %v8697_v34 = vpack.c.bf16 %v638_v31, %v635_v30  ;;  %v650_v41 = vand.u32 4294901760, %v8709_v38  ;;  %v8721_v42 = vsub.f32 %v581_v3, %v605_v5 }
  0x68   :  { %6995 = vmatprep.subr.bf16.mxu0 %v8622_v12  ;;  %v8717_v39 = vpack.c.bf16 %v644_v36, %v641_v35  ;;  %v8723_v43 = vsub.f32 %v582_v4, %v608_v6  ;;  %v8745_v52 = vsub.f32 %v584_v9, %v614_v11  ;;  %v10936_v54 = vand.u32 4294901760, %v8743_v51 }
  0x69   :  { %11005 = vst [vmem:[#allocation15_spill] sm:$0xff] %v8721_v42  ;;  %v10938_v44 = vand.u32 4294901760, %v8721_v42  ;;  %v8733_v46 = vpack.c.bf16 %v650_v41, %v647_v40  ;;  %v8759_v58 = vsub.f32 %v585_v13, %v617_v16  ;;  %v8761_v59 = vsub.f32 %v586_v14, %v620_v17 }
  0x6a   :  { %11006 = vst [vmem:[#allocation16_spill] sm:$0xff] %v8723_v43  ;;  %v10937_v45 = vand.u32 4294901760, %v8723_v43  ;;  %11008 = vst [vmem:[#allocation18_spill] sm:$0xff] %v8745_v52  ;;  %v10935_v55 = vand.u32 4294901760, %v8745_v52  ;;  %v723_v56 = vsub.f32 %v8743_v51, %v10936_v54  ;;  %v8774_v3 = vsub.f32 %v8633_v15, %v623_v19 }
  0x6b   :  { %6997 = vmatpush3.bf16.msra.mxu0 %v8622_v12  ;;  %v709_v47 = vsub.f32 %v8721_v42, %v10938_v44  ;;  %v10934_v62 = vand.u32 4294901760, %v8759_v58  ;;  %v10933_v63 = vand.u32 4294901760, %v8761_v59  ;;  %v8777_v4 = vsub.f32 %v8639_v18, %v626_v22 }
  0x6c   :  { %6999 = vmatprep.subr.bf16.mxu0 %v8654_v23  ;;  %v716_v48 = vsub.f32 %v8723_v43, %v10937_v45  ;;  %v730_v57 = vsub.f32 %v8745_v52, %v10935_v55  ;;  %v724_v60 = vand.u32 4294901760, %v723_v56  ;;  %v10932_v8 = vand.u32 4294901760, %v8774_v3 }
  0x6d   :  { %v710_v49 = vand.u32 4294901760, %v709_v47  ;;  %v737_v1 = vsub.f32 %v8759_v58, %v10934_v62  ;;  %v744_v2 = vsub.f32 %v8761_v59, %v10933_v63  ;;  %v10931_v9 = vand.u32 4294901760, %v8777_v4 }
  0x6e   :  { %v717_v50 = vand.u32 4294901760, %v716_v48  ;;  %v731_v61 = vand.u32 4294901760, %v730_v57  ;;  %v751_v11 = vsub.f32 %v8774_v3, %v10932_v8  ;;  %v8789_v13 = vsub.f32 %v8645_v20, %v629_v24 }
  0x6f   :  { %7001 = vmatpush3.bf16.msra.mxu0 %v8654_v23  ;;  %v738_v5 = vand.u32 4294901760, %v737_v1  ;;  %v745_v6 = vand.u32 4294901760, %v744_v2  ;;  %v8794_v14 = vsub.f32 %v8650_v21, %v632_v25  ;;  %v758_v15 = vsub.f32 %v8777_v4, %v10931_v9  ;;  %v5051_v2 = vld [vmem:[%s11011_s27] ss:$0 sm:$0xff] }
  0x70   :  { %7003 = vmatprep.subr.bf16.mxu0 %v8658_v26  ;;  %v8747_v53 = vpack.c.bf16 %v717_v50, %v710_v49  ;;  %v8765_v0 = vpack.c.bf16 %v731_v61, %v724_v60  ;;  %v752_v16 = vand.u32 4294901760, %v751_v11  ;;  %v10930_v17 = vand.u32 4294901760, %v8789_v13 }
  0x71   :  { %v8781_v10 = vpack.c.bf16 %v745_v6, %v738_v5  ;;  %v10929_v18 = vand.u32 4294901760, %v8794_v14  ;;  %v759_v19 = vand.u32 4294901760, %v758_v15  ;;  %v8810_v21 = vsub.f32 %v8663_v27, %v635_v30 }
  0x72   :  { %v765_v20 = vsub.f32 %v8789_v13, %v10930_v17  ;;  %v8815_v24 = vsub.f32 %v8668_v28, %v638_v31  ;;  %v8832_v28 = vsub.f32 %v8684_v32, %v641_v35  ;;  %v5050_v31 = vld [vmem:[%s11009_s17] ss:$0 sm:$0xff]  ;;  %v8840_v57 = vsub.f32 %v8689_v33, %v644_v36 }
  0x73   :  { %7005 = vmatpush3.bf16.msra.mxu0 %v8658_v26  ;;  %v772_v22 = vsub.f32 %v8794_v14, %v10929_v18  ;;  %v8817_v25 = vpack.c.bf16 %v759_v19, %v752_v16  ;;  %v10928_v49 = vand.u32 4294901760, %v8810_v21  ;;  %v8855_v33 = vsub.f32 %v8704_v37, %v647_v40 }
  0x74   :  { %7007 = vmatprep.subr.bf16.mxu0 %v8677_v29  ;;  %v766_v47 = vand.u32 4294901760, %v765_v20  ;;  %v10927_v50 = vand.u32 4294901760, %v8815_v24  ;;  %11010 = vst [vmem:[#allocation19_spill] sm:$0xff] %v8840_v57  ;;  %v10926_v1 = vand.u32 4294901760, %v8832_v28  ;;  %v10924_v32 = vand.u32 4294901760, %v8840_v57 }
  0x75   :  { %v773_v48 = vand.u32 4294901760, %v772_v22  ;;  %v779_v27 = vsub.f32 %v8810_v21, %v10928_v49  ;;  %11012 = vst [vmem:[#allocation20_spill] sm:$0xff] %v8855_v33  ;;  %v8863_v15 = vsub.f32 %v8709_v38, %v650_v41  ;;  %v10923_v20 = vand.u32 4294901760, %v8855_v33 }
  0x76   :  { %v786_v30 = vsub.f32 %v8815_v24, %v10927_v50  ;;  %v793_v11 = vsub.f32 %v8832_v28, %v10926_v1  ;;  %v800_v36 = vsub.f32 %v8840_v57, %v10924_v32  ;;  %v8395_v50 = vmov 2475754826  }
  0x77   :  { %7009 = vmatpush3.bf16.msra.mxu0 %v8677_v29  ;;  %v8821_v56 = vpack.c.bf16 %v773_v48, %v766_v47  ;;  %v780_v60 = vand.u32 4294901760, %v779_v27  ;;  %11013 = vst [vmem:[#allocation21_spill] sm:$0xff] %v8863_v15  ;;  %v10925_v48 = vand.u32 4294901760, %v8863_v15  ;;  %v807_v38 = vsub.f32 %v8855_v33, %v10923_v20 }
  0x78   :  { %7011 = vmatprep.subr.bf16.mxu0 %v8697_v34  ;;  %v787_v61 = vand.u32 4294901760, %v786_v30  ;;  %v794_v19 = vand.u32 4294901760, %v793_v11  ;;  %v801_v47 = vand.u32 4294901760, %v800_v36  ;;  %v8396_v18 = vmov 2131351028  }
  0x79   :  { %v814_v41 = vsub.f32 %v8863_v15, %v10925_v48  ;;  %v10942_v48 = vmov 683565275   ;;  %v8398_v9 = vmov 920167782   ;;  %v8399_v62 = vmov 1326507024  }
  0x7a   :  { %v8847_v6 = vpack.c.bf16 %v787_v61, %v780_v60  ;;  %v8871_v30 = vpack.c.bf16 %v801_v47, %v794_v19 }
  0x7b   :  { %7013 = vmatpush3.bf16.msra.mxu0 %v8697_v34  ;;  %v815_v11 = vand.u32 4294901760, %v814_v41  ;;  %v8895_v41 = vpack.c.bf16 %v8745_v52, %v8743_v51 }
  0x7c   :  { %7015 = vmatprep.subr.bf16.mxu0 %v8717_v39 }
  0x7f   :  { %7017 = vmatpush3.bf16.msra.mxu0 %v8717_v39 }
  0x80   :  { %7019 = vmatprep.subr.bf16.mxu0 %v8733_v46 }
  0x83   :  { %7021 = vmatpush3.bf16.msra.mxu0 %v8733_v46 }
  0x84   :  { %7023 = vmatprep.subr.bf16.mxu0 %v8747_v53 }
  0xe0   :  { %v138_v5 = vpop.permute.xlu0 %137 }
  0xe1   :  { %v151_v35 = vmul.f32 %v5050_v31, %v138_v5 }
  0xe3   :  { %v8865_v16 = vadd.f32 %v5051_v2, %v151_v35  ;;  %v808_v35 = vand.u32 4294901760, %v807_v38 }
  0xe4   :  { %v143_v22 = vpop.permute.xlu0 %142 }
  0xe5   :  { %v10940_v37 = vand.u32 2147483647, %v8865_v16  ;;  %v168_v40 = vand.u32 2139095040, %v8865_v16  ;;  %v152_v27 = vmul.f32 %v5050_v31, %v143_v22  ;;  %v8885_v22 = vpack.c.bf16 %v815_v11, %v808_v35 }
  0xe6   :  { %vm167_vm14 = vcmp.lt.s32.totalorder %v8865_v16, 0 }
  0xe7   :  { %v169_v60 = vshrl.u32 %v168_v40, 23  ;;  %v8879_v61 = vadd.f32 %v5051_v2, %v152_v27  ;;  %v172_v5 = vand.u32 8388607, %v10940_v37  ;;  %v8891_v2 = vpack.c.bf16 %v8723_v43, %v8721_v42 }
  0xe9   :  { %v5052_v36 = vadd.s32 4294967169, %v169_v60  ;;  %v10939_v31 = vand.u32 2147483647, %v8879_v61  ;;  %v272_v19 = vand.u32 2139095040, %v8879_v61  ;;  %v173_v20 = vor.u32 8388608, %v172_v5 }
  0xeb   :  { %v175_v47 = vadd.s32 1, %v5052_v36  ;;  %v273_v32 = vshrl.u32 %v272_v19, 23  ;;  %v276_v40 = vand.u32 8388607, %v10939_v31  ;;  %v8897_v11 = vshll.u32 %v173_v20, 8 }
  0xed   :  { %vm176_vm0 = vcmp.gt.s32.totalorder %v175_v47, 0  ;;  %v5056_v38 = vadd.s32 4294967169, %v273_v32  ;;  %v277_v5 = vor.u32 8388608, %v276_v40 }
  0xee   :  { %v177_v27 = vsel %vm176_vm0, %v175_v47, 0  ;;  %v8397_v47 = vmov 2102212464   ;;  %vm271_vm0 = vcmp.lt.s32.totalorder %v8879_v61, 0 }
  0xef   :  { %v178_v60 = vshrl.u32 %v177_v27, 5  ;;  %v179_v35 = vand.u32 31, %v177_v27  ;;  %v279_v36 = vadd.s32 1, %v5056_v38 }
  0xf1   :  { %v180_v19 = vsub.s32 32, %v179_v35  ;;  %v182_v1 = vshll.u32 %v10942_v48, %v179_v35  ;;  %v185_v49 = vshll.u32 %v8395_v50, %v179_v35  ;;  %v188_v17 = vshll.u32 %v8396_v18, %v179_v35 }
  0xf2   :  { %v191_v32 = vshll.u32 %v8397_v47, %v179_v35  ;;  %v194_v8 = vshll.u32 %v8398_v9, %v179_v35  ;;  %vm197_vm1 = vcmp.lt.s32.totalorder %v178_v60, 1  ;;  %vm198_vm2 = vcmp.lt.s32.totalorder %v178_v60, 2 }
  0xf3   :  { %v181_v27 = vshrl.u32 %v10942_v48, %v180_v19  ;;  %v183_v20 = vshrl.u32 %v8395_v50, %v180_v19  ;;  %v186_v63 = vshrl.u32 %v8396_v18, %v180_v19  ;;  %v189_v40 = vshrl.u32 %v8397_v47, %v180_v19 }
  0xf4   :  { %v192_v38 = vshrl.u32 %v8398_v9, %v180_v19  ;;  %v195_v55 = vshrl.u32 %v8399_v62, %v180_v19  ;;  %vm199_vm3 = vcmp.lt.s32.totalorder %v178_v60, 3  ;;  %vm200_vm4 = vcmp.lt.s32.totalorder %v178_v60, 4 }
  0xf5   :  { %v184_v54 = vor.u32 %v183_v20, %v182_v1  ;;  %v187_v45 = vor.u32 %v186_v63, %v185_v49  ;;  %v190_v44 = vor.u32 %v189_v40, %v188_v17  ;;  %vm280_vm5 = vcmp.gt.s32.totalorder %v279_v36, 0 }
  0xf6   :  { %v193_v31 = vor.u32 %v192_v38, %v191_v32  ;;  %v196_v37 = vor.u32 %v195_v55, %v194_v8  ;;  %v281_v52 = vsel %vm280_vm5, %v279_v36, 0  ;;  %v8903_v35 = vpack.c.bf16 %v8761_v59, %v8759_v58 }
  0xf7   :  { %v201_v48 = vsel %vm197_vm1, %v181_v27, %v184_v54  ;;  %v202_v51 = vsel %vm200_vm4, %v190_v44, 2102212464  ;;  %v205_v43 = vsel %vm197_vm1, %v184_v54, %v187_v45  ;;  %v209_v19 = vsel %vm197_vm1, %v187_v45, %v190_v44 }
  0xf8   :  { %v203_v42 = vsel %vm199_vm3, %v187_v45, %v202_v51  ;;  %v206_v1 = vsel %vm200_vm4, %v193_v31, 920167782  ;;  %v210_v63 = vsel %vm200_vm4, %v196_v37, 1326507024  ;;  %v282_v17 = vshrl.u32 %v281_v52, 5 }
  0xf9   :  { %v204_v49 = vsel %vm198_vm2, %v201_v48, %v203_v42  ;;  %v207_v55 = vsel %vm199_vm3, %v190_v44, %v206_v1  ;;  %v211_v8 = vsel %vm199_vm3, %v193_v31, %v210_v63  ;;  %v283_v36 = vand.u32 31, %v281_v52 }
  0xfa   :  { %v208_v32 = vsel %vm198_vm2, %v205_v43, %v207_v55  ;;  %v212_v27 = vsel %vm198_vm2, %v209_v19, %v211_v8  ;;  %v220_v42 = vmul.u32 %v8897_v11, %v204_v49  ;;  %vm301_vm6 = vcmp.lt.s32.totalorder %v282_v17, 1 }
  0xfb   :  { %v8915_v54 = vmul.u32.u64.low %v8897_v11, %v212_v27  ;;  %v8916_v20 = vmul.u32.u64.high %v8897_v11, %v212_v27, %v8915_v54  ;;  %v8919_v45 = vmul.u32.u64.low %v8897_v11, %v208_v32  ;;  %v8920_v51 = vmul.u32.u64.high %v8897_v11, %v208_v32, %v8919_v45 }
  0xfc   :  { %v284_v48 = vsub.s32 32, %v283_v36  ;;  %v317_v44 = vshll.u32 %v277_v5, 8  ;;  %v11014_v37 = vmov 683565275   ;;  %v289_v31 = vshll.u32 %v8395_v50, %v283_v36 }
  0xfd   :  { %v286_v52 = vshll.u32 %v11014_v37, %v283_v36  ;;  %v292_v43 = vshll.u32 %v8396_v18, %v283_v36  ;;  %v295_v60 = vshll.u32 %v8397_v47, %v283_v36  ;;  %v298_v1 = vshll.u32 %v8398_v9, %v283_v36 }
  0xfe   :  { %v287_v40 = vshrl.u32 %v8395_v50, %v284_v48  ;;  %v290_v38 = vshrl.u32 %v8396_v18, %v284_v48  ;;  %v293_v19 = vshrl.u32 %v8397_v47, %v284_v48  ;;  %vm222_vm7 = vc.u32 %v8916_v20, %v8919_v45 }
  0xff   :  { %v223_v63 = vadd.s32 1, %v8920_v51  ;;  %v296_v55 = vshrl.u32 %v8398_v9, %v284_v48  ;;  %vm302_vm8 = vcmp.lt.s32.totalorder %v282_v17, 2  ;;  %v299_v5 = vshrl.u32 %v8399_v62, %v284_v48 }
 0x100   :  { %v288_v11 = vor.u32 %v287_v40, %v286_v52  ;;  %v291_v49 = vor.u32 %v290_v38, %v289_v31  ;;  %v294_v8 = vor.u32 %v293_v19, %v292_v43  ;;  %vm304_vm9 = vcmp.lt.s32.totalorder %v282_v17, 4 }
 0x101   :  { %v224_v32 = vsel %vm222_vm7, %v223_v63, %v8920_v51  ;;  %v297_v27 = vor.u32 %v296_v55, %v295_v60  ;;  %v8931_v18 = vpack.c.bf16 %v8777_v4, %v8774_v3  ;;  %v285_v47 = vshrl.u32 %v11014_v37, %v284_v48 }
 0x102   :  { %v225_v50 = vadd.s32 %v224_v32, %v220_v42  ;;  %v300_v36 = vor.u32 %v299_v5, %v298_v1  ;;  %v306_v54 = vsel %vm304_vm9, %v294_v8, 2102212464  ;;  %vm303_vm10 = vcmp.lt.s32.totalorder %v282_v17, 3 }
 0x103   :  { %v309_v9 = vsel %vm301_vm6, %v288_v11, %v291_v49  ;;  %v310_v52 = vsel %vm304_vm9, %v297_v27, 920167782  ;;  %v313_v31 = vsel %vm301_vm6, %v291_v49, %v294_v8  ;;  %v305_v51 = vsel %vm301_vm6, %v285_v47, %v288_v11 }
 0x104   :  { %v226_v62 = vadd.s32 536870912, %v225_v50  ;;  %v311_v43 = vsel %vm303_vm10, %v294_v8, %v310_v52  ;;  %v314_v60 = vsel %vm304_vm9, %v300_v36, 1326507024  ;;  %v307_v40 = vsel %vm303_vm10, %v291_v49, %v306_v54 }
 0x105   :  { %v312_v38 = vsel %vm302_vm8, %v309_v9, %v311_v43  ;;  %v315_v19 = vsel %vm303_vm10, %v297_v27, %v314_v60  ;;  %v8940_v42 = vpack.c.bf16 %v8794_v14, %v8789_v13  ;;  %v8951_v11 = vpack.c.bf16 %v8815_v24, %v8810_v21 }
 0x106   :  { %v227_v48 = vshrl.u32 %v226_v62, 30  ;;  %v316_v37 = vsel %vm302_vm8, %v313_v31, %v315_v19  ;;  %v8943_v1 = vmul.u32.u64.low %v317_v44, %v312_v38  ;;  %v8944_v63 = vmul.u32.u64.high %v317_v44, %v312_v38, %v8943_v1 }
 0x107   :  { %v8946_v55 = vmul.u32.u64.low %v317_v44, %v316_v37  ;;  %v8947_v5 = vmul.u32.u64.high %v317_v44, %v316_v37, %v8946_v55  ;;  %v8955_v49 = vpack.c.bf16 %v8840_v57, %v8832_v28  ;;  %v308_v32 = vsel %vm302_vm8, %v305_v51, %v307_v40 }
 0x108   :  { %v228_v8 = vshll.u32 %v227_v48, 30  ;;  %v8960_v27 = vpack.c.bf16 %v8863_v15, %v8855_v33  ;;  %v327_v36 = vadd.s32 1, %v8944_v63  ;;  %v324_v54 = vmul.u32 %v317_v44, %v308_v32 }
 0x109   :  { %vm326_vm11 = vc.u32 %v8947_v5, %v8943_v1  ;;  %vm257_vm9 = vweird.f32 %v8865_v16 }
 0x10a   :  { %v229_v47 = vsub.s32 %v225_v50, %v228_v8  ;;  %v328_v52 = vsel %vm326_vm11, %v327_v36, %v8944_v63  ;;  %v221_v50 = vadd.s32 %v8919_v45, %v8916_v20  ;;  %v325_v20 = vadd.s32 %v8943_v1, %v8947_v5 }
 0x10b   :  { %v329_v31 = vadd.s32 %v328_v52, %v324_v54 }
 0x10c   :  { %v231_v9 = vsub.s32 0, %v229_v47 }
 0x10d   :  { %v330_v43 = vadd.s32 536870912, %v329_v31 }
 0x10e   :  { %v5053_v62 = vmin.u32 %v231_v9, %v229_v47 }
 0x10f   :  { %v331_v38 = vshrl.u32 %v330_v43, 30 }
 0x110   :  { %v233_v60 = vclz %v5053_v62 }
 0x111   :  { %v332_v51 = vshll.u32 %v331_v38, 30 }
 0x112   :  { %v5054_v17 = vadd.s32 4294967294, %v233_v60 }
 0x113   :  { %v333_v19 = vsub.s32 %v329_v31, %v332_v51  ;;  %v251_v31 = vsub.s32 4, %v227_v48 }
 0x114   :  { %vm5055_vm12 = vcmp.lt.s32.totalorder %v5054_v17, 0 }
 0x115   :  { %v236_v40 = vsel %vm5055_vm12, 0, %v5054_v17  ;;  %v335_v55 = vsub.s32 0, %v333_v19 }
 0x116   :  { %v237_v37 = vsub.s32 32, %v236_v40  ;;  %v241_v44 = vsub.s32 4294967266, %v236_v40  ;;  %v238_v8 = vshll.u32 %v229_v47, %v236_v40 }
 0x117   :  { %v5057_v63 = vmin.u32 %v335_v55, %v333_v19 }
 0x118   :  { %v239_v32 = vshrl.u32 %v221_v50, %v237_v37  ;;  %v242_v15 = vadd.s32 127, %v241_v44  ;;  %v252_v44 = vsel %vm167_vm14, %v251_v31, %v227_v48 }
 0x119   :  { %v337_v9 = vclz %v5057_v63 }
 0x11a   :  { %v240_v36 = vor.u32 %v239_v32, %v238_v8  ;;  %v243_v54 = vshll.u32 %v242_v15, 23  ;;  %v11015_v15 = vand.u32 2147483647, %v8865_v16 }
 0x11b   :  { %v5058_v62 = vadd.s32 4294967294, %v337_v9 }
 0x11c   :  { %v244_v52 = vor.u32 4788187, %v243_v54  ;;  %v247_v60 = vcvt.s32.f32 %v240_v36  ;;  %vm166_vm15 = vcmp.le.f32.partialorder %v11015_v15, 0.7853982  ;;  %v162_v54 = vlaneseq }
 0x11d   :  { %vm5059_vm13 = vcmp.lt.s32.totalorder %v5058_v62, 0  ;;  %v254_v63 = vsel %vm166_vm15, 0, %v252_v44 }
 0x11e   :  { %v245_v43 = vand.u32 2147483647, %v244_v52  ;;  %v340_v51 = vsel %vm5059_vm13, 0, %v5058_v62  ;;  %v258_v9 = vadd.s32 3, %v254_v63  ;;  %v355_v52 = vsub.s32 4, %v331_v38 }
 0x11f   :  { %v341_v45 = vsub.s32 32, %v340_v51  ;;  %v345_v33 = vsub.s32 4294967266, %v340_v51  ;;  %v342_v47 = vshll.u32 %v333_v19, %v340_v51 }
 0x120   :  { %v248_v17 = vmul.f32 %v247_v60, %v245_v43  ;;  %v163_v43 = vand.u32 127, %v162_v54  ;;  %v259_v60 = vand.u32 3, %v258_v9 }
 0x121   :  { %v343_v40 = vshrl.u32 %v325_v20, %v341_v45  ;;  %v346_v50 = vadd.s32 127, %v345_v33  ;;  %v466_v33 = vand.u32 3, %v254_v63 }
 0x122   :  { %v249_v57 = vxor.u32 2147483648, %v248_v17  ;;  %vm164_vm2 = vcmp.lt.s32.totalorder %v163_v43, 64  ;;  %vm264_vm4 = vcmp.eq.s32.totalorder %v259_v60, 2  ;;  %vm261_vm5 = vcmp.eq.s32.totalorder %v259_v60, 0 }
 0x123   :  { %v344_v8 = vor.u32 %v343_v40, %v342_v47  ;;  %v347_v32 = vshll.u32 %v346_v50, 23  ;;  %vm471_vm3 = vcmp.eq.s32.totalorder %v466_v33, 2  ;;  %vm468_vm6 = vcmp.eq.s32.totalorder %v466_v33, 0 }
 0x124   :  { %v250_v37 = vsel %vm167_vm14, %v249_v57, %v248_v17  ;;  %v11016_v57 = vand.u32 2147483647, %v8879_v61  ;;  %v356_v17 = vsel %vm271_vm0, %v355_v52, %v331_v38  ;;  %vm260_vm7 = vcmp.lt.s32.totalorder %v259_v60, 2 }
 0x125   :  { %v253_v55 = vsel %vm166_vm15, %v8865_v16, %v250_v37  ;;  %v348_v1 = vor.u32 4788187, %v347_v32  ;;  %v351_v36 = vcvt.s32.f32 %v344_v8  ;;  %vm467_vm8 = vcmp.lt.s32.totalorder %v466_v33, 2 }
 0x126   :  { %8237 = vcosq.f32 %v253_v55  ;;  %vm270_vm1 = vcmp.le.f32.partialorder %v11016_v57, 0.7853982  ;;  %v11032_v43 = vand.u32 4294901760, %v8789_v13  ;;  %v11039_v13 = vld [vmem:[#allocation20_spill] sm:$0xff] }
 0x127   :  { %8239 = vsinq.f32 %v253_v55  ;;  %v349_v5 = vand.u32 2147483647, %v348_v1  ;;  %v358_v47 = vsel %vm270_vm1, 0, %v356_v17 }
 0x128   :  { %v362_v44 = vadd.s32 3, %v358_v47  ;;  %v569_v54 = vand.u32 3, %v358_v47 }
 0x129   :  { %v352_v19 = vmul.f32 %v351_v36, %v349_v5 }
 0x12a   :  { %v363_v36 = vand.u32 3, %v362_v44  ;;  %vm571_vm11 = vcmp.eq.s32.totalorder %v569_v54, 0  ;;  %vm574_vm12 = vcmp.eq.s32.totalorder %v569_v54, 2  ;;  %vm570_vm15 = vcmp.lt.s32.totalorder %v569_v54, 2 }
 0x12b   :  { %v353_v62 = vxor.u32 2147483648, %v352_v19 }
 0x12c   :  { %vm368_vm10 = vcmp.eq.s32.totalorder %v363_v36, 2  ;;  %vm365_vm13 = vcmp.eq.s32.totalorder %v363_v36, 0  ;;  %vm364_vm14 = vcmp.lt.s32.totalorder %v363_v36, 2  ;;  %v11040_v36 = vand.u32 4294901760, %v11039_v13 }
 0x12d   :  { %v354_v48 = vsel %vm271_vm0, %v353_v62, %v352_v19  ;;  %vm361_vm0 = vweird.f32 %v8879_v61 }
 0x12e   :  { %v357_v51 = vsel %vm270_vm1, %v8879_v61, %v354_v48 }
 0x12f   :  { %8241 = vcosq.f32 %v357_v51 }
 0x130   :  { %v8238_v31 = vpop.eup %8237  ;;  %8243 = vsinq.f32 %v357_v51 }
 0x131   :  { %v8240_v20 = vpop.eup %8239  ;;  %v265_v45 = vxor.u32 2147483648, %v8238_v31 }
 0x132   :  { %v262_v40 = vxor.u32 2147483648, %v8240_v20 }
 0x133   :  { %v266_v50 = vsel %vm264_vm4, %v265_v45, %v8240_v20  ;;  %v473_v15 = vsel %vm471_vm3, %v265_v45, %v8240_v20 }
 0x134   :  { %v263_v37 = vsel %vm261_vm5, %v8238_v31, %v262_v40  ;;  %v470_v38 = vsel %vm468_vm6, %v8238_v31, %v262_v40 }
 0x135   :  { %v267_v55 = vsel %vm260_vm7, %v263_v37, %v266_v50  ;;  %v474_v8 = vsel %vm467_vm8, %v470_v38, %v473_v15 }
 0x136   :  { %v268_v32 = vsel %vm257_vm9, nan, %v267_v55  ;;  %v475_v63 = vsel %vm257_vm9, nan, %v474_v8  ;;  %v11033_v55 = vand.u32 4294901760, %v8794_v14  ;;  %v11041_v14 = vld [vmem:[#allocation21_spill] sm:$0xff] }
 0x137   :  { %v579_v1 = vsel %vm164_vm2, %v268_v32, %v475_v63  ;;  %v11042_v54 = vand.u32 4294901760, %v11041_v14 }
 0x138   :  { %v8978_v5 = vand.u32 4294901760, %v579_v1  ;;  %v7134_v8 = vpack.c.bf16 %v11033_v55, %v11032_v43  ;;  %v9152_v55 = vld [vmem:[#allocation2 + $0x68] sm:$0xff] }
 0x139   :  { %v8242_v19 = vpop.eup %8241 }
 0x13a   :  { %v8981_v9 = vsub.f32 %v579_v1, %v8978_v5  ;;  %v8244_v52 = vpop.eup %8243  ;;  %v369_v62 = vxor.u32 2147483648, %v8242_v19 }
 0x13b   :  { %v366_v16 = vxor.u32 2147483648, %v8244_v52 }
 0x13c   :  { %v8984_v33 = vand.u32 4294901760, %v8981_v9  ;;  %v370_v57 = vsel %vm368_vm10, %v369_v62, %v8244_v52  ;;  %v576_v48 = vsel %vm574_vm12, %v369_v62, %v8244_v52 }
 0x13d   :  { %v367_v17 = vsel %vm365_vm13, %v8242_v19, %v366_v16  ;;  %v573_v31 = vsel %vm571_vm11, %v8242_v19, %v366_v16  ;;  %v7146_v19 = vpack.c.bf16 %v11042_v54, %v11040_v36  ;;  %v1335_v16 = vld [vmem:[#allocation2] sm:$0xff] }
 0x13e   :  { %11017 = vst [vmem:[#allocation22_spill] sm:$0xff] %v8984_v33  ;;  %v688_v60 = vsub.f32 %v8981_v9, %v8984_v33  ;;  %v371_v20 = vsel %vm364_vm14, %v367_v17, %v370_v57  ;;  %v577_v45 = vsel %vm570_vm15, %v573_v31, %v576_v48  ;;  %v1359_v57 = vand.u32 4294901760, %v1335_v16  ;;  %v1337_v31 = vld [vmem:[#allocation2 + $0x10] sm:$0xff] }
 0x13f   :  { %v372_v47 = vsel %vm361_vm0, nan, %v371_v20  ;;  %v578_v40 = vsel %vm361_vm0, nan, %v577_v45  ;;  %v1338_v20 = vld [vmem:[#allocation2 + $0x18] sm:$0xff]  ;;  %v1365_v45 = vand.u32 4294901760, %v1337_v31 }
 0x140   :  { %v8989_v51 = vand.u32 4294901760, %v688_v60  ;;  %v580_v50 = vsel %vm164_vm2, %v372_v47, %v578_v40  ;;  %v1336_v60 = vld [vmem:[#allocation2 + $0x8] sm:$0xff]  ;;  %v1368_v47 = vand.u32 4294901760, %v1338_v20  ;;  %v9187_v14 = vsub.f32 %v1335_v16, %v1359_v57 }
 0x141   :  { %v8993_v15 = vand.u32 4294901760, %v580_v50  ;;  %v1362_v48 = vand.u32 4294901760, %v1336_v60 }
 0x142   :  { %5762 = vmatprep.mubr.f32.mxu0 %v8989_v51  ;;  %v9126_v40 = vpack.c.bf16 %v1368_v47, %v1365_v45 }
 0x143   :  { %v8996_v37 = vsub.f32 %v580_v50, %v8993_v15  ;;  %v9122_v17 = vpack.c.bf16 %v1362_v48, %v1359_v57  ;;  %v1339_v50 = vld [vmem:[#allocation2 + $0x20] sm:$0xff]  ;;  %v9189_v54 = vsub.f32 %v1336_v60, %v1362_v48 }
 0x145   :  { %11018 = vst [vmem:[#allocation23_spill] sm:$0xff] %v8996_v37  ;;  %v8999_v38 = vand.u32 4294901760, %v8996_v37  ;;  %7183 = vmatprep.subr.bf16.mxu1 %v9122_v17 }
 0x146   :  { %7185 = vmatpush3.bf16.msra.mxu1 %v9122_v17 }
 0x147   :  { %11019 = vst [vmem:[#allocation24_spill] sm:$0xff] %v8999_v38  ;;  %v698_v61 = vsub.f32 %v8996_v37, %v8999_v38  ;;  %7187 = vmatprep.subr.bf16.mxu1 %v9126_v40 }
 0x149   :  { %v9003_v44 = vand.u32 4294901760, %v698_v61  ;;  %v1340_v61 = vld [vmem:[#allocation2 + $0x28] sm:$0xff] }
 0x14a   :  { %7189 = vmatpush3.bf16.msra.mxu1 %v9126_v40 }
 0x14b   :  { %5763 = vmatmul.mubr.f32.vlgmr.msra.gmra.mrb[0].mxu0 %v9003_v44 }
 0x14c   :  { %7025 = vmatpush3.bf16.msra.mxu0 %v8747_v53  ;;  %5797 = vmatprep.mubr.f32.mxu0 %v8978_v5  ;;  %v11020_v53 = vld [vmem:[#allocation15_spill] sm:$0xff] }
 0x14d   :  { %7027 = vmatprep.subr.bf16.mxu0 %v8765_v0 }
 0x150   :  { %7029 = vmatpush3.bf16.msra.mxu0 %v8765_v0  ;;  %v11021_v0 = vand.u32 4294901760, %v11020_v53  ;;  %v1371_v53 = vand.u32 4294901760, %v1339_v50 }
 0x151   :  { %7031 = vmatprep.subr.bf16.mxu0 %v8781_v10 }
 0x152   :  { %v9216_v60 = vsub.f32 %v1339_v50, %v1371_v53 }
 0x154   :  { %7033 = vmatpush3.bf16.msra.mxu0 %v8781_v10  ;;  %v11022_v10 = vld [vmem:[#allocation16_spill] sm:$0xff] }
 0x155   :  { %7035 = vmatprep.subr.bf16.mxu0 %v8817_v25 }
 0x158   :  { %7037 = vmatpush3.bf16.msra.mxu0 %v8817_v25  ;;  %v11023_v25 = vand.u32 4294901760, %v11022_v10 }
 0x159   :  { %7039 = vmatprep.subr.bf16.mxu0 %v8821_v56 }
 0x15c   :  { %7041 = vmatpush3.bf16.msra.mxu0 %v8821_v56  ;;  %v7118_v56 = vpack.c.bf16 %v11023_v25, %v11021_v0  ;;  %v1374_v0 = vand.u32 4294901760, %v1340_v61  ;;  %v1341_v25 = vld [vmem:[#allocation2 + $0x30] sm:$0xff] }
 0x15d   :  { %7043 = vmatprep.subr.bf16.mxu0 %v8847_v6 }
 0x15e   :  { %v9130_v10 = vpack.c.bf16 %v1374_v0, %v1371_v53  ;;  %v9218_v57 = vsub.f32 %v1340_v61, %v1374_v0 }
 0x160   :  { %7045 = vmatpush3.bf16.msra.mxu0 %v8847_v6  ;;  %v11024_v6 = vld [vmem:[#allocation17_spill] sm:$0xff]  ;;  %7191 = vmatprep.subr.bf16.mxu1 %v9130_v10 }
 0x161   :  { %7047 = vmatprep.subr.bf16.mxu0 %v8871_v30  ;;  %7193 = vmatpush3.bf16.msra.mxu1 %v9130_v10 }
 0x164   :  { %7049 = vmatpush3.bf16.msra.mxu0 %v8871_v30  ;;  %v11025_v30 = vand.u32 4294901760, %v11024_v6  ;;  %v1377_v6 = vand.u32 4294901760, %v1341_v25 }
 0x165   :  { %7051 = vmatprep.subr.bf16.mxu0 %v8885_v22 }
 0x168   :  { %7053 = vmatpush3.bf16.msra.mxu0 %v8885_v22  ;;  %v11026_v22 = vld [vmem:[#allocation18_spill] sm:$0xff] }
 0x169   :  { %7055 = vmatprep.subr.bf16.mxu0 %v8891_v2 }
 0x16b   :  { %5798 = vmatmul.mubr.f32.vlgmr.msra.gmra.mrb[0].mxu0 %v8993_v15 }
 0x16c   :  { %7057 = vmatpush3.bf16.msra.mxu0 %v8891_v2  ;;  %5832 = vmatprep.mubr.f32.mxu0 %v8981_v9  ;;  %v11027_v2 = vand.u32 4294901760, %v11026_v22 }
 0x16d   :  { %7059 = vmatprep.subr.bf16.mxu0 %v8895_v41 }
 0x170   :  { %7061 = vmatpush3.bf16.msra.mxu0 %v8895_v41  ;;  %v7122_v41 = vpack.c.bf16 %v11027_v2, %v11025_v30  ;;  %v9136_v2 = vld [vmem:[#allocation2 + $0x40] sm:$0xff] }
 0x171   :  { %7063 = vmatprep.subr.bf16.mxu0 %v8903_v35 }
 0x174   :  { %7065 = vmatpush3.bf16.msra.mxu0 %v8903_v35  ;;  %v11028_v35 = vand.u32 4294901760, %v8759_v58  ;;  %v11034_v58 = vand.u32 4294901760, %v8810_v21 }
 0x175   :  { %7067 = vmatprep.subr.bf16.mxu0 %v8931_v18 }
 0x178   :  { %7069 = vmatpush3.bf16.msra.mxu0 %v8931_v18  ;;  %v11029_v18 = vand.u32 4294901760, %v8761_v59  ;;  %v11035_v59 = vand.u32 4294901760, %v8815_v24 }
 0x179   :  { %7071 = vmatprep.subr.bf16.mxu0 %v8940_v42 }
 0x17a   :  { %v7138_v32 = vpack.c.bf16 %v11035_v59, %v11034_v58  ;;  %v1398_v59 = vand.u32 4294901760, %v9152_v55 }
 0x17c   :  { %7073 = vmatpush3.bf16.msra.mxu0 %v8940_v42  ;;  %v7126_v42 = vpack.c.bf16 %v11029_v18, %v11028_v35  ;;  %v1383_v35 = vand.u32 4294901760, %v9136_v2 }
 0x17d   :  { %7075 = vmatprep.subr.bf16.mxu0 %v8951_v11 }
 0x180   :  { %7077 = vmatpush3.bf16.msra.mxu0 %v8951_v11  ;;  %v11030_v11 = vand.u32 4294901760, %v8774_v3  ;;  %v11036_v3 = vand.u32 4294901760, %v8832_v28 }
 0x181   :  { %7079 = vmatprep.subr.bf16.mxu0 %v8955_v49 }
 0x184   :  { %7081 = vmatpush3.bf16.msra.mxu0 %v8955_v49  ;;  %v11031_v49 = vand.u32 4294901760, %v8777_v4  ;;  %v11037_v4 = vld [vmem:[#allocation19_spill] sm:$0xff] }
 0x185   :  { %7083 = vmatprep.subr.bf16.mxu0 %v8960_v27  ;;  %v11038_v63 = vand.u32 4294901760, %v11037_v4  ;;  %v9166_v4 = vld [vmem:[#allocation2 + $0x78] sm:$0xff] }
 0x186   :  { %v1404_v13 = vand.u32 4294901760, %v9166_v4 }
 0x187   :  { %v7142_v1 = vpack.c.bf16 %v11038_v63, %v11036_v3  ;;  %v9164_v3 = vld [vmem:[#allocation2 + $0x70] sm:$0xff] }
 0x188   :  { %7085 = vmatpush3.bf16.msra.mxu0 %v8960_v27  ;;  %v7130_v27 = vpack.c.bf16 %v11031_v49, %v11030_v11  ;;  %v9145_v11 = vld [vmem:[#allocation2 + $0x58] sm:$0xff]  ;;  %v9147_v49 = vld [vmem:[#allocation2 + $0x60] sm:$0xff] }
 0x189   :  { %7087 = vmatprep.subr.bf16.mxu0 %v8612_v7  ;;  %v1392_v43 = vand.u32 4294901760, %v9145_v11  ;;  %v1395_v58 = vand.u32 4294901760, %v9147_v49 }
 0x18b   :  { %5833 = vmatmul.mubr.f32.vlgmr.msra.gmra.mrb[0].mxu0 %v8996_v37  ;;  %v9175_v63 = vpack.c.bf16 %v1398_v59, %v1395_v58 }
 0x18c   :  { %7089 = vmatpush3.bf16.msra.mxu0 %v8612_v7  ;;  %5867 = vmatprep.mubr.f32.mxu0 %v8984_v33 }
 0x18d   :  { %7091 = vmatprep.subr.bf16.mxu0 %v8622_v12 }
 0x190   :  { %7093 = vmatpush3.bf16.msra.mxu0 %v8622_v12 }
 0x191   :  { %7095 = vmatprep.subr.bf16.mxu0 %v8654_v23 }
 0x194   :  { %7097 = vmatpush3.bf16.msra.mxu0 %v8654_v23 }
 0x195   :  { %7099 = vmatprep.subr.bf16.mxu0 %v8658_v26 }
 0x198   :  { %7101 = vmatpush3.bf16.msra.mxu0 %v8658_v26 }
 0x199   :  { %7103 = vmatprep.subr.bf16.mxu0 %v8677_v29 }
 0x19c   :  { %7105 = vmatpush3.bf16.msra.mxu0 %v8677_v29 }
 0x19d   :  { %7107 = vmatprep.subr.bf16.mxu0 %v8697_v34 }
 0x1a0   :  { %7109 = vmatpush3.bf16.msra.mxu0 %v8697_v34 }
 0x1a1   :  { %7111 = vmatprep.subr.bf16.mxu0 %v8717_v39 }
 0x1a4   :  { %7113 = vmatpush3.bf16.msra.mxu0 %v8717_v39 }
 0x1a5   :  { %7115 = vmatprep.subr.bf16.mxu0 %v8733_v46 }
 0x1a8   :  { %7117 = vmatpush3.bf16.msra.mxu0 %v8733_v46 }
 0x1a9   :  { %7119 = vmatprep.subr.bf16.mxu0 %v7118_v56 }
 0x1ab   :  { %5868 = vmatmul.mubr.f32.vlgmr.msra.gmra.mrb[0].mxu0 %v8999_v38 }
 0x1ac   :  { %7121 = vmatpush3.bf16.msra.mxu0 %v7118_v56  ;;  %5902 = vmatprep.mubr.f32.mxu0 %v8978_v5  ;;  %v1342_v56 = vld [vmem:[#allocation2 + $0x38] sm:$0xff] }
 0x1ad   :  { %7123 = vmatprep.subr.bf16.mxu0 %v7122_v41  ;;  %v1380_v30 = vand.u32 4294901760, %v1342_v56 }
 0x1af   :  { %v9134_v22 = vpack.c.bf16 %v1380_v30, %v1377_v6  ;;  %v9230_v50 = vsub.f32 %v1342_v56, %v1380_v30  ;;  %v9244_v56 = vsub.f32 %v9136_v2, %v1383_v35 }
 0x1b0   :  { %7125 = vmatpush3.bf16.msra.mxu0 %v7122_v41  ;;  %v9138_v41 = vld [vmem:[#allocation2 + $0x48] sm:$0xff] }
 0x1b1   :  { %7127 = vmatprep.subr.bf16.mxu0 %v7126_v42  ;;  %7195 = vmatprep.subr.bf16.mxu1 %v9134_v22  ;;  %v1386_v18 = vand.u32 4294901760, %v9138_v41 }
 0x1b2   :  { %7197 = vmatpush3.bf16.msra.mxu1 %v9134_v22 }
 0x1b4   :  { %7129 = vmatpush3.bf16.msra.mxu0 %v7126_v42  ;;  %v9143_v42 = vld [vmem:[#allocation2 + $0x50] sm:$0xff] }
 0x1b5   :  { %7131 = vmatprep.subr.bf16.mxu0 %v7130_v27 }
 0x1b8   :  { %7133 = vmatpush3.bf16.msra.mxu0 %v7130_v27  ;;  %v1389_v27 = vand.u32 4294901760, %v9143_v42 }
 0x1b9   :  { %7135 = vmatprep.subr.bf16.mxu0 %v7134_v8 }
 0x1bc   :  { %7137 = vmatpush3.bf16.msra.mxu0 %v7134_v8  ;;  %v9154_v8 = vpack.c.bf16 %v1386_v18, %v1383_v35  ;;  %v9269_v35 = vsub.f32 %v9145_v11, %v1392_v43  ;;  %v9286_v11 = vsub.f32 %v9152_v55, %v1398_v59  ;;  %v9307_v59 = vsub.f32 %v9166_v4, %v1404_v13 }
 0x1bd   :  { %7139 = vmatprep.subr.bf16.mxu0 %v7138_v32 }
 0x1be   :  { %7199 = vmatprep.subr.bf16.mxu1 %v9154_v8 }
 0x1bf   :  { %7201 = vmatpush3.bf16.msra.mxu1 %v9154_v8 }
 0x1c0   :  { %7141 = vmatpush3.bf16.msra.mxu0 %v7138_v32  ;;  %v9162_v32 = vpack.c.bf16 %v1392_v43, %v1389_v27 }
 0x1c1   :  { %7143 = vmatprep.subr.bf16.mxu0 %v7142_v1 }
 0x1c2   :  { %7203 = vmatprep.subr.bf16.mxu1 %v9162_v32 }
 0x1c3   :  { %7205 = vmatpush3.bf16.msra.mxu1 %v9162_v32 }
 0x1c4   :  { %7145 = vmatpush3.bf16.msra.mxu0 %v7142_v1  ;;  %v1401_v1 = vand.u32 4294901760, %v9164_v3  ;;  %7207 = vmatprep.subr.bf16.mxu1 %v9175_v63 }
 0x1c5   :  { %7147 = vmatprep.subr.bf16.mxu0 %v7146_v19 }
 0x1c6   :  { %v9185_v36 = vpack.c.bf16 %v1404_v13, %v1401_v1  ;;  %v9302_v55 = vsub.f32 %v9164_v3, %v1401_v1 }
 0x1c7   :  { %7209 = vmatpush3.bf16.msra.mxu1 %v9175_v63 }
 0x1c8   :  { %7149 = vmatpush3.bf16.msra.mxu0 %v7146_v19  ;;  %v10965_v19 = vand.u32 4294901760, %v9187_v14  ;;  %7211 = vmatprep.subr.bf16.mxu1 %v9185_v36 }
 0x1c9   :  { %7151 = vmatprep.subr.bf16.mxu0 %v8612_v7 }
 0x1cb   :  { %5903 = vmatmul.mubr.f32.vlgmr.msra.gmra.mrb[0].mxu0 %v8993_v15  ;;  %7213 = vmatpush3.bf16.msra.mxu1 %v9185_v36 }
 0x1cc   :  { %7153 = vmatpush3.bf16.msra.mxu0 %v8612_v7  ;;  %5937 = vmatprep.mubr.f32.mxu0 %v8978_v5  ;;  %v5068_v7 = vld [vmem:[%s11043_s7] ss:$0 sm:$0xff] }
 0x1cd   :  { %7155 = vmatprep.subr.bf16.mxu0 %v8622_v12 }
 0x1d0   :  { %7157 = vmatpush3.bf16.msra.mxu0 %v8622_v12 }
 0x1d1   :  { %7159 = vmatprep.subr.bf16.mxu0 %v8654_v23 }
 0x1d4   :  { %7161 = vmatpush3.bf16.msra.mxu0 %v8654_v23 }
 0x1d5   :  { %7163 = vmatprep.subr.bf16.mxu0 %v8658_v26 }
 0x1d8   :  { %7165 = vmatpush3.bf16.msra.mxu0 %v8658_v26 }
 0x1d9   :  { %7167 = vmatprep.subr.bf16.mxu0 %v8677_v29 }
 0x1dc   :  { %7169 = vmatpush3.bf16.msra.mxu0 %v8677_v29 }
 0x1dd   :  { %7171 = vmatprep.subr.bf16.mxu0 %v8697_v34 }
 0x1e0   :  { %7173 = vmatpush3.bf16.msra.mxu0 %v8697_v34 }
 0x1e1   :  { %7175 = vmatprep.subr.bf16.mxu0 %v8717_v39 }
 0x1e4   :  { %7177 = vmatpush3.bf16.msra.mxu0 %v8717_v39 }
 0x1e5   :  { %7179 = vmatprep.subr.bf16.mxu0 %v8733_v46 }
 0x1e8   :  { %7181 = vmatpush3.bf16.msra.mxu0 %v8733_v46 }
 0x1eb   :  { %5938 = vmatmul.mubr.f32.vlgmr.msra.gmra.mrb[0].mxu0 %v8993_v15 }
 0x2be   :  { %v5939_v12 = vpop.f32.mrb[0].mxu0 }
 0x2bf   :  { %v1278_v23 = vpop.f32.mrb[1].mxu0  ;;  %v8142_v29 = vadd.f32 %v5939_v12, %v5068_v7  ;;  %v1463_v12 = vsub.f32 %v9187_v14, %v10965_v19 }
 0x2c0   :  { %v8143_v26 = vadd.f32 %v5068_v7, %v1278_v23  ;;  %v10964_v7 = vand.u32 4294901760, %v9189_v54 }
 0x2c2   :  { %1288 = vadd.xlane.f32.xlu1 %v8143_v26  ;;  %v1470_v23 = vsub.f32 %v9189_v54, %v10964_v7 }
 0x2c6   :  { %1290 = vadd.xlane.f32.xlu1 %v8142_v29 }
 0x34f   :  { %v1289_v34 = vpop.xlane.xlu1 %1288 }
 0x350   :  { %v1293_v21 = vmul.f32 0.0078125, %v1289_v34  ;;  %v1464_v34 = vand.u32 4294901760, %v1463_v12 }
 0x352   :  { %v9114_v24 = vsub.f32 %v8143_v26, %v1293_v21  ;;  %v9201_v26 = vsub.f32 %v1337_v31, %v1365_v45  ;;  %v1471_v21 = vand.u32 4294901760, %v1470_v23  ;;  %v10960_v45 = vand.u32 4294901760, %v9218_v57 }
 0x353   :  { %v1291_v39 = vpop.xlane.xlu1 %1290  ;;  %v9228_v23 = vsub.f32 %v1341_v25, %v1377_v6  ;;  %v9247_v6 = vsub.f32 %v9138_v41, %v1386_v18  ;;  %v9264_v41 = vsub.f32 %v9143_v42, %v1389_v27  ;;  %v9281_v42 = vsub.f32 %v9147_v49, %v1395_v58 }
 0x354   :  { %v1294_v28 = vmul.f32 0.0078125, %v1291_v39  ;;  %v1297_v46 = vmul.f32 %v9114_v24, %v9114_v24  ;;  %v10963_v39 = vand.u32 4294901760, %v9201_v26  ;;  %v1498_v61 = vsub.f32 %v9218_v57, %v10960_v45 }
 0x355   :  { %v10959_v0 = vand.u32 4294901760, %v9228_v23 }
 0x356   :  { %v9118_v52 = vsub.f32 %v8142_v29, %v1294_v28  ;;  %1299 = vadd.xlane.f32.xlu0 %v1297_v46  ;;  %v9203_v29 = vsub.f32 %v1338_v20, %v1368_v47  ;;  %v9208_v46 = vpack.c.bf16 %v1471_v21, %v1464_v34  ;;  %v10961_v20 = vand.u32 4294901760, %v9216_v60 }
 0x357   :  { %v10950_v34 = vand.u32 4294901760, %v9230_v50  ;;  %v1499_v21 = vand.u32 4294901760, %v1498_v61 }
 0x358   :  { %v1298_v62 = vmul.f32 %v9118_v52, %v9118_v52  ;;  %v10962_v28 = vand.u32 4294901760, %v9203_v29  ;;  %7215 = vmatprep.subr.bf16.mxu1 %v9208_v46  ;;  %v1491_v12 = vsub.f32 %v9216_v60, %v10961_v20  ;;  %v5070_v20 = vld [vmem:[%s11045_s28] ss:$0 sm:$0xff] }
 0x359   :  { %v1512_v25 = vsub.f32 %v9230_v50, %v10950_v34 }
 0x35a   :  { %1301 = vadd.xlane.f32.xlu1 %v1298_v62  ;;  %v1477_v62 = vsub.f32 %v9201_v26, %v10963_v39  ;;  %v1484_v16 = vsub.f32 %v9203_v29, %v10962_v28  ;;  %v1492_v53 = vand.u32 4294901760, %v1491_v12  ;;  %v10957_v12 = vand.u32 4294901760, %v9247_v6 }
 0x35c   :  { %v1478_v48 = vand.u32 4294901760, %v1477_v62  ;;  %v1485_v31 = vand.u32 4294901760, %v1484_v16  ;;  %v1505_v62 = vsub.f32 %v9228_v23, %v10959_v0  ;;  %v9249_v30 = vpack.c.bf16 %v1499_v21, %v1492_v53  ;;  %v5069_v0 = vld [vmem:[%s11044_s5] ss:$0 sm:$0xff] }
 0x35d   :  { %v1526_v2 = vsub.f32 %v9247_v6, %v10957_v12  ;;  %v10956_v21 = vand.u32 4294901760, %v9264_v41 }
 0x35e   :  { %v9223_v47 = vpack.c.bf16 %v1485_v31, %v1478_v48  ;;  %v1506_v16 = vand.u32 4294901760, %v1505_v62  ;;  %v1513_v48 = vand.u32 4294901760, %v1512_v25  ;;  %v10958_v31 = vand.u32 4294901760, %v9244_v56 }
 0x35f   :  { %v1527_v53 = vand.u32 4294901760, %v1526_v2  ;;  %v10952_v62 = vand.u32 4294901760, %v9269_v35 }
 0x360   :  { %v9253_v61 = vpack.c.bf16 %v1513_v48, %v1506_v16  ;;  %v1519_v34 = vsub.f32 %v9244_v56, %v10958_v31  ;;  %v1533_v16 = vsub.f32 %v9264_v41, %v10956_v21  ;;  %v10953_v48 = vand.u32 4294901760, %v9286_v11 }
 0x361   :  { %v1540_v27 = vsub.f32 %v9269_v35, %v10952_v62 }
 0x362   :  { %v1520_v18 = vand.u32 4294901760, %v1519_v34  ;;  %v1534_v43 = vand.u32 4294901760, %v1533_v16  ;;  %v10951_v34 = vand.u32 4294901760, %v9281_v42  ;;  %v1554_v58 = vsub.f32 %v9286_v11, %v10953_v48 }
 0x363   :  { %v1541_v2 = vand.u32 4294901760, %v1540_v27  ;;  %v10955_v27 = vand.u32 4294901760, %v9302_v55 }
 0x364   :  { %v9273_v25 = vpack.c.bf16 %v1527_v53, %v1520_v18  ;;  %v1547_v49 = vsub.f32 %v9281_v42, %v10951_v34  ;;  %v1555_v16 = vand.u32 4294901760, %v1554_v58  ;;  %v10954_v34 = vand.u32 4294901760, %v9307_v59 }
 0x365   :  { %v9309_v18 = vpack.c.bf16 %v1541_v2, %v1534_v43  ;;  %v1561_v48 = vsub.f32 %v9302_v55, %v10955_v27  ;;  %v7246_v43 = vpack.c.bf16 %v9189_v54, %v9187_v14  ;;  %v9323_v2 = vpack.c.bf16 %v9203_v29, %v9201_v26 }
 0x366   :  { %v1548_v53 = vand.u32 4294901760, %v1547_v49  ;;  %v1568_v3 = vsub.f32 %v9307_v59, %v10954_v34  ;;  %v9327_v49 = vpack.c.bf16 %v9218_v57, %v9216_v60  ;;  %v9331_v58 = vpack.c.bf16 %v9230_v50, %v9228_v23 }
 0x367   :  { %v1562_v1 = vand.u32 4294901760, %v1561_v48  ;;  %v9335_v48 = vpack.c.bf16 %v9247_v6, %v9244_v56 }
 0x368   :  { %v7238_v62 = vpack.c.bf16 %v1555_v16, %v1548_v53  ;;  %v1569_v4 = vand.u32 4294901760, %v1568_v3  ;;  %v9339_v53 = vpack.c.bf16 %v9269_v35, %v9264_v41  ;;  %v9343_v16 = vpack.c.bf16 %v9286_v11, %v9281_v42 }
 0x369   :  { %v9347_v3 = vpack.c.bf16 %v9307_v59, %v9302_v55 }
 0x36a   :  { %v7242_v13 = vpack.c.bf16 %v1569_v4, %v1562_v1 }
 0x3e3   :  { %v1300_v1 = vpop.xlane.xlu0 %1299 }
 0x3e4   :  { %v1303_v4 = vmul.f32 0.0078125, %v1300_v1 }
 0x3e6   :  { %v1305_v34 = vadd.f32 1e-05, %v1303_v4 }
 0x3e7   :  { %v1302_v27 = vpop.xlane.xlu1 %1301 }
 0x3e8   :  { %8245 = vrsqrt.f32 %v1305_v34  ;;  %v1304_v21 = vmul.f32 0.0078125, %v1302_v27 }
 0x3ea   :  { %v1306_v12 = vadd.f32 1e-05, %v1304_v21 }
 0x3ec   :  { %8247 = vrsqrt.f32 %v1306_v12 }
 0x3f2   :  { %v8246_v31 = vpop.eup %8245 }
 0x3f3   :  { %v1309_v45 = vmul.f32 %v8246_v31, %v9114_v24 }
 0x3f5   :  { %v1318_v28 = vmul.f32 %v5069_v0, %v1309_v45 }
 0x3f6   :  { %v8248_v39 = vpop.eup %8247 }
 0x3f7   :  { %v1310_v1 = vmul.f32 %v8248_v39, %v9118_v52  ;;  %v1327_v4 = vadd.f32 %v5070_v20, %v1318_v28 }
 0x3f9   :  { %v1319_v34 = vmul.f32 %v5069_v0, %v1310_v1  ;;  %vm1329_vm1 = vcmp.ge.f32.partialorder %v1327_v4, 0.0  ;;  %v1331_v21 = vmul.f32 0.01, %v1327_v4 }
 0x3fb   :  { %v1328_v12 = vadd.f32 %v5070_v20, %v1319_v34  ;;  %v1333_v27 = vsel %vm1329_vm1, %v1327_v4, %v1331_v21  ;;  %v11049_v20 = vand.u32 4294901760, %v9203_v29  ;;  %v11054_v29 = vand.u32 4294901760, %v9244_v56  ;;  %v2805_v34 = vld [vmem:[#allocation7 + $0x50] sm:$0xff]  ;;  %v2806_v21 = vld [vmem:[#allocation7 + $0x58] sm:$0xff] }
 0x3fc   :  { %v9357_v7 = vand.u32 4294901760, %v1333_v27  ;;  %v11060_v56 = vand.u32 4294901760, %v9302_v55  ;;  %v2800_v55 = vld [vmem:[#allocation7 + $0x28] sm:$0xff] }
 0x3fd   :  { %vm1330_vm2 = vcmp.ge.f32.partialorder %v1328_v12, 0.0  ;;  %v1332_v19 = vmul.f32 0.01, %v1328_v12 }
 0x3fe   :  { %v1440_v24 = vsub.f32 %v1333_v27, %v9357_v7 }
 0x3ff   :  { %v1334_v31 = vsel %vm1330_vm2, %v1328_v12, %v1332_v19  ;;  %v9475_v12 = vld [vmem:[#allocation7 + $0x68] sm:$0xff] }
 0x400   :  { %v1441_v38 = vand.u32 4294901760, %v1440_v24  ;;  %v9360_v33 = vand.u32 4294901760, %v1334_v31 }
 0x402   :  { %v1442_v45 = vsub.f32 %v1440_v24, %v1441_v38  ;;  %v1450_v37 = vsub.f32 %v1334_v31, %v9360_v33 }
 0x404   :  { %v1443_v52 = vand.u32 4294901760, %v1442_v45  ;;  %v1451_v39 = vand.u32 4294901760, %v1450_v37  ;;  %v2849_v45 = vand.u32 4294901760, %v2805_v34 }
 0x406   :  { %5972 = vmatprep.mubr.f32.mxu1 %v1443_v52  ;;  %v1452_v28 = vsub.f32 %v1450_v37, %v1451_v39  ;;  %v2852_v52 = vand.u32 4294901760, %v2806_v21 }
 0x408   :  { %v1453_v0 = vand.u32 4294901760, %v1452_v28  ;;  %v2858_v28 = vand.u32 4294901760, %v9475_v12 }
 0x40a   :  { %5973 = vmatmul.mubr.f32.vlgmr.msra.gmra.mrb[0].mxu1 %v1453_v0 }
 0x40b   :  { %7217 = vmatpush3.bf16.msra.mxu1 %v9208_v46  ;;  %6007 = vmatprep.mubr.f32.mxu1 %v9357_v7  ;;  %v11048_v46 = vand.u32 4294901760, %v9201_v26 }
 0x40c   :  { %7219 = vmatprep.subr.bf16.mxu1 %v9223_v47 }
 0x40f   :  { %7221 = vmatpush3.bf16.msra.mxu1 %v9223_v47  ;;  %v7314_v47 = vpack.c.bf16 %v11049_v20, %v11048_v46  ;;  %v9494_v46 = vld [vmem:[#allocation7 + $0x78] sm:$0xff] }
 0x410   :  { %7223 = vmatprep.subr.bf16.mxu1 %v9249_v30 }
 0x413   :  { %7225 = vmatpush3.bf16.msra.mxu1 %v9249_v30  ;;  %v11050_v30 = vand.u32 4294901760, %v9216_v60  ;;  %v11056_v60 = vand.u32 4294901760, %v9264_v41 }
 0x414   :  { %7227 = vmatprep.subr.bf16.mxu1 %v9253_v61 }
 0x417   :  { %7229 = vmatpush3.bf16.msra.mxu1 %v9253_v61 }
 0x418   :  { %7231 = vmatprep.subr.bf16.mxu1 %v9273_v25 }
 0x41b   :  { %7233 = vmatpush3.bf16.msra.mxu1 %v9273_v25  ;;  %v11055_v25 = vand.u32 4294901760, %v9247_v6  ;;  %v11061_v6 = vand.u32 4294901760, %v9307_v59 }
 0x41c   :  { %7235 = vmatprep.subr.bf16.mxu1 %v9309_v18 }
 0x41f   :  { %7237 = vmatpush3.bf16.msra.mxu1 %v9309_v18  ;;  %v7326_v18 = vpack.c.bf16 %v11055_v25, %v11054_v29 }
 0x420   :  { %7239 = vmatprep.subr.bf16.mxu1 %v7238_v62 }
 0x423   :  { %7241 = vmatpush3.bf16.msra.mxu1 %v7238_v62  ;;  %v11053_v62 = vand.u32 4294901760, %v9230_v50  ;;  %v11059_v50 = vand.u32 4294901760, %v9286_v11  ;;  %v2799_v11 = vld [vmem:[#allocation7 + $0x20] sm:$0xff] }
 0x424   :  { %7243 = vmatprep.subr.bf16.mxu1 %v7242_v13  ;;  %v2831_v59 = vand.u32 4294901760, %v2799_v11 }
 0x426   :  { %v9518_v25 = vsub.f32 %v2799_v11, %v2831_v59 }
 0x427   :  { %7245 = vmatpush3.bf16.msra.mxu1 %v7242_v13 }
 0x428   :  { %7247 = vmatprep.subr.bf16.mxu1 %v7246_v43 }
 0x42a   :  { %6008 = vmatmul.mubr.f32.vlgmr.msra.gmra.mrb[0].mxu1 %v9360_v33 }
 0x42b   :  { %7249 = vmatpush3.bf16.msra.mxu1 %v7246_v43  ;;  %6042 = vmatprep.mubr.f32.mxu1 %v1440_v24 }
 0x42c   :  { %7251 = vmatprep.subr.bf16.mxu1 %v9323_v2 }
 0x42f   :  { %7253 = vmatpush3.bf16.msra.mxu1 %v9323_v2  ;;  %v7338_v2 = vpack.c.bf16 %v11061_v6, %v11060_v56  ;;  %v2950_v6 = vand.u32 4294901760, %v9518_v25 }
 0x430   :  { %7255 = vmatprep.subr.bf16.mxu1 %v9327_v49 }
 0x433   :  { %7257 = vmatpush3.bf16.msra.mxu1 %v9327_v49  ;;  %v2834_v49 = vand.u32 4294901760, %v2800_v55 }
 0x434   :  { %7259 = vmatprep.subr.bf16.mxu1 %v9331_v58 }
 0x437   :  { %7261 = vmatpush3.bf16.msra.mxu1 %v9331_v58  ;;  %v2801_v58 = vld [vmem:[#allocation7 + $0x30] sm:$0xff] }
 0x438   :  { %7263 = vmatprep.subr.bf16.mxu1 %v9335_v48 }
 0x43b   :  { %7265 = vmatpush3.bf16.msra.mxu1 %v9335_v48  ;;  %v2802_v48 = vld [vmem:[#allocation7 + $0x38] sm:$0xff] }
 0x43c   :  { %7267 = vmatprep.subr.bf16.mxu1 %v9339_v53 }
 0x43f   :  { %7269 = vmatpush3.bf16.msra.mxu1 %v9339_v53  ;;  %v2837_v53 = vand.u32 4294901760, %v2801_v58 }
 0x440   :  { %7271 = vmatprep.subr.bf16.mxu1 %v9343_v16 }
 0x443   :  { %7273 = vmatpush3.bf16.msra.mxu1 %v9343_v16  ;;  %v2803_v16 = vld [vmem:[#allocation7 + $0x40] sm:$0xff] }
 0x444   :  { %7275 = vmatprep.subr.bf16.mxu1 %v9347_v3  ;;  %v2843_v4 = vand.u32 4294901760, %v2803_v16 }
 0x447   :  { %7277 = vmatpush3.bf16.msra.mxu1 %v9347_v3  ;;  %v2804_v3 = vld [vmem:[#allocation7 + $0x48] sm:$0xff] }
 0x448   :  { %7279 = vmatprep.subr.bf16.mxu1 %v9122_v17 }
 0x44a   :  { %6043 = vmatmul.mubr.f32.vlgmr.msra.gmra.mrb[0].mxu1 %v1450_v37  ;;  %v11046_v37 = vand.u32 4294901760, %v9187_v14  ;;  %v11051_v14 = vand.u32 4294901760, %v9218_v57  ;;  %v11057_v57 = vand.u32 4294901760, %v9269_v35  ;;  %v2797_v35 = vld [vmem:[#allocation7 + $0x10] sm:$0xff] }
 0x44b   :  { %7281 = vmatpush3.bf16.msra.mxu1 %v9122_v17  ;;  %6077 = vmatprep.mubr.f32.mxu1 %v1441_v38  ;;  %v11047_v38 = vand.u32 4294901760, %v9189_v54  ;;  %v11052_v54 = vand.u32 4294901760, %v9228_v23  ;;  %v11058_v23 = vand.u32 4294901760, %v9281_v42  ;;  %v2825_v42 = vand.u32 4294901760, %v2797_v35 }
 0x44c   :  { %7283 = vmatprep.subr.bf16.mxu1 %v9126_v40  ;;  %v7318_v61 = vpack.c.bf16 %v11051_v14, %v11050_v30  ;;  %v7330_v13 = vpack.c.bf16 %v11057_v57, %v11056_v60  ;;  %v9522_v60 = vsub.f32 %v2801_v58, %v2837_v53 }
 0x44d   :  { %v7310_v19 = vpack.c.bf16 %v11047_v38, %v11046_v37  ;;  %v7322_v26 = vpack.c.bf16 %v11053_v62, %v11052_v54  ;;  %v7334_v43 = vpack.c.bf16 %v11059_v50, %v11058_v23  ;;  %v9490_v38 = vpack.c.bf16 %v2852_v52, %v2849_v45 }
 0x44e   :  { %v9496_v20 = vsub.f32 %v2797_v35, %v2825_v42 }
 0x44f   :  { %7285 = vmatpush3.bf16.msra.mxu1 %v9126_v40 }
 0x450   :  { %7287 = vmatprep.subr.bf16.mxu1 %v9130_v10 }
 0x453   :  { %7289 = vmatpush3.bf16.msra.mxu1 %v9130_v10 }
 0x454   :  { %7291 = vmatprep.subr.bf16.mxu1 %v9134_v22 }
 0x457   :  { %7293 = vmatpush3.bf16.msra.mxu1 %v9134_v22 }
 0x458   :  { %7295 = vmatprep.subr.bf16.mxu1 %v9154_v8 }
 0x45b   :  { %7297 = vmatpush3.bf16.msra.mxu1 %v9154_v8 }
 0x45c   :  { %7299 = vmatprep.subr.bf16.mxu1 %v9162_v32 }
 0x45f   :  { %7301 = vmatpush3.bf16.msra.mxu1 %v9162_v32 }
 0x460   :  { %7303 = vmatprep.subr.bf16.mxu1 %v9175_v63 }
 0x463   :  { %7305 = vmatpush3.bf16.msra.mxu1 %v9175_v63 }
 0x464   :  { %7307 = vmatprep.subr.bf16.mxu1 %v9185_v36 }
 0x467   :  { %7309 = vmatpush3.bf16.msra.mxu1 %v9185_v36 }
 0x468   :  { %7311 = vmatprep.subr.bf16.mxu1 %v7310_v19 }
 0x46a   :  { %6078 = vmatmul.mubr.f32.vlgmr.msra.gmra.mrb[0].mxu1 %v1451_v39 }
 0x46b   :  { %7313 = vmatpush3.bf16.msra.mxu1 %v7310_v19  ;;  %6112 = vmatprep.mubr.f32.mxu1 %v9357_v7  ;;  %v9492_v19 = vld [vmem:[#allocation7 + $0x70] sm:$0xff] }
 0x46c   :  { %7315 = vmatprep.subr.bf16.mxu1 %v7314_v47  ;;  %v2861_v14 = vand.u32 4294901760, %v9492_v19 }
 0x46f   :  { %7317 = vmatpush3.bf16.msra.mxu1 %v7314_v47 }
 0x470   :  { %7319 = vmatprep.subr.bf16.mxu1 %v7318_v61 }
 0x473   :  { %7321 = vmatpush3.bf16.msra.mxu1 %v7318_v61  ;;  %v2864_v61 = vand.u32 4294901760, %v9494_v46 }
 0x474   :  { %7323 = vmatprep.subr.bf16.mxu1 %v7322_v26 }
 0x477   :  { %7325 = vmatpush3.bf16.msra.mxu1 %v7322_v26  ;;  %v2936_v26 = vand.u32 4294901760, %v9496_v20 }
 0x478   :  { %7327 = vmatprep.subr.bf16.mxu1 %v7326_v18 }
 0x47b   :  { %7329 = vmatpush3.bf16.msra.mxu1 %v7326_v18  ;;  %v9520_v18 = vsub.f32 %v2800_v55, %v2834_v49 }
 0x47c   :  { %7331 = vmatprep.subr.bf16.mxu1 %v7330_v13 }
 0x47f   :  { %7333 = vmatpush3.bf16.msra.mxu1 %v7330_v13  ;;  %v9531_v13 = vpack.c.bf16 %v2864_v61, %v2861_v14 }
 0x480   :  { %7335 = vmatprep.subr.bf16.mxu1 %v7334_v43 }
 0x483   :  { %7337 = vmatpush3.bf16.msra.mxu1 %v7334_v43  ;;  %v2937_v43 = vsub.f32 %v9496_v20, %v2936_v26 }
 0x484   :  { %7339 = vmatprep.subr.bf16.mxu1 %v7338_v2 }
 0x487   :  { %7341 = vmatpush3.bf16.msra.mxu1 %v7338_v2  ;;  %v2957_v2 = vand.u32 4294901760, %v9520_v18 }
 0x488   :  { %7343 = vmatprep.subr.bf16.mxu1 %v9122_v17 }
 0x489   :  { %v2958_v11 = vsub.f32 %v9520_v18, %v2957_v2 }
 0x48a   :  { %6113 = vmatmul.mubr.f32.vlgmr.msra.gmra.mrb[0].mxu1 %v9360_v33 }
 0x48b   :  { %7345 = vmatpush3.bf16.msra.mxu1 %v9122_v17  ;;  %6147 = vmatprep.mubr.f32.mxu1 %v9357_v7  ;;  %v2795_v17 = vld [vmem:[#allocation7] sm:$0xff]  ;;  %v2796_v7 = vld [vmem:[#allocation7 + $0x8] sm:$0xff] }
 0x48c   :  { %7347 = vmatprep.subr.bf16.mxu1 %v9126_v40  ;;  %v2822_v41 = vand.u32 4294901760, %v2796_v7 }
 0x48e   :  { %v9479_v24 = vsub.f32 %v2796_v7, %v2822_v41 }
 0x48f   :  { %7349 = vmatpush3.bf16.msra.mxu1 %v9126_v40  ;;  %v2819_v40 = vand.u32 4294901760, %v2795_v17 }
 0x490   :  { %7351 = vmatprep.subr.bf16.mxu1 %v9130_v10  ;;  %v2929_v37 = vand.u32 4294901760, %v9479_v24 }
 0x491   :  { %v9477_v27 = vsub.f32 %v2795_v17, %v2819_v40  ;;  %v2964_v17 = vand.u32 4294901760, %v9522_v60 }
 0x492   :  { %v2930_v62 = vsub.f32 %v9479_v24, %v2929_v37 }
 0x493   :  { %7353 = vmatpush3.bf16.msra.mxu1 %v9130_v10  ;;  %v2798_v10 = vld [vmem:[#allocation7 + $0x18] sm:$0xff]  ;;  %v2922_v0 = vand.u32 4294901760, %v9477_v27  ;;  %v2965_v55 = vsub.f32 %v9522_v60, %v2964_v17 }
 0x494   :  { %7355 = vmatprep.subr.bf16.mxu1 %v9134_v22  ;;  %v2931_v50 = vand.u32 4294901760, %v2930_v62  ;;  %v9587_v62 = vsub.f32 %v9475_v12, %v2858_v28  ;;  %v9600_v12 = vsub.f32 %v9492_v19, %v2861_v14 }
 0x495   :  { %v2923_v54 = vsub.f32 %v9477_v27, %v2922_v0 }
 0x496   :  { %v3020_v19 = vand.u32 4294901760, %v9600_v12 }
 0x497   :  { %7357 = vmatpush3.bf16.msra.mxu1 %v9134_v22  ;;  %v9456_v22 = vpack.c.bf16 %v2822_v41, %v2819_v40  ;;  %v2924_v23 = vand.u32 4294901760, %v2923_v54  ;;  %v9545_v41 = vsub.f32 %v2803_v16, %v2843_v4 }
 0x498   :  { %7359 = vmatprep.subr.bf16.mxu1 %v9154_v8 }
 0x499   :  { %v7598_v40 = vpack.c.bf16 %v2931_v50, %v2924_v23 }
 0x49b   :  { %7361 = vmatpush3.bf16.msra.mxu1 %v9154_v8  ;;  %v2828_v8 = vand.u32 4294901760, %v2798_v10 }
 0x49c   :  { %7363 = vmatprep.subr.bf16.mxu1 %v9162_v32 }
 0x49d   :  { %v9498_v47 = vsub.f32 %v2798_v10, %v2828_v8  ;;  %v2938_v10 = vand.u32 4294901760, %v2937_v43 }
 0x49f   :  { %7365 = vmatpush3.bf16.msra.mxu1 %v9162_v32  ;;  %v9460_v32 = vpack.c.bf16 %v2828_v8, %v2825_v42  ;;  %v2943_v29 = vand.u32 4294901760, %v9498_v47  ;;  %v2951_v8 = vsub.f32 %v9518_v25, %v2950_v6 }
 0x4a0   :  { %7367 = vmatprep.subr.bf16.mxu1 %v9175_v63 }
 0x4a1   :  { %v2944_v56 = vsub.f32 %v9498_v47, %v2943_v29  ;;  %v2952_v16 = vand.u32 4294901760, %v2951_v8 }
 0x4a3   :  { %7369 = vmatpush3.bf16.msra.mxu1 %v9175_v63  ;;  %v9466_v63 = vpack.c.bf16 %v2834_v49, %v2831_v59  ;;  %v2945_v42 = vand.u32 4294901760, %v2944_v56  ;;  %v2978_v49 = vand.u32 4294901760, %v9545_v41 }
 0x4a4   :  { %7371 = vmatprep.subr.bf16.mxu1 %v9185_v36 }
 0x4a5   :  { %v2979_v54 = vsub.f32 %v9545_v41, %v2978_v49 }
 0x4a7   :  { %7373 = vmatpush3.bf16.msra.mxu1 %v9185_v36  ;;  %v2840_v36 = vand.u32 4294901760, %v2802_v48  ;;  %v2980_v50 = vand.u32 4294901760, %v2979_v54 }
 0x4a8   :  { %7567 = vmatprep.subr.bf16.mxu1 %v9456_v22 }
 0x4a9   :  { %v9470_v1 = vpack.c.bf16 %v2840_v36, %v2837_v53  ;;  %v9524_v57 = vsub.f32 %v2802_v48, %v2840_v36  ;;  %v9565_v48 = vsub.f32 %v2805_v34, %v2849_v45  ;;  %v9567_v53 = vsub.f32 %v2806_v21, %v2852_v52 }
 0x4aa   :  { %6148 = vmatmul.mubr.f32.vlgmr.msra.gmra.mrb[0].mxu1 %v9360_v33  ;;  %v2846_v33 = vand.u32 4294901760, %v2804_v3  ;;  %v7602_v36 = vpack.c.bf16 %v2945_v42, %v2938_v10 }
 0x4ab   :  { %7569 = vmatpush3.bf16.msra.mxu1 %v9456_v22  ;;  %6392 = vmatprep.mubr.f32.mxu1 %v8989_v51  ;;  %v9473_v51 = vld [vmem:[#allocation7 + $0x60] sm:$0xff]  ;;  %v2971_v7 = vand.u32 4294901760, %v9524_v57  ;;  %v2992_v21 = vand.u32 4294901760, %v9565_v48  ;;  %v2999_v45 = vand.u32 4294901760, %v9567_v53 }
 0x4ac   :  { %7571 = vmatprep.subr.bf16.mxu1 %v9460_v32  ;;  %v9482_v31 = vpack.c.bf16 %v2846_v33, %v2843_v4  ;;  %v2855_v39 = vand.u32 4294901760, %v9473_v51  ;;  %v9547_v35 = vsub.f32 %v2804_v3, %v2846_v33  ;;  %v2959_v3 = vand.u32 4294901760, %v2958_v11 }
 0x4ad   :  { %v2972_v59 = vsub.f32 %v9524_v57, %v2971_v7  ;;  %v2966_v4 = vand.u32 4294901760, %v2965_v55  ;;  %v2993_v56 = vsub.f32 %v9565_v48, %v2992_v21 }
 0x4ae   :  { %v9504_v30 = vpack.c.bf16 %v2858_v28, %v2855_v39  ;;  %v2985_v58 = vand.u32 4294901760, %v9547_v35  ;;  %v7606_v52 = vpack.c.bf16 %v2959_v3, %v2952_v16  ;;  %v9605_v28 = vsub.f32 %v9494_v46, %v2864_v61 }
 0x4af   :  { %7573 = vmatpush3.bf16.msra.mxu1 %v9460_v32  ;;  %v2973_v33 = vand.u32 4294901760, %v2972_v59  ;;  %v2994_v42 = vand.u32 4294901760, %v2993_v56  ;;  %v7650_v56 = vpack.c.bf16 %v9567_v53, %v9565_v48  ;;  %v9729_v48 = vld [vmem:[#allocation5 + $0x28] sm:$0xff] }
 0x4b0   :  { %7575 = vmatprep.subr.bf16.mxu1 %v9466_v63  ;;  %v2986_v34 = vsub.f32 %v9547_v35, %v2985_v58  ;;  %v3027_v14 = vand.u32 4294901760, %v9605_v28 }
 0x4b1   :  { %v7610_v23 = vpack.c.bf16 %v2973_v33, %v2966_v4 }
 0x4b2   :  { %v2987_v43 = vand.u32 4294901760, %v2986_v34  ;;  %v3028_v16 = vsub.f32 %v9605_v28, %v3027_v14  ;;  %v7630_v34 = vpack.c.bf16 %v9479_v24, %v9477_v27  ;;  %v7702_v27 = vpack.c.bf16 %v2957_v2, %v2950_v6 }
 0x4b3   :  { %7577 = vmatpush3.bf16.msra.mxu1 %v9466_v63  ;;  %v7706_v24 = vpack.c.bf16 %v2971_v7, %v2964_v17  ;;  %v2090_v17 = vld [vmem:[#allocation5 + $0x10] sm:$0xff]  ;;  %v2091_v7 = vld [vmem:[#allocation5 + $0x18] sm:$0xff] }
 0x4b4   :  { %7579 = vmatprep.subr.bf16.mxu1 %v9470_v1  ;;  %v7614_v10 = vpack.c.bf16 %v2987_v43, %v2980_v50  ;;  %v3029_v33 = vand.u32 4294901760, %v3028_v16  ;;  %v7642_v50 = vpack.c.bf16 %v9524_v57, %v9522_v60  ;;  %v7646_v43 = vpack.c.bf16 %v9547_v35, %v9545_v41  ;;  %v2088_v60 = vld [vmem:[#allocation5] sm:$0xff]  ;;  %v2089_v57 = vld [vmem:[#allocation5 + $0x8] sm:$0xff] }
 0x4b5   :  { %v2115_v6 = vand.u32 4294901760, %v2089_v57  ;;  %v2118_v41 = vand.u32 4294901760, %v2090_v17  ;;  %v2121_v35 = vand.u32 4294901760, %v2091_v7  ;;  %v9773_v16 = vld [vmem:[#allocation5 + $0x60] sm:$0xff] }
 0x4b7   :  { %7581 = vmatpush3.bf16.msra.mxu1 %v9470_v1 }
 0x4b8   :  { %7583 = vmatprep.subr.bf16.mxu1 %v9482_v31 }
 0x4bb   :  { %7585 = vmatpush3.bf16.msra.mxu1 %v9482_v31 }
 0x4bc   :  { %7587 = vmatprep.subr.bf16.mxu1 %v9490_v38 }
 0x4bf   :  { %7589 = vmatpush3.bf16.msra.mxu1 %v9490_v38 }
 0x4c0   :  { %7591 = vmatprep.subr.bf16.mxu1 %v9504_v30 }
 0x4c3   :  { %7593 = vmatpush3.bf16.msra.mxu1 %v9504_v30 }
 0x4c4   :  { %7595 = vmatprep.subr.bf16.mxu1 %v9531_v13 }
 0x4c7   :  { %7597 = vmatpush3.bf16.msra.mxu1 %v9531_v13 }
 0x4c8   :  { %7599 = vmatprep.subr.bf16.mxu1 %v7598_v40 }
 0x4ca   :  { %6393 = vmatmul.mubr.f32.vlgmr.msra.gmra.mrb[2].mxu1 %v9003_v44  ;;  %v9582_v44 = vsub.f32 %v9473_v51, %v2855_v39  ;;  %v3013_v39 = vand.u32 4294901760, %v9587_v62 }
 0x4cb   :  { %7601 = vmatpush3.bf16.msra.mxu1 %v7598_v40  ;;  %6427 = vmatprep.mubr.f32.mxu1 %v8978_v5  ;;  %v3000_v40 = vsub.f32 %v9567_v53, %v2999_v45 }
 0x4cc   :  { %7603 = vmatprep.subr.bf16.mxu1 %v7602_v36  ;;  %v3006_v51 = vand.u32 4294901760, %v9582_v44  ;;  %v3014_v55 = vsub.f32 %v9587_v62, %v3013_v39 }
 0x4cd   :  { %v3001_v8 = vand.u32 4294901760, %v3000_v40  ;;  %v7658_v40 = vpack.c.bf16 %v9605_v28, %v9600_v12  ;;  %v9755_v28 = vld [vmem:[#allocation5 + $0x40] sm:$0xff] }
 0x4ce   :  { %v3007_v11 = vsub.f32 %v9582_v44, %v3006_v51  ;;  %v3015_v59 = vand.u32 4294901760, %v3014_v55  ;;  %v11064_v55 = vld [vmem:[#allocation24_spill] sm:$0xff] }
 0x4cf   :  { %7605 = vmatpush3.bf16.msra.mxu1 %v7602_v36  ;;  %v7618_v46 = vpack.c.bf16 %v3001_v8, %v2994_v42  ;;  %v3021_v36 = vsub.f32 %v9600_v12, %v3020_v19  ;;  %v11063_v42 = vld [vmem:[#allocation22_spill] sm:$0xff]  ;;  %v7694_v8 = vpack.c.bf16 %v2929_v37, %v2922_v0  ;;  %v7710_v0 = vpack.c.bf16 %v2985_v58, %v2978_v49  ;;  %v9727_v58 = vld [vmem:[#allocation5 + $0x20] sm:$0xff] }
 0x4d0   :  { %7607 = vmatprep.subr.bf16.mxu1 %v7606_v52  ;;  %v3008_v61 = vand.u32 4294901760, %v3007_v11  ;;  %v7698_v11 = vpack.c.bf16 %v2943_v29, %v2936_v26  ;;  %v7714_v37 = vpack.c.bf16 %v2999_v45, %v2992_v21  ;;  %v9725_v49 = vpack.c.bf16 %v2121_v35, %v2118_v41 }
 0x4d1   :  { %v3022_v4 = vand.u32 4294901760, %v3021_v36  ;;  %v2124_v53 = vand.u32 4294901760, %v9727_v58  ;;  %v2127_v21 = vand.u32 4294901760, %v9729_v48  ;;  %v9771_v36 = vld [vmem:[#allocation5 + $0x58] sm:$0xff] }
 0x4d2   :  { %v7622_v3 = vpack.c.bf16 %v3015_v59, %v3008_v61  ;;  %v9769_v59 = vld [vmem:[#allocation5 + $0x50] sm:$0xff] }
 0x4d3   :  { %7609 = vmatpush3.bf16.msra.mxu1 %v7606_v52  ;;  %v7626_v54 = vpack.c.bf16 %v3029_v33, %v3022_v4  ;;  %v7634_v52 = vpack.c.bf16 %v9498_v47, %v9496_v20  ;;  %v7718_v20 = vpack.c.bf16 %v3013_v39, %v3006_v51  ;;  %v7722_v47 = vpack.c.bf16 %v3027_v14, %v3020_v19  ;;  %v9757_v19 = vld [vmem:[#allocation5 + $0x48] sm:$0xff] }
 0x4d4   :  { %7611 = vmatprep.subr.bf16.mxu1 %v7610_v23  ;;  %v9739_v45 = vpack.c.bf16 %v2127_v21, %v2124_v53  ;;  %v2136_v14 = vand.u32 4294901760, %v9755_v28  ;;  %v2145_v4 = vand.u32 4294901760, %v9771_v36  ;;  %v9778_v33 = vld [vmem:[#allocation5 + $0x68] sm:$0xff] }
 0x4d7   :  { %7613 = vmatpush3.bf16.msra.mxu1 %v7610_v23  ;;  %v7638_v23 = vpack.c.bf16 %v9520_v18, %v9518_v25 }
 0x4d8   :  { %7615 = vmatprep.subr.bf16.mxu1 %v7614_v10 }
 0x4db   :  { %7617 = vmatpush3.bf16.msra.mxu1 %v7614_v10  ;;  %v11062_v10 = vld [vmem:[#allocation23_spill] sm:$0xff] }
 0x4dc   :  { %7619 = vmatprep.subr.bf16.mxu1 %v7618_v46 }
 0x4df   :  { %7621 = vmatpush3.bf16.msra.mxu1 %v7618_v46  ;;  %v2139_v46 = vand.u32 4294901760, %v9757_v19 }
 0x4e0   :  { %7623 = vmatprep.subr.bf16.mxu1 %v7622_v3 }
 0x4e1   :  { %v9767_v61 = vpack.c.bf16 %v2139_v46, %v2136_v14 }
 0x4e3   :  { %7625 = vmatpush3.bf16.msra.mxu1 %v7622_v3  ;;  %v2142_v3 = vand.u32 4294901760, %v9769_v59 }
 0x4e4   :  { %7627 = vmatprep.subr.bf16.mxu1 %v7626_v54 }
 0x4e7   :  { %7629 = vmatpush3.bf16.msra.mxu1 %v7626_v54  ;;  %v2148_v54 = vand.u32 4294901760, %v9773_v16 }
 0x4e8   :  { %7631 = vmatprep.subr.bf16.mxu1 %v7630_v34 }
 0x4ea   :  { %6428 = vmatmul.mubr.f32.vlgmr.msra.gmra.mrb[2].mxu1 %v8993_v15 }
 0x4eb   :  { %7633 = vmatpush3.bf16.msra.mxu1 %v7630_v34  ;;  %6462 = vmatprep.mubr.f32.mxu1 %v8981_v9  ;;  %v7654_v9 = vpack.c.bf16 %v9587_v62, %v9582_v44  ;;  %v9741_v44 = vld [vmem:[#allocation5 + $0x30] sm:$0xff]  ;;  %v9743_v62 = vld [vmem:[#allocation5 + $0x38] sm:$0xff] }
 0x4ec   :  { %7635 = vmatprep.subr.bf16.mxu1 %v7634_v52  ;;  %v2130_v51 = vand.u32 4294901760, %v9741_v44  ;;  %v2133_v39 = vand.u32 4294901760, %v9743_v62  ;;  %v9781_v34 = vld [vmem:[#allocation5 + $0x70] sm:$0xff] }
 0x4ee   :  { %v9753_v12 = vpack.c.bf16 %v2133_v39, %v2130_v51 }
 0x4ef   :  { %7637 = vmatpush3.bf16.msra.mxu1 %v7634_v52  ;;  %v9783_v52 = vld [vmem:[#allocation5 + $0x78] sm:$0xff] }
 0x4f0   :  { %7639 = vmatprep.subr.bf16.mxu1 %v7638_v23 }
 0x4f3   :  { %7641 = vmatpush3.bf16.msra.mxu1 %v7638_v23  ;;  %v2151_v23 = vand.u32 4294901760, %v9778_v33 }
 0x4f4   :  { %7643 = vmatprep.subr.bf16.mxu1 %v7642_v50 }
 0x4f7   :  { %7645 = vmatpush3.bf16.msra.mxu1 %v7642_v50  ;;  %v9791_v50 = vpack.c.bf16 %v2145_v4, %v2142_v3 }
 0x4f8   :  { %7647 = vmatprep.subr.bf16.mxu1 %v7646_v43 }
 0x4fb   :  { %7649 = vmatpush3.bf16.msra.mxu1 %v7646_v43  ;;  %v2154_v43 = vand.u32 4294901760, %v9781_v34 }
 0x4fc   :  { %7651 = vmatprep.subr.bf16.mxu1 %v7650_v56 }
 0x4ff   :  { %7653 = vmatpush3.bf16.msra.mxu1 %v7650_v56  ;;  %v2157_v56 = vand.u32 4294901760, %v9783_v52 }
 0x500   :  { %7655 = vmatprep.subr.bf16.mxu1 %v7654_v9 }
 0x503   :  { %7657 = vmatpush3.bf16.msra.mxu1 %v7654_v9  ;;  %v5075_v9 = vld [vmem:[%s10908_s14] ss:$0 sm:$0xff] }
 0x504   :  { %7659 = vmatprep.subr.bf16.mxu1 %v7658_v40 }
 0x507   :  { %7661 = vmatpush3.bf16.msra.mxu1 %v7658_v40  ;;  %v9802_v40 = vpack.c.bf16 %v2151_v23, %v2148_v54 }
 0x508   :  { %7663 = vmatprep.subr.bf16.mxu1 %v9456_v22 }
 0x50a   :  { %6463 = vmatmul.mubr.f32.vlgmr.msra.gmra.mrb[2].mxu1 %v11062_v10 }
 0x50b   :  { %7665 = vmatpush3.bf16.msra.mxu1 %v9456_v22  ;;  %6497 = vmatprep.mubr.f32.mxu1 %v11063_v42 }
 0x50c   :  { %7667 = vmatprep.subr.bf16.mxu1 %v9460_v32 }
 0x50f   :  { %7669 = vmatpush3.bf16.msra.mxu1 %v9460_v32 }
 0x510   :  { %7671 = vmatprep.subr.bf16.mxu1 %v9466_v63 }
 0x513   :  { %7673 = vmatpush3.bf16.msra.mxu1 %v9466_v63 }
 0x514   :  { %7675 = vmatprep.subr.bf16.mxu1 %v9470_v1 }
 0x517   :  { %7677 = vmatpush3.bf16.msra.mxu1 %v9470_v1 }
 0x518   :  { %7679 = vmatprep.subr.bf16.mxu1 %v9482_v31 }
 0x51b   :  { %7681 = vmatpush3.bf16.msra.mxu1 %v9482_v31 }
 0x51c   :  { %7683 = vmatprep.subr.bf16.mxu1 %v9490_v38 }
 0x51f   :  { %7685 = vmatpush3.bf16.msra.mxu1 %v9490_v38 }
 0x520   :  { %7687 = vmatprep.subr.bf16.mxu1 %v9504_v30 }
 0x523   :  { %7689 = vmatpush3.bf16.msra.mxu1 %v9504_v30 }
 0x524   :  { %7691 = vmatprep.subr.bf16.mxu1 %v9531_v13 }
 0x527   :  { %7693 = vmatpush3.bf16.msra.mxu1 %v9531_v13 }
 0x528   :  { %7695 = vmatprep.subr.bf16.mxu1 %v7694_v8 }
 0x52a   :  { %6498 = vmatmul.mubr.f32.vlgmr.msra.gmra.mrb[2].mxu1 %v11064_v55 }
 0x52b   :  { %7697 = vmatpush3.bf16.msra.mxu1 %v7694_v8  ;;  %6532 = vmatprep.mubr.f32.mxu1 %v8978_v5 }
 0x52c   :  { %7699 = vmatprep.subr.bf16.mxu1 %v7698_v11 }
 0x52f   :  { %7701 = vmatpush3.bf16.msra.mxu1 %v7698_v11  ;;  %v9813_v11 = vpack.c.bf16 %v2157_v56, %v2154_v43 }
 0x530   :  { %7703 = vmatprep.subr.bf16.mxu1 %v7702_v27 }
 0x533   :  { %7705 = vmatpush3.bf16.msra.mxu1 %v7702_v27  ;;  %v9817_v27 = vsub.f32 %v2089_v57, %v2115_v6 }
 0x534   :  { %7707 = vmatprep.subr.bf16.mxu1 %v7706_v24 }
 0x537   :  { %7709 = vmatpush3.bf16.msra.mxu1 %v7706_v24 }
 0x538   :  { %7711 = vmatprep.subr.bf16.mxu1 %v7710_v0 }
 0x53b   :  { %7713 = vmatpush3.bf16.msra.mxu1 %v7710_v0  ;;  %v2222_v0 = vand.u32 4294901760, %v9817_v27 }
 0x53c   :  { %7715 = vmatprep.subr.bf16.mxu1 %v7714_v37 }
 0x53f   :  { %7717 = vmatpush3.bf16.msra.mxu1 %v7714_v37 }
 0x540   :  { %7719 = vmatprep.subr.bf16.mxu1 %v7718_v20 }
 0x543   :  { %7721 = vmatpush3.bf16.msra.mxu1 %v7718_v20 }
 0x544   :  { %7723 = vmatprep.subr.bf16.mxu1 %v7722_v47 }
 0x547   :  { %7725 = vmatpush3.bf16.msra.mxu1 %v7722_v47  ;;  %v2223_v47 = vsub.f32 %v9817_v27, %v2222_v0 }
 0x548   :  { %7727 = vmatprep.subr.bf16.mxu1 %v9456_v22 }
 0x54a   :  { %6533 = vmatmul.mubr.f32.vlgmr.msra.gmra.mrb[2].mxu1 %v8993_v15 }
 0x54b   :  { %7729 = vmatpush3.bf16.msra.mxu1 %v9456_v22  ;;  %6567 = vmatprep.mubr.f32.mxu1 %v8978_v5  ;;  %v5071_v5 = vld [vmem:[%s11065_s6] ss:$0 sm:$0xff] }
 0x54c   :  { %7731 = vmatprep.subr.bf16.mxu1 %v9460_v32 }
 0x54f   :  { %7733 = vmatpush3.bf16.msra.mxu1 %v9460_v32 }
 0x550   :  { %7735 = vmatprep.subr.bf16.mxu1 %v9466_v63 }
 0x553   :  { %7737 = vmatpush3.bf16.msra.mxu1 %v9466_v63 }
 0x554   :  { %7739 = vmatprep.subr.bf16.mxu1 %v9470_v1 }
 0x557   :  { %7741 = vmatpush3.bf16.msra.mxu1 %v9470_v1 }
 0x558   :  { %7743 = vmatprep.subr.bf16.mxu1 %v9482_v31 }
 0x55b   :  { %7745 = vmatpush3.bf16.msra.mxu1 %v9482_v31 }
 0x55c   :  { %7747 = vmatprep.subr.bf16.mxu1 %v9490_v38 }
 0x55f   :  { %7749 = vmatpush3.bf16.msra.mxu1 %v9490_v38 }
 0x560   :  { %7751 = vmatprep.subr.bf16.mxu1 %v9504_v30 }
 0x563   :  { %7753 = vmatpush3.bf16.msra.mxu1 %v9504_v30 }
 0x564   :  { %7755 = vmatprep.subr.bf16.mxu1 %v9531_v13 }
 0x567   :  { %7757 = vmatpush3.bf16.msra.mxu1 %v9531_v13  ;;  %v2112_v13 = vand.u32 4294901760, %v2088_v60 }
 0x569   :  { %v9721_v2 = vpack.c.bf16 %v2115_v6, %v2112_v13  ;;  %v9815_v55 = vsub.f32 %v2088_v60, %v2112_v13 }
 0x56a   :  { %6568 = vmatmul.mubr.f32.vlgmr.msra.gmra.mrb[2].mxu1 %v8993_v15 }
 0x56b   :  { %7375 = vmatprep.subr.bf16.mxu0 %v9721_v2  ;;  %v2215_v24 = vand.u32 4294901760, %v9815_v55 }
 0x56c   :  { %7377 = vmatpush3.bf16.msra.mxu0 %v9721_v2 }
 0x56d   :  { %7379 = vmatprep.subr.bf16.mxu0 %v9725_v49  ;;  %v2216_v20 = vsub.f32 %v9815_v55, %v2215_v24 }
 0x570   :  { %7381 = vmatpush3.bf16.msra.mxu0 %v9725_v49 }
 0x571   :  { %7383 = vmatprep.subr.bf16.mxu0 %v9739_v45 }
 0x574   :  { %7385 = vmatpush3.bf16.msra.mxu0 %v9739_v45 }
 0x575   :  { %7387 = vmatprep.subr.bf16.mxu0 %v9753_v12 }
 0x578   :  { %7389 = vmatpush3.bf16.msra.mxu0 %v9753_v12 }
 0x579   :  { %7391 = vmatprep.subr.bf16.mxu0 %v9767_v61 }
 0x57c   :  { %7393 = vmatpush3.bf16.msra.mxu0 %v9767_v61 }
 0x57d   :  { %v6149_v22 = vpop.f32.mrb[0].mxu1  ;;  %7395 = vmatprep.subr.bf16.mxu0 %v9791_v50 }
 0x57e   :  { %v2032_v32 = vpop.f32.mrb[1].mxu1  ;;  %v8144_v1 = vadd.f32 %v6149_v22, %v5071_v5  ;;  %v9834_v22 = vsub.f32 %v2091_v7, %v2121_v35  ;;  %v9874_v35 = vsub.f32 %v9743_v62, %v2133_v39  ;;  %v9890_v62 = vsub.f32 %v9755_v28, %v2136_v14 }
 0x57f   :  { %v8145_v63 = vadd.f32 %v5071_v5, %v2032_v32  ;;  %v9832_v5 = vsub.f32 %v2090_v17, %v2118_v41  ;;  %v2217_v32 = vand.u32 4294901760, %v2216_v20  ;;  %v9869_v41 = vsub.f32 %v9741_v44, %v2130_v51 }
 0x580   :  { %7397 = vmatpush3.bf16.msra.mxu0 %v9791_v50  ;;  %v9895_v39 = vsub.f32 %v9757_v19, %v2139_v46  ;;  %v9912_v19 = vsub.f32 %v9769_v59, %v2142_v3  ;;  %v9917_v46 = vsub.f32 %v9771_v36, %v2145_v4  ;;  %v9929_v59 = vsub.f32 %v9773_v16, %v2148_v54 }
 0x581   :  { %2042 = vadd.xlane.f32.xlu1 %v8145_v63  ;;  %7399 = vmatprep.subr.bf16.mxu0 %v9802_v40  ;;  %v9934_v36 = vsub.f32 %v9778_v33, %v2151_v23  ;;  %v9950_v33 = vsub.f32 %v9781_v34, %v2154_v43  ;;  %v9955_v23 = vsub.f32 %v9783_v52, %v2157_v56 }
 0x584   :  { %7401 = vmatpush3.bf16.msra.mxu0 %v9802_v40 }
 0x585   :  { %2044 = vadd.xlane.f32.xlu1 %v8144_v1  ;;  %7403 = vmatprep.subr.bf16.mxu0 %v9813_v11 }
 0x588   :  { %7405 = vmatpush3.bf16.msra.mxu0 %v9813_v11 }
 0x60e   :  { %v2043_v31 = vpop.xlane.xlu1 %2042 }
 0x60f   :  { %v2046_v38 = vmul.f32 0.0078125, %v2043_v31  ;;  %v10981_v31 = vand.u32 4294901760, %v9834_v22 }
 0x611   :  { %v9713_v26 = vsub.f32 %v8145_v63, %v2046_v38  ;;  %v2224_v63 = vand.u32 4294901760, %v2223_v47  ;;  %v10976_v47 = vand.u32 4294901760, %v9890_v62 }
 0x612   :  { %v2045_v30 = vpop.xlane.xlu1 %2044 }
 0x613   :  { %v2047_v29 = vmul.f32 0.0078125, %v2045_v30  ;;  %v2050_v25 = vmul.f32 %v9713_v26, %v9713_v26  ;;  %v9840_v38 = vpack.c.bf16 %v2224_v63, %v2217_v32  ;;  %v10975_v32 = vand.u32 4294901760, %v9895_v39 }
 0x614   :  { %v2272_v28 = vsub.f32 %v9890_v62, %v10976_v47 }
 0x615   :  { %v9717_v15 = vsub.f32 %v8144_v1, %v2047_v29  ;;  %2052 = vadd.xlane.f32.xlu1 %v2050_v25  ;;  %v2229_v1 = vand.u32 4294901760, %v9832_v5  ;;  %v2237_v29 = vsub.f32 %v9834_v22, %v10981_v31  ;;  %v9851_v25 = vsub.f32 %v9727_v58, %v2124_v53  ;;  %7407 = vmatprep.subr.bf16.mxu0 %v9840_v38 }
 0x616   :  { %v10978_v53 = vand.u32 4294901760, %v9869_v41  ;;  %v2279_v14 = vsub.f32 %v9895_v39, %v10975_v32 }
 0x617   :  { %v2051_v18 = vmul.f32 %v9717_v15, %v9717_v15  ;;  %v2230_v30 = vsub.f32 %v9832_v5, %v2229_v1  ;;  %v2238_v57 = vand.u32 4294901760, %v2237_v29  ;;  %v10980_v13 = vand.u32 4294901760, %v9851_v25 }
 0x618   :  { %v2258_v44 = vsub.f32 %v9869_v41, %v10978_v53  ;;  %v2280_v29 = vand.u32 4294901760, %v2279_v14  ;;  %v10969_v14 = vand.u32 4294901760, %v9955_v23 }
 0x619   :  { %2054 = vadd.xlane.f32.xlu1 %v2051_v18  ;;  %v9856_v18 = vsub.f32 %v9729_v48, %v2127_v21  ;;  %v2231_v60 = vand.u32 4294901760, %v2230_v30  ;;  %v2244_v7 = vsub.f32 %v9851_v25, %v10980_v13  ;;  %v10977_v21 = vand.u32 4294901760, %v9874_v35 }
 0x61a   :  { %v2273_v30 = vand.u32 4294901760, %v2272_v28  ;;  %v10970_v28 = vand.u32 4294901760, %v9950_v33  ;;  %v2321_v43 = vsub.f32 %v9955_v23, %v10969_v14 }
 0x61b   :  { %v10979_v6 = vand.u32 4294901760, %v9856_v18  ;;  %v9861_v17 = vpack.c.bf16 %v2238_v57, %v2231_v60  ;;  %v2245_v48 = vand.u32 4294901760, %v2244_v7  ;;  %v2265_v51 = vsub.f32 %v9874_v35, %v10977_v21 }
 0x61c   :  { %v10974_v60 = vand.u32 4294901760, %v9912_v19  ;;  %v10973_v57 = vand.u32 4294901760, %v9917_v46  ;;  %v9921_v7 = vpack.c.bf16 %v2280_v29, %v2273_v30  ;;  %v2314_v34 = vsub.f32 %v9950_v33, %v10970_v28 }
 0x61d   :  { %v2251_v58 = vsub.f32 %v9856_v18, %v10979_v6  ;;  %v2266_v20 = vand.u32 4294901760, %v2265_v51  ;;  %v2322_v56 = vand.u32 4294901760, %v2321_v43 }
 0x61e   :  { %v2293_v3 = vsub.f32 %v9917_v46, %v10973_v57  ;;  %v2315_v52 = vand.u32 4294901760, %v2314_v34 }
 0x620   :  { %v9969_v29 = vpack.c.bf16 %v2322_v56, %v2315_v52 }
 0x63d   :  { %v6569_v10 = vpop.f32.mrb[2].mxu1 }
 0x63e   :  { %v3492_v42 = vpop.f32.mrb[3].mxu1  ;;  %v9822_v37 = vadd.f32 %v6569_v10, %v5075_v9 }
 0x63f   :  { %v9806_v8 = vadd.f32 %v5075_v9, %v3492_v42  ;;  %v2252_v9 = vand.u32 4294901760, %v2251_v58  ;;  %v2259_v42 = vand.u32 4294901760, %v2258_v44  ;;  %v2286_v58 = vsub.f32 %v9912_v19, %v10974_v60  ;;  %v5073_v60 = vld [vmem:[%s10904_s10] ss:$0 sm:$0xff] }
 0x640   :  { %v2294_v44 = vand.u32 4294901760, %v2293_v3  ;;  %v9977_v3 = vpack.c.bf16 %v9834_v22, %v9832_v5  ;;  %v11070_v5 = vand.u32 4294901760, %v9874_v35 }
 0x641   :  { %3502 = vadd.xlane.f32.xlu1 %v9806_v8  ;;  %v9897_v10 = vpack.c.bf16 %v2252_v9, %v2245_v48  ;;  %v9901_v63 = vpack.c.bf16 %v2266_v20, %v2259_v42  ;;  %v2287_v4 = vand.u32 4294901760, %v2286_v58  ;;  %v10972_v48 = vand.u32 4294901760, %v9929_v59 }
 0x642   :  { %v10971_v9 = vand.u32 4294901760, %v9934_v36  ;;  %v9973_v58 = vpack.c.bf16 %v9817_v27, %v9815_v55  ;;  %v11067_v55 = vand.u32 4294901760, %v9851_v25  ;;  %v11068_v27 = vand.u32 4294901760, %v9856_v18 }
 0x643   :  { %v2300_v16 = vsub.f32 %v9929_v59, %v10972_v48  ;;  %v9957_v51 = vpack.c.bf16 %v2294_v44, %v2287_v4  ;;  %v9981_v4 = vpack.c.bf16 %v9856_v18, %v9851_v25  ;;  %v9985_v44 = vpack.c.bf16 %v9874_v35, %v9869_v41  ;;  %v5072_v48 = vld [vmem:[%s10903_s9] ss:$0 sm:$0xff] }
 0x644   :  { %v2307_v54 = vsub.f32 %v9934_v36, %v10971_v9  ;;  %v11073_v25 = vand.u32 4294901760, %v9912_v19  ;;  %v11074_v18 = vand.u32 4294901760, %v9917_v46  ;;  %v11076_v35 = vand.u32 4294901760, %v9934_v36 }
 0x645   :  { %3504 = vadd.xlane.f32.xlu1 %v9822_v37  ;;  %v2301_v42 = vand.u32 4294901760, %v2300_v16  ;;  %v9989_v16 = vpack.c.bf16 %v9895_v39, %v9890_v62 }
 0x646   :  { %v2308_v20 = vand.u32 4294901760, %v2307_v54  ;;  %v9993_v54 = vpack.c.bf16 %v9917_v46, %v9912_v19  ;;  %v3550_v46 = vld [vmem:[#allocation8 + $0x10] sm:$0xff] }
 0x648   :  { %v9961_v30 = vpack.c.bf16 %v2308_v20, %v2301_v42  ;;  %v9997_v42 = vpack.c.bf16 %v9934_v36, %v9929_v59  ;;  %v10001_v20 = vpack.c.bf16 %v9955_v23, %v9950_v33 }
 0x6a2   :  { %v2053_v34 = vpop.xlane.xlu1 %2052 }
 0x6a3   :  { %v2056_v43 = vmul.f32 0.0078125, %v2053_v34 }
 0x6a5   :  { %v2058_v52 = vadd.f32 1e-05, %v2056_v43 }
 0x6a6   :  { %v2055_v56 = vpop.xlane.xlu1 %2054 }
 0x6a7   :  { %8249 = vrsqrt.f32 %v2058_v52  ;;  %v2057_v14 = vmul.f32 0.0078125, %v2055_v56 }
 0x6a9   :  { %v2059_v28 = vadd.f32 1e-05, %v2057_v14 }
 0x6ab   :  { %8251 = vrsqrt.f32 %v2059_v28 }
 0x6b1   :  { %v8250_v9 = vpop.eup %8249 }
 0x6b2   :  { %v2062_v57 = vmul.f32 %v8250_v9, %v9713_v26 }
 0x6b4   :  { %v2071_v32 = vmul.f32 %v5072_v48, %v2062_v57 }
 0x6b5   :  { %v8252_v47 = vpop.eup %8251 }
 0x6b6   :  { %v2063_v34 = vmul.f32 %v8252_v47, %v9717_v15  ;;  %v2080_v43 = vadd.f32 %v5073_v60, %v2071_v32 }
 0x6b8   :  { %v2072_v52 = vmul.f32 %v5072_v48, %v2063_v34  ;;  %vm2082_vm3 = vcmp.ge.f32.partialorder %v2080_v43, 0.0  ;;  %v2084_v14 = vmul.f32 0.01, %v2080_v43 }
 0x6ba   :  { %v2081_v28 = vadd.f32 %v5073_v60, %v2072_v52  ;;  %v2086_v56 = vsel %vm2082_vm3, %v2080_v43, %v2084_v14 }
 0x6bb   :  { %v10011_v21 = vand.u32 4294901760, %v2086_v56 }
 0x6bc   :  { %vm2083_vm4 = vcmp.ge.f32.partialorder %v2081_v28, 0.0  ;;  %v2085_v53 = vmul.f32 0.01, %v2081_v28 }
 0x6bd   :  { %v2193_v26 = vsub.f32 %v2086_v56, %v10011_v21  ;;  %v10164_v56 = vld [vmem:[#allocation8 + $0x48] sm:$0xff] }
 0x6be   :  { %v2087_v9 = vsel %vm2083_vm4, %v2081_v28, %v2085_v53  ;;  %v10162_v28 = vld [vmem:[#allocation8 + $0x40] sm:$0xff] }
 0x6bf   :  { %v2194_v6 = vand.u32 4294901760, %v2193_v26  ;;  %v10014_v13 = vand.u32 4294901760, %v2087_v9 }
 0x6c1   :  { %v2195_v57 = vsub.f32 %v2193_v26, %v2194_v6  ;;  %v10017_v31 = vsub.f32 %v2087_v9, %v10014_v13  ;;  %v3599_v9 = vand.u32 4294901760, %v10164_v56 }
 0x6c3   :  { %v2196_v15 = vand.u32 4294901760, %v2195_v57  ;;  %v2204_v47 = vand.u32 4294901760, %v10017_v31 }
 0x6c5   :  { %6182 = vmatprep.mubr.f32.mxu0 %v2196_v15  ;;  %v2205_v32 = vsub.f32 %v10017_v31, %v2204_v47  ;;  %v10174_v15 = vld [vmem:[#allocation8 + $0x50] sm:$0xff] }
 0x6c7   :  { %v2206_v60 = vand.u32 4294901760, %v2205_v32 }
 0x6c9   :  { %6183 = vmatmul.mubr.f32.vlgmr.msra.gmra.mrb[2].mxu0 %v2206_v60 }
 0x6ca   :  { %7409 = vmatpush3.bf16.msra.mxu0 %v9840_v38  ;;  %6217 = vmatprep.mubr.f32.mxu0 %v10011_v21 }
 0x6cb   :  { %7411 = vmatprep.subr.bf16.mxu0 %v9861_v17 }
 0x6ce   :  { %7413 = vmatpush3.bf16.msra.mxu0 %v9861_v17  ;;  %v3503_v53 = vpop.xlane.xlu1 %3502 }
 0x6cf   :  { %v3506_v48 = vmul.f32 0.0078125, %v3503_v53  ;;  %7415 = vmatprep.subr.bf16.mxu0 %v9897_v10  ;;  %v5076_v53 = vld [vmem:[%s10909_s15] ss:$0 sm:$0xff] }
 0x6d1   :  { %v10029_v34 = vsub.f32 %v9806_v8, %v3506_v48 }
 0x6d2   :  { %7417 = vmatpush3.bf16.msra.mxu0 %v9897_v10  ;;  %v3505_v43 = vpop.xlane.xlu1 %3504 }
 0x6d3   :  { %v3507_v52 = vmul.f32 0.0078125, %v3505_v43  ;;  %7419 = vmatprep.subr.bf16.mxu0 %v9901_v63  ;;  %v3510_v38 = vmul.f32 %v10029_v34, %v10029_v34 }
 0x6d5   :  { %v10036_v14 = vsub.f32 %v9822_v37, %v3507_v52  ;;  %3512 = vadd.xlane.f32.xlu1 %v3510_v38  ;;  %v7502_v37 = vpack.c.bf16 %v2222_v0, %v2215_v24  ;;  %v7510_v24 = vpack.c.bf16 %v11068_v27, %v11067_v55  ;;  %v11069_v0 = vand.u32 4294901760, %v9869_v41 }
 0x6d6   :  { %7421 = vmatpush3.bf16.msra.mxu0 %v9901_v63  ;;  %v7522_v63 = vpack.c.bf16 %v11074_v18, %v11073_v25  ;;  %v11075_v41 = vand.u32 4294901760, %v9929_v59  ;;  %v3602_v52 = vand.u32 4294901760, %v10174_v15 }
 0x6d7   :  { %7423 = vmatprep.subr.bf16.mxu0 %v9921_v7  ;;  %v3511_v8 = vmul.f32 %v10036_v14, %v10036_v14 }
 0x6d9   :  { %3514 = vadd.xlane.f32.xlu0 %v3511_v8  ;;  %v5077_v8 = vld [vmem:[%s10910_s16] ss:$0 sm:$0xff] }
 0x6da   :  { %7425 = vmatpush3.bf16.msra.mxu0 %v9921_v7  ;;  %v7526_v7 = vpack.c.bf16 %v11076_v35, %v11075_v41 }
 0x6db   :  { %7427 = vmatprep.subr.bf16.mxu0 %v9957_v51 }
 0x6de   :  { %7429 = vmatpush3.bf16.msra.mxu0 %v9957_v51 }
 0x6df   :  { %7431 = vmatprep.subr.bf16.mxu0 %v9961_v30 }
 0x6e2   :  { %7433 = vmatpush3.bf16.msra.mxu0 %v9961_v30  ;;  %v10139_v30 = vld [vmem:[#allocation8 + $0x28] sm:$0xff] }
 0x6e3   :  { %7435 = vmatprep.subr.bf16.mxu0 %v9969_v29 }
 0x6e6   :  { %7437 = vmatpush3.bf16.msra.mxu0 %v9969_v29 }
 0x6e7   :  { %7439 = vmatprep.subr.bf16.mxu0 %v9973_v58 }
 0x6e9   :  { %6218 = vmatmul.mubr.f32.vlgmr.msra.gmra.mrb[2].mxu0 %v10014_v13 }
 0x6ea   :  { %7441 = vmatpush3.bf16.msra.mxu0 %v9973_v58  ;;  %6252 = vmatprep.mubr.f32.mxu0 %v2193_v26  ;;  %v3596_v26 = vand.u32 4294901760, %v10162_v28 }
 0x6eb   :  { %7443 = vmatprep.subr.bf16.mxu0 %v9977_v3 }
 0x6ec   :  { %v10190_v43 = vpack.c.bf16 %v3599_v9, %v3596_v26 }
 0x6ee   :  { %7445 = vmatpush3.bf16.msra.mxu0 %v9977_v3 }
 0x6ef   :  { %7447 = vmatprep.subr.bf16.mxu0 %v9981_v4 }
 0x6f2   :  { %7449 = vmatpush3.bf16.msra.mxu0 %v9981_v4  ;;  %v3587_v4 = vand.u32 4294901760, %v10139_v30 }
 0x6f3   :  { %7451 = vmatprep.subr.bf16.mxu0 %v9985_v44 }
 0x6f6   :  { %7453 = vmatpush3.bf16.msra.mxu0 %v9985_v44  ;;  %v10147_v44 = vld [vmem:[#allocation8 + $0x30] sm:$0xff] }
 0x6f7   :  { %7455 = vmatprep.subr.bf16.mxu0 %v9989_v16 }
 0x6fa   :  { %7457 = vmatpush3.bf16.msra.mxu0 %v9989_v16  ;;  %v10149_v16 = vld [vmem:[#allocation8 + $0x38] sm:$0xff] }
 0x6fb   :  { %7459 = vmatprep.subr.bf16.mxu0 %v9993_v54 }
 0x6fe   :  { %7461 = vmatpush3.bf16.msra.mxu0 %v9993_v54 }
 0x6ff   :  { %7463 = vmatprep.subr.bf16.mxu0 %v9997_v42 }
 0x702   :  { %7465 = vmatpush3.bf16.msra.mxu0 %v9997_v42  ;;  %v3590_v42 = vand.u32 4294901760, %v10147_v44 }
 0x703   :  { %7467 = vmatprep.subr.bf16.mxu0 %v10001_v20 }
 0x706   :  { %7469 = vmatpush3.bf16.msra.mxu0 %v10001_v20  ;;  %v3593_v20 = vand.u32 4294901760, %v10149_v16 }
 0x707   :  { %7471 = vmatprep.subr.bf16.mxu0 %v9721_v2 }
 0x709   :  { %6253 = vmatmul.mubr.f32.vlgmr.msra.gmra.mrb[2].mxu0 %v10017_v31  ;;  %v11072_v31 = vand.u32 4294901760, %v9895_v39  ;;  %v11078_v39 = vand.u32 4294901760, %v9955_v23  ;;  %v10137_v23 = vld [vmem:[#allocation8 + $0x20] sm:$0xff] }
 0x70a   :  { %7473 = vmatpush3.bf16.msra.mxu0 %v9721_v2  ;;  %6287 = vmatprep.mubr.f32.mxu0 %v2194_v6  ;;  %v11066_v6 = vand.u32 4294901760, %v9834_v22  ;;  %v7514_v22 = vpack.c.bf16 %v11070_v5, %v11069_v0  ;;  %v3584_v3 = vand.u32 4294901760, %v10137_v23  ;;  %v10205_v0 = vld [vmem:[#allocation8 + $0x70] sm:$0xff]  ;;  %v10207_v5 = vld [vmem:[#allocation8 + $0x78] sm:$0xff] }
 0x70b   :  { %7475 = vmatprep.subr.bf16.mxu0 %v9725_v49 }
 0x70c   :  { %v7506_v17 = vpack.c.bf16 %v11066_v6, %v2229_v1  ;;  %v11071_v1 = vand.u32 4294901760, %v9890_v62  ;;  %v11077_v62 = vand.u32 4294901760, %v9950_v33  ;;  %v10198_v6 = vld [vmem:[#allocation8 + $0x60] sm:$0xff] }
 0x70e   :  { %7477 = vmatpush3.bf16.msra.mxu0 %v9725_v49  ;;  %v7518_v10 = vpack.c.bf16 %v11072_v31, %v11071_v1  ;;  %v7530_v51 = vpack.c.bf16 %v11078_v39, %v11077_v62  ;;  %v3617_v62 = vand.u32 4294901760, %v10207_v5 }
 0x70f   :  { %7479 = vmatprep.subr.bf16.mxu0 %v9739_v45 }
 0x712   :  { %7481 = vmatpush3.bf16.msra.mxu0 %v9739_v45 }
 0x713   :  { %7483 = vmatprep.subr.bf16.mxu0 %v9753_v12 }
 0x716   :  { %7485 = vmatpush3.bf16.msra.mxu0 %v9753_v12 }
 0x717   :  { %7487 = vmatprep.subr.bf16.mxu0 %v9767_v61 }
 0x71a   :  { %7489 = vmatpush3.bf16.msra.mxu0 %v9767_v61 }
 0x71b   :  { %7491 = vmatprep.subr.bf16.mxu0 %v9791_v50 }
 0x71e   :  { %7493 = vmatpush3.bf16.msra.mxu0 %v9791_v50 }
 0x71f   :  { %7495 = vmatprep.subr.bf16.mxu0 %v9802_v40 }
 0x722   :  { %7497 = vmatpush3.bf16.msra.mxu0 %v9802_v40 }
 0x723   :  { %7499 = vmatprep.subr.bf16.mxu0 %v9813_v11 }
 0x726   :  { %7501 = vmatpush3.bf16.msra.mxu0 %v9813_v11 }
 0x727   :  { %7503 = vmatprep.subr.bf16.mxu0 %v7502_v37 }
 0x729   :  { %6288 = vmatmul.mubr.f32.vlgmr.msra.gmra.mrb[2].mxu0 %v2204_v47  ;;  %v10176_v47 = vld [vmem:[#allocation8 + $0x58] sm:$0xff] }
 0x72a   :  { %7505 = vmatpush3.bf16.msra.mxu0 %v7502_v37  ;;  %6322 = vmatprep.mubr.f32.mxu0 %v10011_v21  ;;  %v3605_v38 = vand.u32 4294901760, %v10176_v47 }
 0x72b   :  { %7507 = vmatprep.subr.bf16.mxu0 %v7506_v17 }
 0x72e   :  { %7509 = vmatpush3.bf16.msra.mxu0 %v7506_v17  ;;  %v10200_v17 = vld [vmem:[#allocation8 + $0x68] sm:$0xff] }
 0x72f   :  { %7511 = vmatprep.subr.bf16.mxu0 %v7510_v24  ;;  %v3611_v25 = vand.u32 4294901760, %v10200_v17 }
 0x732   :  { %7513 = vmatpush3.bf16.msra.mxu0 %v7510_v24 }
 0x733   :  { %7515 = vmatprep.subr.bf16.mxu0 %v7514_v22 }
 0x736   :  { %7517 = vmatpush3.bf16.msra.mxu0 %v7514_v22 }
 0x737   :  { %7519 = vmatprep.subr.bf16.mxu0 %v7518_v10 }
 0x73a   :  { %7521 = vmatpush3.bf16.msra.mxu0 %v7518_v10  ;;  %v10218_v10 = vpack.c.bf16 %v3605_v38, %v3602_v52 }
 0x73b   :  { %7523 = vmatprep.subr.bf16.mxu0 %v7522_v63 }
 0x73e   :  { %7525 = vmatpush3.bf16.msra.mxu0 %v7522_v63 }
 0x73f   :  { %7527 = vmatprep.subr.bf16.mxu0 %v7526_v7 }
 0x742   :  { %7529 = vmatpush3.bf16.msra.mxu0 %v7526_v7  ;;  %v3614_v7 = vand.u32 4294901760, %v10205_v0 }
 0x743   :  { %7531 = vmatprep.subr.bf16.mxu0 %v7530_v51 }
 0x746   :  { %7533 = vmatpush3.bf16.msra.mxu0 %v7530_v51 }
 0x747   :  { %7535 = vmatprep.subr.bf16.mxu0 %v9721_v2 }
 0x749   :  { %6323 = vmatmul.mubr.f32.vlgmr.msra.gmra.mrb[2].mxu0 %v10014_v13 }
 0x74a   :  { %7537 = vmatpush3.bf16.msra.mxu0 %v9721_v2  ;;  %6357 = vmatprep.mubr.f32.mxu0 %v10011_v21  ;;  %v3548_v2 = vld [vmem:[#allocation8] sm:$0xff]  ;;  %v3549_v21 = vld [vmem:[#allocation8 + $0x8] sm:$0xff] }
 0x74b   :  { %7539 = vmatprep.subr.bf16.mxu0 %v9725_v49  ;;  %v3575_v19 = vand.u32 4294901760, %v3549_v21 }
 0x74d   :  { %v10178_v32 = vsub.f32 %v3549_v21, %v3575_v19 }
 0x74e   :  { %7541 = vmatpush3.bf16.msra.mxu0 %v9725_v49  ;;  %v3572_v49 = vand.u32 4294901760, %v3548_v2 }
 0x74f   :  { %7543 = vmatprep.subr.bf16.mxu0 %v9739_v45  ;;  %v3682_v55 = vand.u32 4294901760, %v10178_v32 }
 0x750   :  { %v10172_v57 = vsub.f32 %v3548_v2, %v3572_v49 }
 0x751   :  { %v3683_v35 = vsub.f32 %v10178_v32, %v3682_v55 }
 0x752   :  { %7545 = vmatpush3.bf16.msra.mxu0 %v9739_v45  ;;  %v3551_v45 = vld [vmem:[#allocation8 + $0x18] sm:$0xff] }
 0x753   :  { %7547 = vmatprep.subr.bf16.mxu0 %v9753_v12  ;;  %v3581_v36 = vand.u32 4294901760, %v3551_v45 }
 0x755   :  { %v10211_v31 = vsub.f32 %v3551_v45, %v3581_v36  ;;  %v10250_v45 = vsub.f32 %v10139_v30, %v3587_v4 }
 0x756   :  { %7549 = vmatpush3.bf16.msra.mxu0 %v9753_v12  ;;  %v3578_v12 = vand.u32 4294901760, %v3550_v46 }
 0x757   :  { %7551 = vmatprep.subr.bf16.mxu0 %v9767_v61  ;;  %v3696_v21 = vand.u32 4294901760, %v10211_v31 }
 0x758   :  { %v10142_v58 = vpack.c.bf16 %v3581_v36, %v3578_v12  ;;  %v10209_v1 = vsub.f32 %v3550_v46, %v3578_v12  ;;  %v10245_v46 = vsub.f32 %v10137_v23, %v3584_v3  ;;  %v3684_v12 = vand.u32 4294901760, %v3683_v35 }
 0x759   :  { %v10266_v23 = vpack.c.bf16 %v3617_v62, %v3614_v7 }
 0x75a   :  { %7553 = vmatpush3.bf16.msra.mxu0 %v9767_v61  ;;  %v10135_v61 = vpack.c.bf16 %v3575_v19, %v3572_v49  ;;  %v3689_v2 = vand.u32 4294901760, %v10209_v1 }
 0x75b   :  { %7555 = vmatprep.subr.bf16.mxu0 %v9791_v50 }
 0x75e   :  { %7557 = vmatpush3.bf16.msra.mxu0 %v9791_v50 }
 0x75f   :  { %7559 = vmatprep.subr.bf16.mxu0 %v9802_v40 }
 0x762   :  { %7561 = vmatpush3.bf16.msra.mxu0 %v9802_v40  ;;  %v3513_v59 = vpop.xlane.xlu1 %3512 }
 0x763   :  { %v3516_v33 = vmul.f32 0.0078125, %v3513_v59  ;;  %7563 = vmatprep.subr.bf16.mxu0 %v9813_v11 }
 0x765   :  { %v3518_v50 = vadd.f32 1e-05, %v3516_v33 }
 0x766   :  { %7565 = vmatpush3.bf16.msra.mxu0 %v9813_v11  ;;  %v3515_v29 = vpop.xlane.xlu0 %3514  ;;  %v10158_v11 = vpack.c.bf16 %v3587_v4, %v3584_v3  ;;  %v3697_v3 = vsub.f32 %v10211_v31, %v3696_v21 }
 0x767   :  { %8253 = vrsqrt.f32 %v3518_v50  ;;  %v3517_v40 = vmul.f32 0.0078125, %v3515_v29  ;;  %7759 = vmatprep.subr.bf16.mxu0 %v10135_v61  ;;  %v10256_v50 = vsub.f32 %v10147_v44, %v3590_v42  ;;  %v10259_v29 = vsub.f32 %v10149_v16, %v3593_v20 }
 0x768   :  { %v3703_v16 = vand.u32 4294901760, %v10245_v46 }
 0x769   :  { %v3519_v54 = vadd.f32 1e-05, %v3517_v40  ;;  %6358 = vmatmul.mubr.f32.vlgmr.msra.gmra.mrb[2].mxu0 %v10014_v13  ;;  %v10168_v13 = vpack.c.bf16 %v3593_v20, %v3590_v42  ;;  %v3690_v40 = vsub.f32 %v10209_v1, %v3689_v2 }
 0x76a   :  { %7761 = vmatpush3.bf16.msra.mxu0 %v10135_v61 }
 0x76b   :  { %8255 = vrsqrt.f32 %v3519_v54  ;;  %7763 = vmatprep.subr.bf16.mxu0 %v10142_v58  ;;  %v3710_v54 = vand.u32 4294901760, %v10250_v45 }
 0x76e   :  { %7765 = vmatpush3.bf16.msra.mxu0 %v10142_v58 }
 0x76f   :  { %7767 = vmatprep.subr.bf16.mxu0 %v10158_v11 }
 0x771   :  { %v8254_v60 = vpop.eup %8253 }
 0x772   :  { %v3522_v48 = vmul.f32 %v8254_v60, %v10029_v34  ;;  %7769 = vmatpush3.bf16.msra.mxu0 %v10158_v11  ;;  %v3675_v34 = vand.u32 4294901760, %v10172_v57 }
 0x773   :  { %7771 = vmatprep.subr.bf16.mxu0 %v10168_v13 }
 0x774   :  { %v3531_v37 = vmul.f32 %v5076_v53, %v3522_v48  ;;  %v3676_v18 = vsub.f32 %v10172_v57, %v3675_v34  ;;  %v3724_v48 = vand.u32 4294901760, %v10259_v29 }
 0x775   :  { %v8256_v27 = vpop.eup %8255 }
 0x776   :  { %v3523_v24 = vmul.f32 %v8256_v27, %v10036_v14  ;;  %7773 = vmatpush3.bf16.msra.mxu0 %v10168_v13  ;;  %v3540_v22 = vadd.f32 %v5077_v8, %v3531_v37  ;;  %v3608_v14 = vand.u32 4294901760, %v10198_v6  ;;  %v3677_v59 = vand.u32 4294901760, %v3676_v18 }
 0x777   :  { %7775 = vmatprep.subr.bf16.mxu0 %v10190_v43  ;;  %v3698_v37 = vand.u32 4294901760, %v3697_v3  ;;  %v10292_v27 = vsub.f32 %v10162_v28, %v3596_v26  ;;  %v3725_v26 = vsub.f32 %v10259_v29, %v3724_v48 }
 0x778   :  { %v3532_v63 = vmul.f32 %v5076_v53, %v3523_v24  ;;  %vm3542_vm5 = vcmp.ge.f32.partialorder %v3540_v22, 0.0  ;;  %v3544_v41 = vmul.f32 0.01, %v3540_v22  ;;  %v10238_v49 = vpack.c.bf16 %v3611_v25, %v3608_v14 }
 0x779   :  { %v7790_v42 = vpack.c.bf16 %v3684_v12, %v3677_v59  ;;  %v3717_v53 = vand.u32 4294901760, %v10256_v50  ;;  %v10297_v24 = vsub.f32 %v10164_v56, %v3599_v9  ;;  %v3731_v9 = vand.u32 4294901760, %v10292_v27 }
 0x77a   :  { %7777 = vmatpush3.bf16.msra.mxu0 %v10190_v43  ;;  %v3541_v39 = vadd.f32 %v5077_v8, %v3532_v63  ;;  %v3546_v51 = vsel %vm3542_vm5, %v3540_v22, %v3544_v41  ;;  %v3691_v8 = vand.u32 4294901760, %v3690_v40  ;;  %v3704_v63 = vsub.f32 %v10245_v46, %v3703_v16 }
 0x77b   :  { %7779 = vmatprep.subr.bf16.mxu0 %v10218_v10  ;;  %v10240_v19 = vand.u32 4294901760, %v3546_v51  ;;  %v3711_v41 = vsub.f32 %v10250_v45, %v3710_v54  ;;  %v3718_v56 = vsub.f32 %v10256_v50, %v3717_v53  ;;  %v3738_v35 = vand.u32 4294901760, %v10297_v24 }
 0x77c   :  { %vm3543_vm6 = vcmp.ge.f32.partialorder %v3541_v39, 0.0  ;;  %v3545_v36 = vmul.f32 0.01, %v3541_v39  ;;  %v7794_v12 = vpack.c.bf16 %v3698_v37, %v3691_v8  ;;  %v3726_v3 = vand.u32 4294901760, %v3725_v26 }
 0x77d   :  { %v10253_v33 = vsub.f32 %v3546_v51, %v10240_v19  ;;  %v10327_v51 = vsub.f32 %v10176_v47, %v3605_v38  ;;  %v3719_v40 = vand.u32 4294901760, %v3718_v56  ;;  %v3739_v47 = vsub.f32 %v10297_v24, %v3738_v35 }
 0x77e   :  { %7781 = vmatpush3.bf16.msra.mxu0 %v10218_v10  ;;  %v3547_v30 = vsel %vm3543_vm6, %v3541_v39, %v3545_v36  ;;  %v10322_v39 = vsub.f32 %v10174_v15, %v3602_v52  ;;  %v3705_v36 = vand.u32 4294901760, %v3704_v63  ;;  %v3732_v15 = vsub.f32 %v10292_v27, %v3731_v9 }
 0x77f   :  { %7783 = vmatprep.subr.bf16.mxu0 %v10238_v49  ;;  %v3654_v4 = vand.u32 4294901760, %v10253_v33  ;;  %v10276_v44 = vand.u32 4294901760, %v3547_v30  ;;  %v3752_v38 = vand.u32 4294901760, %v10327_v51  ;;  %v10346_v8 = vsub.f32 %v10200_v17, %v3611_v25 }
 0x780   :  { %v3745_v52 = vand.u32 4294901760, %v10322_v39  ;;  %v7802_v37 = vpack.c.bf16 %v3726_v3, %v3719_v40  ;;  %v3740_v63 = vand.u32 4294901760, %v3739_v47  ;;  %v10359_v17 = vsub.f32 %v10205_v0, %v3614_v7 }
 0x781   :  { %v3655_v20 = vsub.f32 %v10253_v33, %v3654_v4  ;;  %v10284_v60 = vsub.f32 %v3547_v30, %v10276_v44  ;;  %v3712_v30 = vand.u32 4294901760, %v3711_v41  ;;  %v10364_v25 = vsub.f32 %v10207_v5, %v3617_v62 }
 0x782   :  { %7785 = vmatpush3.bf16.msra.mxu0 %v10238_v49  ;;  %v3746_v41 = vsub.f32 %v10322_v39, %v3745_v52  ;;  %v3773_v0 = vand.u32 4294901760, %v10359_v17 }
 0x783   :  { %7787 = vmatprep.subr.bf16.mxu0 %v10266_v23  ;;  %v3656_v22 = vand.u32 4294901760, %v3655_v20  ;;  %v3664_v18 = vand.u32 4294901760, %v10284_v60  ;;  %v7798_v20 = vpack.c.bf16 %v3712_v30, %v3705_v36  ;;  %v3780_v7 = vand.u32 4294901760, %v10364_v25 }
 0x784   :  { %v3747_v26 = vand.u32 4294901760, %v3746_v41  ;;  %v3774_v40 = vsub.f32 %v10359_v17, %v3773_v0  ;;  %v7830_v41 = vpack.c.bf16 %v10250_v45, %v10245_v46 }
 0x785   :  { %6602 = vmatprep.mubr.f32.mxu0 %v3656_v22  ;;  %v3665_v28 = vsub.f32 %v10284_v60, %v3664_v18  ;;  %v3733_v22 = vand.u32 4294901760, %v3732_v15  ;;  %v3781_v3 = vsub.f32 %v10364_v25, %v3780_v7 }
 0x786   :  { %7789 = vmatpush3.bf16.msra.mxu0 %v10266_v23  ;;  %v3775_v47 = vand.u32 4294901760, %v3774_v40 }
 0x787   :  { %7791 = vmatprep.subr.bf16.mxu0 %v7790_v42  ;;  %v3666_v59 = vand.u32 4294901760, %v3665_v28  ;;  %v3753_v28 = vsub.f32 %v10327_v51, %v3752_v38  ;;  %v7806_v56 = vpack.c.bf16 %v3740_v63, %v3733_v22  ;;  %v7822_v22 = vpack.c.bf16 %v10178_v32, %v10172_v57 }
 0x788   :  { %v7826_v63 = vpack.c.bf16 %v10211_v31, %v10209_v1  ;;  %v7894_v57 = vpack.c.bf16 %v3710_v54, %v3703_v16  ;;  %v7898_v32 = vpack.c.bf16 %v3724_v48, %v3717_v53  ;;  %v7914_v31 = vpack.c.bf16 %v3780_v7, %v3773_v0  ;;  %v4301_v48 = vld [vmem:[%s10915_s21] sm:$0xff] }
 0x789   :  { %6603 = vmatmul.mubr.f32.vlgmr.msra.gmra.mrb[4].mxu0 %v3666_v59  ;;  %v3754_v59 = vand.u32 4294901760, %v3753_v28  ;;  %v7834_v28 = vpack.c.bf16 %v10259_v29, %v10256_v50 }
 0x78a   :  { %7793 = vmatpush3.bf16.msra.mxu0 %v7790_v42  ;;  %6637 = vmatprep.mubr.f32.mxu0 %v10240_v19  ;;  %v10341_v42 = vsub.f32 %v10198_v6, %v3608_v14  ;;  %v3766_v14 = vand.u32 4294901760, %v10346_v8 }
 0x78b   :  { %7795 = vmatprep.subr.bf16.mxu0 %v7794_v12  ;;  %v7810_v5 = vpack.c.bf16 %v3754_v59, %v3747_v26  ;;  %v7842_v26 = vpack.c.bf16 %v10327_v51, %v10322_v39  ;;  %v4304_v39 = vld [vmem:[%s10915_s21 + $0x18] sm:$0xff] }
 0x78c   :  { %v3759_v6 = vand.u32 4294901760, %v10341_v42  ;;  %v3767_v36 = vsub.f32 %v10346_v8, %v3766_v14  ;;  %v7846_v59 = vpack.c.bf16 %v10346_v8, %v10341_v42  ;;  %v4306_v8 = vld [vmem:[%s10915_s21 + $0x28] sm:$0xff] }
 0x78e   :  { %7797 = vmatpush3.bf16.msra.mxu0 %v7794_v12  ;;  %v3760_v12 = vsub.f32 %v10341_v42, %v3759_v6  ;;  %v3768_v30 = vand.u32 4294901760, %v3767_v36  ;;  %v7910_v1 = vpack.c.bf16 %v3766_v14, %v3759_v6  ;;  %v4305_v42 = vld [vmem:[%s10915_s21 + $0x20] sm:$0xff]  ;;  %v4340_v14 = vand.u32 4294901760, %v4306_v8  ;;  %v4308_v36 = vld [vmem:[%s10915_s21 + $0x38] sm:$0xff] }
 0x78f   :  { %7799 = vmatprep.subr.bf16.mxu0 %v7798_v20  ;;  %v4337_v6 = vand.u32 4294901760, %v4305_v42  ;;  %v4346_v7 = vand.u32 4294901760, %v4308_v36 }
 0x790   :  { %v3761_v62 = vand.u32 4294901760, %v3760_v12  ;;  %v7850_v12 = vpack.c.bf16 %v10364_v25, %v10359_v17  ;;  %v4307_v25 = vld [vmem:[%s10915_s21 + $0x30] sm:$0xff] }
 0x791   :  { %v10511_v17 = vpack.c.bf16 %v4340_v14, %v4337_v6  ;;  %v4343_v0 = vand.u32 4294901760, %v4307_v25 }
 0x792   :  { %7801 = vmatpush3.bf16.msra.mxu0 %v7798_v20  ;;  %v7814_v15 = vpack.c.bf16 %v3768_v30, %v3761_v62  ;;  %v3782_v20 = vand.u32 4294901760, %v3781_v3  ;;  %v10526_v62 = vld [vmem:[%s10915_s21 + $0x40] sm:$0xff]  ;;  %v10531_v30 = vld [vmem:[%s10915_s21 + $0x48] sm:$0xff] }
 0x793   :  { %7803 = vmatprep.subr.bf16.mxu0 %v7802_v37  ;;  %v4349_v40 = vand.u32 4294901760, %v10526_v62  ;;  %v4352_v3 = vand.u32 4294901760, %v10531_v30 }
 0x796   :  { %7805 = vmatpush3.bf16.msra.mxu0 %v7802_v37  ;;  %v7818_v37 = vpack.c.bf16 %v3782_v20, %v3775_v47  ;;  %v10542_v47 = vld [vmem:[%s10915_s21 + $0x50] sm:$0xff]  ;;  %v10547_v20 = vld [vmem:[%s10915_s21 + $0x58] sm:$0xff] }
 0x797   :  { %7807 = vmatprep.subr.bf16.mxu0 %v7806_v56 }
 0x79a   :  { %7809 = vmatpush3.bf16.msra.mxu0 %v7806_v56  ;;  %v7838_v56 = vpack.c.bf16 %v10297_v24, %v10292_v27  ;;  %v4302_v27 = vld [vmem:[%s10915_s21 + $0x8] sm:$0xff]  ;;  %v4325_v24 = vand.u32 4294901760, %v4301_v48 }
 0x79b   :  { %7811 = vmatprep.subr.bf16.mxu0 %v7810_v5 }
 0x79e   :  { %7813 = vmatpush3.bf16.msra.mxu0 %v7810_v5  ;;  %v10521_v5 = vpack.c.bf16 %v4346_v7, %v4343_v0 }
 0x79f   :  { %7815 = vmatprep.subr.bf16.mxu0 %v7814_v15 }
 0x7a2   :  { %7817 = vmatpush3.bf16.msra.mxu0 %v7814_v15  ;;  %v10537_v15 = vpack.c.bf16 %v4352_v3, %v4349_v40 }
 0x7a3   :  { %7819 = vmatprep.subr.bf16.mxu0 %v7818_v37 }
 0x7a6   :  { %7821 = vmatpush3.bf16.msra.mxu0 %v7818_v37  ;;  %v10552_v37 = vld [vmem:[%s10915_s21 + $0x60] sm:$0xff] }
 0x7a7   :  { %7823 = vmatprep.subr.bf16.mxu0 %v7822_v22 }
 0x7a9   :  { %6638 = vmatmul.mubr.f32.vlgmr.msra.gmra.mrb[4].mxu0 %v10276_v44 }
 0x7aa   :  { %7825 = vmatpush3.bf16.msra.mxu0 %v7822_v22  ;;  %6672 = vmatprep.mubr.f32.mxu0 %v10253_v33  ;;  %v7886_v33 = vpack.c.bf16 %v3682_v55, %v3675_v34  ;;  %v7902_v34 = vpack.c.bf16 %v3738_v35, %v3731_v9  ;;  %v7906_v55 = vpack.c.bf16 %v3752_v38, %v3745_v52  ;;  %v4303_v35 = vld [vmem:[%s10915_s21 + $0x10] sm:$0xff]  ;;  %v4334_v52 = vand.u32 4294901760, %v4304_v39 }
 0x7ab   :  { %7827 = vmatprep.subr.bf16.mxu0 %v7826_v63  ;;  %v4331_v51 = vand.u32 4294901760, %v4303_v35  ;;  %v4355_v22 = vand.u32 4294901760, %v10542_v47 }
 0x7ad   :  { %v10501_v38 = vpack.c.bf16 %v4334_v52, %v4331_v51 }
 0x7ae   :  { %7829 = vmatpush3.bf16.msra.mxu0 %v7826_v63  ;;  %v4358_v63 = vand.u32 4294901760, %v10547_v20 }
 0x7af   :  { %7831 = vmatprep.subr.bf16.mxu0 %v7830_v41 }
 0x7b2   :  { %7833 = vmatpush3.bf16.msra.mxu0 %v7830_v41  ;;  %v10560_v41 = vld [vmem:[%s10915_s21 + $0x68] sm:$0xff] }
 0x7b3   :  { %7835 = vmatprep.subr.bf16.mxu0 %v7834_v28 }
 0x7b6   :  { %7837 = vmatpush3.bf16.msra.mxu0 %v7834_v28  ;;  %v4361_v28 = vand.u32 4294901760, %v10552_v37 }
 0x7b7   :  { %7839 = vmatprep.subr.bf16.mxu0 %v7838_v56 }
 0x7ba   :  { %7841 = vmatpush3.bf16.msra.mxu0 %v7838_v56  ;;  %v10566_v56 = vld [vmem:[%s10915_s21 + $0x70] sm:$0xff] }
 0x7bb   :  { %7843 = vmatprep.subr.bf16.mxu0 %v7842_v26 }
 0x7be   :  { %7845 = vmatpush3.bf16.msra.mxu0 %v7842_v26  ;;  %v10571_v26 = vld [vmem:[%s10915_s21 + $0x78] sm:$0xff] }
 0x7bf   :  { %7847 = vmatprep.subr.bf16.mxu0 %v7846_v59 }
 0x7c2   :  { %7849 = vmatpush3.bf16.msra.mxu0 %v7846_v59  ;;  %v4364_v59 = vand.u32 4294901760, %v10560_v41 }
 0x7c3   :  { %7851 = vmatprep.subr.bf16.mxu0 %v7850_v12 }
 0x7c6   :  { %7853 = vmatpush3.bf16.msra.mxu0 %v7850_v12  ;;  %v10575_v12 = vpack.c.bf16 %v4358_v63, %v4355_v22 }
 0x7c7   :  { %7855 = vmatprep.subr.bf16.mxu0 %v10135_v61 }
 0x7c9   :  { %6673 = vmatmul.mubr.f32.vlgmr.msra.gmra.mrb[4].mxu0 %v10284_v60 }
 0x7ca   :  { %7857 = vmatpush3.bf16.msra.mxu0 %v10135_v61  ;;  %6707 = vmatprep.mubr.f32.mxu0 %v3654_v4  ;;  %v7890_v4 = vpack.c.bf16 %v3696_v21, %v3689_v2  ;;  %v5078_v21 = vld [vmem:[%s10912_s18] ss:$0 sm:$0xff] }
 0x7cb   :  { %7859 = vmatprep.subr.bf16.mxu0 %v10142_v58 }
 0x7ce   :  { %7861 = vmatpush3.bf16.msra.mxu0 %v10142_v58 }
 0x7cf   :  { %7863 = vmatprep.subr.bf16.mxu0 %v10158_v11 }
 0x7d2   :  { %7865 = vmatpush3.bf16.msra.mxu0 %v10158_v11 }
 0x7d3   :  { %7867 = vmatprep.subr.bf16.mxu0 %v10168_v13 }
 0x7d6   :  { %7869 = vmatpush3.bf16.msra.mxu0 %v10168_v13 }
 0x7d7   :  { %7871 = vmatprep.subr.bf16.mxu0 %v10190_v43 }
 0x7da   :  { %7873 = vmatpush3.bf16.msra.mxu0 %v10190_v43 }
 0x7db   :  { %7875 = vmatprep.subr.bf16.mxu0 %v10218_v10 }
 0x7de   :  { %7877 = vmatpush3.bf16.msra.mxu0 %v10218_v10 }
 0x7df   :  { %7879 = vmatprep.subr.bf16.mxu0 %v10238_v49 }
 0x7e2   :  { %7881 = vmatpush3.bf16.msra.mxu0 %v10238_v49 }
 0x7e3   :  { %7883 = vmatprep.subr.bf16.mxu0 %v10266_v23 }
 0x7e6   :  { %7885 = vmatpush3.bf16.msra.mxu0 %v10266_v23 }
 0x7e7   :  { %7887 = vmatprep.subr.bf16.mxu0 %v7886_v33 }
 0x7e9   :  { %6708 = vmatmul.mubr.f32.vlgmr.msra.gmra.mrb[4].mxu0 %v3664_v18  ;;  %v4328_v18 = vand.u32 4294901760, %v4302_v27 }
 0x7ea   :  { %7889 = vmatpush3.bf16.msra.mxu0 %v7886_v33  ;;  %6742 = vmatprep.mubr.f32.mxu0 %v10240_v19  ;;  %v4367_v33 = vand.u32 4294901760, %v10566_v56 }
 0x7eb   :  { %7891 = vmatprep.subr.bf16.mxu0 %v7890_v4  ;;  %v10491_v9 = vpack.c.bf16 %v4328_v18, %v4325_v24 }
 0x7ed   :  { %7951 = vmatprep.subr.bf16.mxu1 %v10491_v9 }
 0x7ee   :  { %7893 = vmatpush3.bf16.msra.mxu0 %v7890_v4  ;;  %7953 = vmatpush3.bf16.msra.mxu1 %v10491_v9  ;;  %v4370_v4 = vand.u32 4294901760, %v10571_v26 }
 0x7ef   :  { %7895 = vmatprep.subr.bf16.mxu0 %v7894_v57  ;;  %7955 = vmatprep.subr.bf16.mxu1 %v10501_v38 }
 0x7f2   :  { %7897 = vmatpush3.bf16.msra.mxu0 %v7894_v57  ;;  %7957 = vmatpush3.bf16.msra.mxu1 %v10501_v38  ;;  %v10583_v57 = vpack.c.bf16 %v4364_v59, %v4361_v28 }
 0x7f3   :  { %7899 = vmatprep.subr.bf16.mxu0 %v7898_v32  ;;  %7959 = vmatprep.subr.bf16.mxu1 %v10511_v17 }
 0x7f6   :  { %7901 = vmatpush3.bf16.msra.mxu0 %v7898_v32  ;;  %7961 = vmatpush3.bf16.msra.mxu1 %v10511_v17  ;;  %v10592_v32 = vpack.c.bf16 %v4370_v4, %v4367_v33 }
 0x7f7   :  { %7903 = vmatprep.subr.bf16.mxu0 %v7902_v34  ;;  %7963 = vmatprep.subr.bf16.mxu1 %v10521_v5 }
 0x7fa   :  { %7905 = vmatpush3.bf16.msra.mxu0 %v7902_v34  ;;  %7965 = vmatpush3.bf16.msra.mxu1 %v10521_v5  ;;  %v10594_v34 = vsub.f32 %v4301_v48, %v4325_v24  ;;  %v10638_v24 = vsub.f32 %v4307_v25, %v4343_v0 }
 0x7fb   :  { %7907 = vmatprep.subr.bf16.mxu0 %v7906_v55  ;;  %7967 = vmatprep.subr.bf16.mxu1 %v10537_v15 }
 0x7fe   :  { %7909 = vmatpush3.bf16.msra.mxu0 %v7906_v55  ;;  %7969 = vmatpush3.bf16.msra.mxu1 %v10537_v15  ;;  %v10596_v55 = vsub.f32 %v4302_v27, %v4328_v18  ;;  %v10640_v18 = vsub.f32 %v4308_v36, %v4346_v7 }
 0x7ff   :  { %7911 = vmatprep.subr.bf16.mxu0 %v7910_v1  ;;  %7971 = vmatprep.subr.bf16.mxu1 %v10575_v12 }
 0x802   :  { %7913 = vmatpush3.bf16.msra.mxu0 %v7910_v1  ;;  %7973 = vmatpush3.bf16.msra.mxu1 %v10575_v12  ;;  %v4428_v1 = vand.u32 4294901760, %v10594_v34 }
 0x803   :  { %7915 = vmatprep.subr.bf16.mxu0 %v7914_v31  ;;  %7975 = vmatprep.subr.bf16.mxu1 %v10583_v57 }
 0x806   :  { %7917 = vmatpush3.bf16.msra.mxu0 %v7914_v31  ;;  %v4435_v31 = vand.u32 4294901760, %v10596_v55  ;;  %7977 = vmatpush3.bf16.msra.mxu1 %v10583_v57 }
 0x807   :  { %7919 = vmatprep.subr.bf16.mxu0 %v10135_v61  ;;  %7979 = vmatprep.subr.bf16.mxu1 %v10592_v32 }
 0x809   :  { %6743 = vmatmul.mubr.f32.vlgmr.msra.gmra.mrb[4].mxu0 %v10276_v44 }
 0x80a   :  { %7921 = vmatpush3.bf16.msra.mxu0 %v10135_v61  ;;  %6777 = vmatprep.mubr.f32.mxu0 %v10240_v19  ;;  %v5074_v61 = vld [vmem:[%s10906_s12] ss:$0 sm:$0xff] }
 0x80b   :  { %7923 = vmatprep.subr.bf16.mxu0 %v10142_v58  ;;  %7981 = vmatpush3.bf16.msra.mxu1 %v10592_v32 }
 0x80e   :  { %7925 = vmatpush3.bf16.msra.mxu0 %v10142_v58 }
 0x80f   :  { %7927 = vmatprep.subr.bf16.mxu0 %v10158_v11 }
 0x812   :  { %7929 = vmatpush3.bf16.msra.mxu0 %v10158_v11 }
 0x813   :  { %7931 = vmatprep.subr.bf16.mxu0 %v10168_v13 }
 0x816   :  { %7933 = vmatpush3.bf16.msra.mxu0 %v10168_v13 }
 0x817   :  { %7935 = vmatprep.subr.bf16.mxu0 %v10190_v43 }
 0x81a   :  { %7937 = vmatpush3.bf16.msra.mxu0 %v10190_v43 }
 0x81b   :  { %7939 = vmatprep.subr.bf16.mxu0 %v10218_v10 }
 0x81e   :  { %7941 = vmatpush3.bf16.msra.mxu0 %v10218_v10 }
 0x81f   :  { %7943 = vmatprep.subr.bf16.mxu0 %v10238_v49 }
 0x822   :  { %7945 = vmatpush3.bf16.msra.mxu0 %v10238_v49 }
 0x823   :  { %7947 = vmatprep.subr.bf16.mxu0 %v10266_v23 }
 0x826   :  { %7949 = vmatpush3.bf16.msra.mxu0 %v10266_v23 }
 0x829   :  { %6778 = vmatmul.mubr.f32.vlgmr.msra.gmra.mrb[4].mxu0 %v10276_v44 }
 0x83c   :  { %v6359_v58 = vpop.f32.mrb[2].mxu0 }
 0x83d   :  { %v8146_v11 = vadd.f32 %v6359_v58, %v5074_v61  ;;  %v2785_v13 = vpop.f32.mrb[3].mxu0  ;;  %v4436_v58 = vsub.f32 %v10596_v55, %v4435_v31 }
 0x83e   :  { %v8147_v43 = vadd.f32 %v5074_v61, %v2785_v13  ;;  %v4429_v61 = vsub.f32 %v10594_v34, %v4428_v1  ;;  %v10610_v13 = vsub.f32 %v4304_v39, %v4334_v52  ;;  %v10990_v52 = vand.u32 4294901760, %v10640_v18 }
 0x83f   :  { %v5009_v2 = vmul.f32 0.1, %v8146_v11  ;;  %v10608_v11 = vsub.f32 %v4303_v35, %v4331_v51  ;;  %v10991_v51 = vand.u32 4294901760, %v10638_v24 }
 0x840   :  { %v5008_v10 = vmul.f32 0.1, %v8147_v43  ;;  %v4430_v43 = vand.u32 4294901760, %v4429_v61  ;;  %v4478_v25 = vsub.f32 %v10640_v18, %v10990_v52 }
 0x841   :  { %5011 = vst [vmem:[#allocation10 + $0x8] sm:$0xff] %v5009_v2  ;;  %v4437_v2 = vand.u32 4294901760, %v4436_v58 }
 0x842   :  { %5010 = vst [vmem:[#allocation10] sm:$0xff] %v5008_v10  ;;  %v4442_v10 = vand.u32 4294901760, %v10608_v11  ;;  %v4479_v61 = vand.u32 4294901760, %v4478_v25 }
 0x8fc   :  { %v6779_v49 = vpop.f32.mrb[4].mxu0 }
 0x8fd   :  { %v8150_v19 = vadd.f32 %v6779_v49, %v5078_v21  ;;  %v4245_v46 = vpop.f32.mrb[5].mxu0  ;;  %v10615_v49 = vpack.c.bf16 %v4437_v2, %v4430_v43 }
 0x8fe   :  { %v8151_v45 = vadd.f32 %v5078_v21, %v4245_v46  ;;  %v4449_v21 = vand.u32 4294901760, %v10610_v13 }
 0x8ff   :  { %4257 = vadd.xlane.f32.xlu0 %v8150_v19  ;;  %7983 = vmatprep.subr.bf16.mxu1 %v10615_v49 }
 0x900   :  { %4255 = vadd.xlane.f32.xlu1 %v8151_v45  ;;  %v4450_v46 = vsub.f32 %v10610_v13, %v4449_v21 }
 0x98c   :  { %v4258_v50 = vpop.xlane.xlu0 %4257 }
 0x98d   :  { %v4260_v29 = vmul.f32 0.0078125, %v4258_v50  ;;  %v4256_v23 = vpop.xlane.xlu1 %4255  ;;  %v10625_v50 = vsub.f32 %v4306_v8, %v4340_v14  ;;  %v4471_v8 = vsub.f32 %v10638_v24, %v10991_v51  ;;  %v10653_v14 = vsub.f32 %v10531_v30, %v4352_v3 }
 0x98e   :  { %v4259_v44 = vmul.f32 0.0078125, %v4256_v23  ;;  %v4451_v23 = vand.u32 4294901760, %v4450_v46  ;;  %v10667_v30 = vsub.f32 %v10542_v47, %v4355_v22  ;;  %v10692_v22 = vsub.f32 %v10560_v41, %v4364_v59 }
 0x98f   :  { %v10477_v16 = vsub.f32 %v8150_v19, %v4260_v29  ;;  %v4443_v19 = vsub.f32 %v10608_v11, %v4442_v10  ;;  %v4472_v36 = vand.u32 4294901760, %v4471_v8  ;;  %v10988_v7 = vand.u32 4294901760, %v10653_v14 }
 0x990   :  { %v10479_v54 = vsub.f32 %v8151_v45, %v4259_v44  ;;  %v10623_v45 = vsub.f32 %v4305_v42, %v4337_v6  ;;  %v10650_v6 = vsub.f32 %v10526_v62, %v4349_v40  ;;  %v10670_v40 = vsub.f32 %v10547_v20, %v4358_v63 }
 0x991   :  { %v4264_v60 = vmul.f32 %v10477_v16, %v10477_v16  ;;  %v4444_v29 = vand.u32 4294901760, %v4443_v19  ;;  %v4492_v62 = vsub.f32 %v10653_v14, %v10988_v7  ;;  %v10672_v3 = vpack.c.bf16 %v4479_v61, %v4472_v36 }
 0x992   :  { %v4263_v53 = vmul.f32 %v10479_v54, %v10479_v54  ;;  %v4456_v44 = vand.u32 4294901760, %v10623_v45  ;;  %v10989_v0 = vand.u32 4294901760, %v10650_v6  ;;  %v10987_v19 = vand.u32 4294901760, %v10667_v30 }
 0x993   :  { %4267 = vadd.xlane.f32.xlu0 %v4264_v60  ;;  %v4463_v60 = vand.u32 4294901760, %v10625_v50  ;;  %v4493_v2 = vand.u32 4294901760, %v4492_v62  ;;  %v10986_v46 = vand.u32 4294901760, %v10670_v40  ;;  %v10687_v20 = vsub.f32 %v10552_v37, %v4361_v28 }
 0x994   :  { %4265 = vadd.xlane.f32.xlu1 %v4263_v53  ;;  %v10630_v53 = vpack.c.bf16 %v4451_v23, %v4444_v29  ;;  %v4457_v48 = vsub.f32 %v10623_v45, %v4456_v44  ;;  %v4485_v58 = vsub.f32 %v10650_v6, %v10989_v0  ;;  %v4499_v23 = vsub.f32 %v10667_v30, %v10987_v19 }
 0x995   :  { %v4464_v27 = vsub.f32 %v10625_v50, %v4463_v60  ;;  %v4506_v47 = vsub.f32 %v10670_v40, %v10986_v46  ;;  %v10704_v37 = vsub.f32 %v10566_v56, %v4367_v33  ;;  %v10709_v41 = vsub.f32 %v10571_v26, %v4370_v4 }
 0x996   :  { %v4458_v35 = vand.u32 4294901760, %v4457_v48  ;;  %v4486_v43 = vand.u32 4294901760, %v4485_v58  ;;  %v4500_v63 = vand.u32 4294901760, %v4499_v23  ;;  %v10730_v23 = vpack.c.bf16 %v10625_v50, %v10623_v45 }
 0x997   :  { %v4465_v39 = vand.u32 4294901760, %v4464_v27  ;;  %v4507_v48 = vand.u32 4294901760, %v4506_v47  ;;  %v10985_v27 = vand.u32 4294901760, %v10687_v20  ;;  %v10983_v25 = vand.u32 4294901760, %v10704_v37 }
 0x998   :  { %v10676_v29 = vpack.c.bf16 %v4493_v2, %v4486_v43  ;;  %v10982_v36 = vand.u32 4294901760, %v10709_v41  ;;  %v8014_v43 = vpack.c.bf16 %v10596_v55, %v10594_v34  ;;  %v10726_v2 = vpack.c.bf16 %v10610_v13, %v10608_v11 }
 0x999   :  { %v10644_v42 = vpack.c.bf16 %v4465_v39, %v4458_v35  ;;  %v10984_v35 = vand.u32 4294901760, %v10692_v22  ;;  %v10696_v39 = vpack.c.bf16 %v4507_v48, %v4500_v63  ;;  %v4513_v8 = vsub.f32 %v10687_v20, %v10985_v27 }
 0x99a   :  { %v4527_v56 = vsub.f32 %v10704_v37, %v10983_v25  ;;  %v4534_v33 = vsub.f32 %v10709_v41, %v10982_v36  ;;  %v10734_v47 = vpack.c.bf16 %v10640_v18, %v10638_v24  ;;  %v10738_v63 = vpack.c.bf16 %v10653_v14, %v10650_v6  ;;  %v5079_v25 = vld [vmem:[%s10913_s19] ss:$0 sm:$0xff]  ;;  %s8400_s19 = smov [#allocation10]  }
 0x99b   :  { %v4520_v28 = vsub.f32 %v10692_v22, %v10984_v35  ;;  %v4514_v59 = vand.u32 4294901760, %v4513_v8  ;;  %v10742_v48 = vpack.c.bf16 %v10670_v40, %v10667_v30  ;;  %v10746_v8 = vpack.c.bf16 %v10692_v22, %v10687_v20 }
 0x99c   :  { %v4528_v4 = vand.u32 4294901760, %v4527_v56  ;;  %v4535_v58 = vand.u32 4294901760, %v4534_v33  ;;  %v8086_v34 = vpack.c.bf16 %v4463_v60, %v4456_v44  ;;  %v11079_v55 = vand.u32 4294901760, %v10638_v24 }
 0x99d   :  { %v4521_v61 = vand.u32 4294901760, %v4520_v28  ;;  %v10750_v28 = vpack.c.bf16 %v10709_v41, %v10704_v37  ;;  %v11081_v11 = vand.u32 4294901760, %v10650_v6  ;;  %v11082_v13 = vand.u32 4294901760, %v10653_v14 }
 0x99e   :  { %v8010_v62 = vpack.c.bf16 %v4535_v58, %v4528_v4  ;;  %v11084_v45 = vand.u32 4294901760, %v10670_v40  ;;  %v11085_v44 = vand.u32 4294901760, %v10687_v20  ;;  %v11086_v60 = vand.u32 4294901760, %v10692_v22 }
 0x99f   :  { %v8006_v26 = vpack.c.bf16 %v4521_v61, %v4514_v59 }
 0x9a0   :  { %v8102_v24 = vpack.c.bf16 %v11086_v60, %v11085_v44 }
 0xa20   :  { %v4268_v59 = vpop.xlane.xlu0 %4267 }
 0xa21   :  { %v4270_v61 = vmul.f32 0.0078125, %v4268_v59  ;;  %v4266_v56 = vpop.xlane.xlu1 %4265  ;;  %v5080_v59 = vld [vmem:[%s10914_s20] ss:$0 sm:$0xff]  ;;  %s5032_s20 = sshll.u32 %s8400_s19, 4  ;;  %s5033_s20 = int_to_ptr.vmem [resolvable:$true] %s5032_s20 }
 0xa22   :  { %v4269_v33 = vmul.f32 0.0078125, %v4266_v56  ;;  %s8357_s17 = scalar_lea.vmem %s5033_s20, 256  ;;  %p8362_p5 = scmp.lt.s32.totalorder %s5033_s20, %s5033_s20 }
 0xa23   :  { %v4272_v4 = vadd.f32 1e-05, %v4270_v61  ;;  %p8358_p4 = scmp.ne.s32.totalorder %s5033_s20, %s8357_s17  ;;  %p8363_p6 = scmp.lt.s32.totalorder %s8357_s17, %s8357_s17 }
 0xa24   :  { %v4271_v58 = vadd.f32 1e-05, %v4269_v33 }
 0xa25   :  { %8257 = vrsqrt.f32 %v4272_v4  ;;  %p8364_p7 = por %p8363_p6, %p8362_p5 }
 0xa26   :  { %8259 = vrsqrt.f32 %v4271_v58 }
 0xa27   :  { %p8365_p8 = pnand %p8364_p7, %p8358_p4 }
 0xa2f   :  { %v8258_v36 = vpop.eup %8257 }
 0xa30   :  { %v8260_v35 = vpop.eup %8259  ;;  %v4276_v27 = vmul.f32 %v8258_v36, %v10477_v16 }
 0xa31   :  { %v4275_v46 = vmul.f32 %v8260_v35, %v10479_v54 }
 0xa32   :  { %v4285_v19 = vmul.f32 %v5079_v25, %v4276_v27 }
 0xa33   :  { %v4284_v56 = vmul.f32 %v5079_v25, %v4275_v46 }
 0xa34   :  { %v4294_v61 = vadd.f32 %v5080_v59, %v4285_v19 }
 0xa35   :  { %v4293_v33 = vadd.f32 %v5080_v59, %v4284_v56 }
 0xa36   :  { %vm4296_vm7 = vcmp.ge.f32.partialorder %v4294_v61, 0.0  ;;  %v4298_v4 = vmul.f32 0.01, %v4294_v61 }
 0xa37   :  { %vm4295_vm8 = vcmp.ge.f32.partialorder %v4293_v33, 0.0  ;;  %v4297_v58 = vmul.f32 0.01, %v4293_v33 }
 0xa38   :  { %v4300_v7 = vsel %vm4296_vm7, %v4294_v61, %v4298_v4 }
 0xa39   :  { %v4299_v0 = vsel %vm4295_vm8, %v4293_v33, %v4297_v58  ;;  %v10760_v52 = vand.u32 4294901760, %v4300_v7 }
 0xa3a   :  { %v10762_v51 = vand.u32 4294901760, %v4299_v0 }
 0xa3b   :  { %v10765_v16 = vsub.f32 %v4300_v7, %v10760_v52 }
 0xa3c   :  { %v4406_v54 = vsub.f32 %v4299_v0, %v10762_v51 }
 0xa3d   :  { %v4417_v27 = vand.u32 4294901760, %v10765_v16 }
 0xa3e   :  { %v4407_v46 = vand.u32 4294901760, %v4406_v54 }
 0xa3f   :  { %v4418_v19 = vsub.f32 %v10765_v16, %v4417_v27 }
 0xa40   :  { %v4408_v35 = vsub.f32 %v4406_v54, %v4407_v46 }
 0xa41   :  { %v4419_v36 = vand.u32 4294901760, %v4418_v19 }
 0xa42   :  { %v4409_v25 = vand.u32 4294901760, %v4408_v35 }
 0xa44   :  { %6812 = vmatprep.mubr.f32.mxu1 %v4409_v25 }
 0xa45   :  { %6813 = vmatmul.mubr.f32.vlgmr.msra.gmra.mrb[4].mxu1 %v4419_v36 }
 0xa46   :  { %7985 = vmatpush3.bf16.msra.mxu1 %v10615_v49  ;;  %6847 = vmatprep.mubr.f32.mxu1 %v10762_v51  ;;  %v8078_v49 = vpack.c.bf16 %v4435_v31, %v4428_v1  ;;  %v11080_v1 = vand.u32 4294901760, %v10640_v18  ;;  %v11087_v18 = vand.u32 4294901760, %v10704_v37 }
 0xa47   :  { %7987 = vmatprep.subr.bf16.mxu1 %v10630_v53 }
 0xa48   :  { %v8090_v31 = vpack.c.bf16 %v11080_v1, %v11079_v55 }
 0xa4a   :  { %7989 = vmatpush3.bf16.msra.mxu1 %v10630_v53  ;;  %v8082_v53 = vpack.c.bf16 %v4449_v21, %v4442_v10  ;;  %v8094_v10 = vpack.c.bf16 %v11082_v13, %v11081_v11  ;;  %v11083_v21 = vand.u32 4294901760, %v10667_v30 }
 0xa4b   :  { %7991 = vmatprep.subr.bf16.mxu1 %v10644_v42 }
 0xa4c   :  { %v8098_v50 = vpack.c.bf16 %v11084_v45, %v11083_v21 }
 0xa4e   :  { %7993 = vmatpush3.bf16.msra.mxu1 %v10644_v42  ;;  %v11088_v42 = vand.u32 4294901760, %v10709_v41 }
 0xa4f   :  { %7995 = vmatprep.subr.bf16.mxu1 %v10672_v3 }
 0xa50   :  { %v8106_v6 = vpack.c.bf16 %v11088_v42, %v11087_v18 }
 0xa52   :  { %7997 = vmatpush3.bf16.msra.mxu1 %v10672_v3 }
 0xa53   :  { %7999 = vmatprep.subr.bf16.mxu1 %v10676_v29 }
 0xa56   :  { %8001 = vmatpush3.bf16.msra.mxu1 %v10676_v29 }
 0xa57   :  { %8003 = vmatprep.subr.bf16.mxu1 %v10696_v39 }
 0xa5a   :  { %8005 = vmatpush3.bf16.msra.mxu1 %v10696_v39 }
 0xa5b   :  { %8007 = vmatprep.subr.bf16.mxu1 %v8006_v26 }
 0xa5e   :  { %8009 = vmatpush3.bf16.msra.mxu1 %v8006_v26 }
 0xa5f   :  { %8011 = vmatprep.subr.bf16.mxu1 %v8010_v62 }
 0xa62   :  { %8013 = vmatpush3.bf16.msra.mxu1 %v8010_v62 }
 0xa63   :  { %8015 = vmatprep.subr.bf16.mxu1 %v8014_v43 }
 0xa65   :  { %6848 = vmatmul.mubr.f32.vlgmr.msra.gmra.mrb[4].mxu1 %v10760_v52 }
 0xa66   :  { %8017 = vmatpush3.bf16.msra.mxu1 %v8014_v43  ;;  %6882 = vmatprep.mubr.f32.mxu1 %v4406_v54 }
 0xa67   :  { %8019 = vmatprep.subr.bf16.mxu1 %v10726_v2 }
 0xa6a   :  { %8021 = vmatpush3.bf16.msra.mxu1 %v10726_v2 }
 0xa6b   :  { %8023 = vmatprep.subr.bf16.mxu1 %v10730_v23 }
 0xa6e   :  { %8025 = vmatpush3.bf16.msra.mxu1 %v10730_v23 }
 0xa6f   :  { %8027 = vmatprep.subr.bf16.mxu1 %v10734_v47 }
 0xa72   :  { %8029 = vmatpush3.bf16.msra.mxu1 %v10734_v47 }
 0xa73   :  { %8031 = vmatprep.subr.bf16.mxu1 %v10738_v63 }
 0xa76   :  { %8033 = vmatpush3.bf16.msra.mxu1 %v10738_v63 }
 0xa77   :  { %8035 = vmatprep.subr.bf16.mxu1 %v10742_v48 }
 0xa7a   :  { %8037 = vmatpush3.bf16.msra.mxu1 %v10742_v48 }
 0xa7b   :  { %8039 = vmatprep.subr.bf16.mxu1 %v10746_v8 }
 0xa7e   :  { %8041 = vmatpush3.bf16.msra.mxu1 %v10746_v8 }
 0xa7f   :  { %8043 = vmatprep.subr.bf16.mxu1 %v10750_v28 }
 0xa82   :  { %8045 = vmatpush3.bf16.msra.mxu1 %v10750_v28 }
 0xa83   :  { %8047 = vmatprep.subr.bf16.mxu1 %v10491_v9 }
 0xa85   :  { %6883 = vmatmul.mubr.f32.vlgmr.msra.gmra.mrb[4].mxu1 %v10765_v16 }
 0xa86   :  { %8049 = vmatpush3.bf16.msra.mxu1 %v10491_v9  ;;  %6917 = vmatprep.mubr.f32.mxu1 %v4407_v46 }
 0xa87   :  { %8051 = vmatprep.subr.bf16.mxu1 %v10501_v38 }
 0xa8a   :  { %8053 = vmatpush3.bf16.msra.mxu1 %v10501_v38 }
 0xa8b   :  { %8055 = vmatprep.subr.bf16.mxu1 %v10511_v17 }
 0xa8e   :  { %8057 = vmatpush3.bf16.msra.mxu1 %v10511_v17 }
 0xa8f   :  { %8059 = vmatprep.subr.bf16.mxu1 %v10521_v5 }
 0xa92   :  { %8061 = vmatpush3.bf16.msra.mxu1 %v10521_v5 }
 0xa93   :  { %8063 = vmatprep.subr.bf16.mxu1 %v10537_v15 }
 0xa96   :  { %8065 = vmatpush3.bf16.msra.mxu1 %v10537_v15 }
 0xa97   :  { %8067 = vmatprep.subr.bf16.mxu1 %v10575_v12 }
 0xa9a   :  { %8069 = vmatpush3.bf16.msra.mxu1 %v10575_v12 }
 0xa9b   :  { %8071 = vmatprep.subr.bf16.mxu1 %v10583_v57 }
 0xa9e   :  { %8073 = vmatpush3.bf16.msra.mxu1 %v10583_v57 }
 0xa9f   :  { %8075 = vmatprep.subr.bf16.mxu1 %v10592_v32 }
 0xaa2   :  { %8077 = vmatpush3.bf16.msra.mxu1 %v10592_v32 }
 0xaa3   :  { %8079 = vmatprep.subr.bf16.mxu1 %v8078_v49 }
 0xaa5   :  { %6918 = vmatmul.mubr.f32.vlgmr.msra.gmra.mrb[4].mxu1 %v4417_v27 }
 0xaa6   :  { %8081 = vmatpush3.bf16.msra.mxu1 %v8078_v49  ;;  %6952 = vmatprep.mubr.f32.mxu1 %v10762_v51 }
 0xaa7   :  { %8083 = vmatprep.subr.bf16.mxu1 %v8082_v53 }
 0xaaa   :  { %8085 = vmatpush3.bf16.msra.mxu1 %v8082_v53 }
 0xaab   :  { %8087 = vmatprep.subr.bf16.mxu1 %v8086_v34 }
 0xaae   :  { %8089 = vmatpush3.bf16.msra.mxu1 %v8086_v34 }
 0xaaf   :  { %8091 = vmatprep.subr.bf16.mxu1 %v8090_v31 }
 0xab2   :  { %8093 = vmatpush3.bf16.msra.mxu1 %v8090_v31 }
 0xab3   :  { %8095 = vmatprep.subr.bf16.mxu1 %v8094_v10 }
 0xab6   :  { %8097 = vmatpush3.bf16.msra.mxu1 %v8094_v10 }
 0xab7   :  { %8099 = vmatprep.subr.bf16.mxu1 %v8098_v50 }
 0xaba   :  { %8101 = vmatpush3.bf16.msra.mxu1 %v8098_v50 }
 0xabb   :  { %8103 = vmatprep.subr.bf16.mxu1 %v8102_v24 }
 0xabe   :  { %8105 = vmatpush3.bf16.msra.mxu1 %v8102_v24 }
 0xabf   :  { %8107 = vmatprep.subr.bf16.mxu1 %v8106_v6 }
 0xac2   :  { %8109 = vmatpush3.bf16.msra.mxu1 %v8106_v6 }
 0xac3   :  { %8111 = vmatprep.subr.bf16.mxu1 %v10491_v9 }
 0xac5   :  { %6953 = vmatmul.mubr.f32.vlgmr.msra.gmra.mrb[4].mxu1 %v10760_v52 }
 0xac6   :  { %8113 = vmatpush3.bf16.msra.mxu1 %v10491_v9  ;;  %6987 = vmatprep.mubr.f32.mxu1 %v10762_v51 }
 0xac7   :  { %8115 = vmatprep.subr.bf16.mxu1 %v10501_v38 }
 0xaca   :  { %8117 = vmatpush3.bf16.msra.mxu1 %v10501_v38 }
 0xacb   :  { %8119 = vmatprep.subr.bf16.mxu1 %v10511_v17 }
 0xace   :  { %8121 = vmatpush3.bf16.msra.mxu1 %v10511_v17 }
 0xacf   :  { %8123 = vmatprep.subr.bf16.mxu1 %v10521_v5 }
 0xad2   :  { %8125 = vmatpush3.bf16.msra.mxu1 %v10521_v5 }
 0xad3   :  { %8127 = vmatprep.subr.bf16.mxu1 %v10537_v15 }
 0xad6   :  { %8129 = vmatpush3.bf16.msra.mxu1 %v10537_v15 }
 0xad7   :  { %8131 = vmatprep.subr.bf16.mxu1 %v10575_v12 }
 0xada   :  { %8133 = vmatpush3.bf16.msra.mxu1 %v10575_v12 }
 0xadb   :  { %8135 = vmatprep.subr.bf16.mxu1 %v10583_v57 }
 0xade   :  { %8137 = vmatpush3.bf16.msra.mxu1 %v10583_v57 }
 0xadf   :  { %8139 = vmatprep.subr.bf16.mxu1 %v10592_v32 }
 0xae2   :  { %8141 = vmatpush3.bf16.msra.mxu1 %v10592_v32 }
 0xae5   :  { %6988 = vmatmul.mubr.f32.vlgmr.msra.gmra.mrb[4].mxu1 %v10760_v52 }
 0xae6   :  { %8368 = shalt.err (!%p8365_p8)
}
 0xae7   :  { %s8369_s24 = scalar_lea.hbm %s10917_s23, 256 }
 0xae8   :  { %p8370_p9 = scmp.ne.s32.totalorder %s10917_s23, %s8369_s24  ;;  %p8373_p10 = scmp.lt.u32.totalorder %s8369_s24, %s10917_s23 }
 0xaea   :  { %p8375_p11 = pnand %p8373_p10, %p8370_p9 }
 0xaec   :  { %8378 = shalt.err (!%p8375_p11)
}
 0xaed   :  { %5038 = dma.vmem_to_hbm [thread:$0]  %s5033_s20, 256, %s10917_s23, [#allocation4], %s8389_s8, %s8389_s8, %s8390_s4   ;;  %vm5024_vm9 = vcmask 23552  }
 0xaee   :  { %v5081_v9 = vld [vmem:[%s10916_s22] ss:$0 sm:$0xff]  ;;  %s11089_s8 = sld [smem:[#allocation34_spill]] }
 0xbb8   :  { %v6989_v38 = vpop.f32.mrb[4].mxu1 }
 0xbb9   :  { %v8152_v17 = vadd.f32 %v6989_v38, %v5081_v9  ;;  %v4998_v5 = vpop.f32.mrb[5].mxu1 }
 0xbba   :  { %v8153_v15 = vadd.f32 %v5081_v9, %v4998_v5 }
 0xbbb   :  { %v5013_v12 = vsub.f32 0.0, %v8152_v17 }
 0xbbc   :  { %v5012_v57 = vsub.f32 0.0, %v8153_v15 }
 0xbbd   :  { %v5016_v32 = vmul.f32 1.442695, %v5013_v12 }
 0xbbe   :  { %v5014_v51 = vmul.f32 1.442695, %v5012_v57 }
 0xbbf   :  { %8261 = vpow2.f32 %v5016_v32 }
 0xbc0   :  { %8263 = vpow2.f32 %v5014_v51 }
 0xbc9   :  { %v8262_v52 = vpop.eup %8261 }
 0xbca   :  { %v8264_v14 = vpop.eup %8263  ;;  %v5019_v0 = vadd.f32 1.0, %v8262_v52 }
 0xbcb   :  { %v5018_v7 = vadd.f32 1.0, %v8264_v14 }
 0xbcc   :  { %8265 = vrcp.f32 %v5019_v0 }
 0xbcd   :  { %8267 = vrcp.f32 %v5018_v7 }
 0xbd6   :  { %v8266_v30 = vpop.eup %8265 }
 0xbd7   :  { %v8268_v40 = vpop.eup %8267  ;;  %5026 = vst.msk [vmem:[%s11089_s8 + $0x8] sm:$0xff] %vm5024_vm9, %v8266_v30 }
 0xbd8   :  { %5025 = vst.msk [vmem:[%s11089_s8] sm:$0xff] %vm5024_vm9, %v8268_v40 }
 0xbd9   :  { %8385 = dma.done.wait [#allocation4], 256  }
 0xbda   :  { %8386 = vsyncadd [#allocation4], 4294967040 }
 0xbdb   :  { %5046 = vsyncpa [#allocation3], 1 }
 0xbdc   :  { %5047 = vsyncpa [#allocation6], 1 }
 0xbdd   :  { %5048 = vsyncpa [#allocation9], 1 }
 0xbde   :  { %5049 = vsyncpa [#allocation4], 1 }

</bundles_post_ra>
